<compile_context>
chip_gen: v7x
topology: tpu7x:2x2x1
jax: 0.10.0
libtpu: 0.0.40
codegen_flags: <defaults>
</compile_context>

<pallas_src>
import functools

import jax
import jax.numpy as jnp
from jax.experimental import pallas as pl
from jax.experimental.pallas import tpu as pltpu

_LANE = 128


def _im2col_3x3(x_f32, H, W, C, out_dtype):
    """Build the (H*W, 9*C) im2col operand for a 3x3 / pad=1 conv.

    The zero halo is built with concats (no scratch, no full-buffer clears);
    padding/slicing is done in f32 (native 32-bit layout), each tap slice is
    cast to the matmul dtype, and taps are stacked along the lane-aligned K
    axis so a single MXU matmul performs the whole convolution.
    """
    zrow = jnp.zeros((1, W, C), jnp.float32)
    zcol = jnp.zeros((H + 2, 1, C), jnp.float32)
    xp = jnp.concatenate([zrow, x_f32, zrow], axis=0)      # (H+2, W,   C)
    xp = jnp.concatenate([zcol, xp, zcol], axis=1)         # (H+2, W+2, C)
    cols = [
        xp[dy:dy + H, dx:dx + W, :].reshape(H * W, C).astype(out_dtype)
        for dy in range(3) for dx in range(3)
    ]
    return jnp.concatenate(cols, axis=-1)                  # (H*W, 9*C)


def _basic_block_kernel(x_ref, w1_ref, w2_ref, b1_ref, b2_ref, o_ref, *,
                        H, W, C, compute_dtype):
    """Fused conv3x3 -> (+bias) -> ReLU -> conv3x3 -> (+bias) -> +identity -> ReLU.

    One grid step = one image.
      x_ref  : (1, H, W, C)   input tile, C = channels padded to 128 (f32)
      w1_ref : (9*C, C)       conv1 weights, BN1 scale folded, im2col-K order
      w2_ref : (9*C, C)       conv2 weights, BN2 scale folded
      b1_ref : (1, C)         folded BN1 bias (f32)
      b2_ref : (1, C)         folded BN2 bias (f32)
      o_ref  : (1, H, W, C)   output tile (f32)
    """
    x = x_ref[0]                                           # (H, W, C) f32

    # conv1 (+ bn1 scale folded into w1) + bias + relu — single MXU matmul.
    col1 = _im2col_3x3(x, H, W, C, compute_dtype)
    h1 = jnp.maximum(
        jnp.dot(col1, w1_ref[...], preferred_element_type=jnp.float32)
        + b1_ref[...],
        0.0)                                               # (H*W, C) f32

    # conv2 (+ bn2 scale folded into w2) + bias + identity + relu.
    col2 = _im2col_3x3(h1.reshape(H, W, C), H, W, C, compute_dtype)
    out = (jnp.dot(col2, w2_ref[...], preferred_element_type=jnp.float32)
           + b2_ref[...]
           + x.reshape(H * W, C))                          # exact f32 residual
    o_ref[...] = jnp.maximum(out, 0.0).reshape(1, H, W, C)


def basic_block_forward(x_nchw, w1, w2, bn1, bn2, eps=1e-5,
                        compute_dtype=jnp.bfloat16):
    """x_nchw: (N, C, H, W) f32.  w1: (P, C, 3, 3), w2: (P, P, 3, 3) (OIHW).
    bn1/bn2: dicts with gamma, beta, mean, var of shape (P,)."""
    N, Cin, H, W = x_nchw.shape
    P = w1.shape[0]
    assert Cin == P, "identity path requires inplanes == planes (no downsample)"

    Cp = ((Cin + _LANE - 1) // _LANE) * _LANE              # lane-dense channels

    # Fold BatchNorm (inference) into the weights (scale) and a bias.
    s1 = bn1["gamma"] / jnp.sqrt(bn1["var"] + eps)
    b1 = bn1["beta"] - bn1["mean"] * s1
    s2 = bn2["gamma"] / jnp.sqrt(bn2["var"] + eps)
    b2 = bn2["beta"] - bn2["mean"] * s2

    def pack_w(w_oihw, scale):
        # Fold BN scale (per output channel), OIHW -> HWIO, pad channels to Cp,
        # flatten (dy, dx, cin) -> K so it matches the im2col K ordering.
        w = (w_oihw * scale[:, None, None, None]).astype(jnp.float32)
        w = jnp.transpose(w, (2, 3, 1, 0))                 # (3, 3, Cin, P)
        w = jnp.pad(w, ((0, 0), (0, 0), (0, Cp - w.shape[2]), (0, Cp - w.shape[3])))
        return w.reshape(9 * Cp, Cp).astype(compute_dtype)

    w1_k = pack_w(w1, s1)
    w2_k = pack_w(w2, s2)
    b1_k = jnp.pad(b1, (0, Cp - P)).reshape(1, Cp).astype(jnp.float32)
    b2_k = jnp.pad(b2, (0, Cp - P)).reshape(1, Cp).astype(jnp.float32)

    # NCHW -> NHWC + channel pad to the lane width.  No spatial pad: the halo
    # is built inside the kernel.
    x_nhwc = jnp.pad(jnp.transpose(x_nchw, (0, 2, 3, 1)).astype(jnp.float32),
                     ((0, 0), (0, 0), (0, 0), (0, Cp - Cin)))

    kernel = functools.partial(_basic_block_kernel, H=H, W=W, C=Cp,
                               compute_dtype=compute_dtype)

    out_nhwc = pl.pallas_call(
        kernel,
        out_shape=jax.ShapeDtypeStruct((N, H, W, Cp), jnp.float32),
        grid_spec=pltpu.PrefetchScalarGridSpec(
            num_scalar_prefetch=0,
            grid=(N,),
            in_specs=[
                pl.BlockSpec((1, H, W, Cp), lambda n: (n, 0, 0, 0)),
                pl.BlockSpec((9 * Cp, Cp), lambda n: (0, 0)),
                pl.BlockSpec((9 * Cp, Cp), lambda n: (0, 0)),
                pl.BlockSpec((1, Cp), lambda n: (0, 0)),
                pl.BlockSpec((1, Cp), lambda n: (0, 0)),
            ],
            out_specs=pl.BlockSpec((1, H, W, Cp), lambda n: (n, 0, 0, 0)),
        ),
        compiler_params=pltpu.CompilerParams(
            dimension_semantics=("parallel",)),
    )(x_nhwc, w1_k, w2_k, b1_k, b2_k)

    # Drop channel padding, NHWC -> NCHW (PyTorch convention).
    return jnp.transpose(out_nhwc[..., :P], (0, 3, 1, 2))


# ----------------------------------------------------------------------------
# References for correctness checking.
# ----------------------------------------------------------------------------
def _conv(x, w, **kw):
    return jax.lax.conv_general_dilated(
        x, w, window_strides=(1, 1), padding=((1, 1), (1, 1)),
        dimension_numbers=("NCHW", "OIHW", "NCHW"), **kw)


def _reference_f32(x, w1, w2, bn1, bn2, eps=1e-5):
    """Pure f32 reference (exact PyTorch semantics)."""
    def bn(x, p):
        s = p["gamma"] / jnp.sqrt(p["var"] + eps)
        b = p["beta"] - p["mean"] * s
        return x * s[None, :, None, None] + b[None, :, None, None]
    out = jax.nn.relu(bn(_conv(x, w1), bn1))
    out = bn(_conv(out, w2), bn2) + x
    return jax.nn.relu(out)


def _reference_cast_matched(x, w1, w2, bn1, bn2, eps=1e-5,
                            compute_dtype=jnp.bfloat16):
    """Reference applying the same bf16 operand rounding / f32 accumulation as
    the kernel, so the kernel's im2col mechanics can be checked tightly."""
    def fold(w, p):
        s = p["gamma"] / jnp.sqrt(p["var"] + eps)
        b = p["beta"] - p["mean"] * s
        return (w * s[:, None, None, None]).astype(compute_dtype), b
    w1c, b1 = fold(w1, bn1)
    w2c, b2 = fold(w2, bn2)
    def conv_lo(x, w):
        return _conv(x.astype(compute_dtype), w,
                     preferred_element_type=jnp.float32)
    h = jax.nn.relu(conv_lo(x, w1c) + b1[None, :, None, None])
    out = conv_lo(h, w2c) + b2[None, :, None, None] + x
    return jax.nn.relu(out)


if __name__ == "__main__":
    key = jax.random.PRNGKey(0)
    kx, kw1, kw2, kg1, kb1, km1, kv1, kg2, kb2, km2, kv2 = jax.random.split(key, 11)

    N, C, H, W = 2, 4, 16, 16   # inplanes = planes = 4, stride = 1, dilation = 1
    P = C

    x = jax.random.normal(kx, (N, C, H, W), dtype=jnp.float32)
    w1 = jax.random.normal(kw1, (P, C, 3, 3), dtype=jnp.float32) * 0.1
    w2 = jax.random.normal(kw2, (P, P, 3, 3), dtype=jnp.float32) * 0.1
    bn1 = dict(gamma=1.0 + 0.1 * jax.random.normal(kg1, (P,), jnp.float32),
               beta=0.1 * jax.random.normal(kb1, (P,), jnp.float32),
               mean=0.1 * jax.random.normal(km1, (P,), jnp.float32),
               var=1.0 + 0.1 * jnp.abs(jax.random.normal(kv1, (P,), jnp.float32)))
    bn2 = dict(gamma=1.0 + 0.1 * jax.random.normal(kg2, (P,), jnp.float32),
               beta=0.1 * jax.random.normal(kb2, (P,), jnp.float32),
               mean=0.1 * jax.random.normal(km2, (P,), jnp.float32),
               var=1.0 + 0.1 * jnp.abs(jax.random.normal(kv2, (P,), jnp.float32)))

    out = jax.block_until_ready(basic_block_forward(x, w1, w2, bn1, bn2))
    assert out.shape == (N, P, H, W)

    # Tight check of the kernel logic against a reference with identical bf16
    # operand rounding (only summation order differs -> tiny tolerance).
    ref_cast = jax.block_until_ready(_reference_cast_matched(x, w1, w2, bn1, bn2))
    assert jnp.allclose(out, ref_cast, atol=2e-3, rtol=2e-3), \
        "mismatch vs cast-matched reference"

    # Loose sanity check against pure-f32 PyTorch semantics (bf16 MXU operands
    # introduce ~1e-2 quantization error, per the review's note on tolerance).
    ref_f32 = jax.block_until_ready(_reference_f32(x, w1, w2, bn1, bn2))
    assert jnp.allclose(out, ref_f32, atol=1e-1, rtol=1e-1), \
        "mismatch vs f32 reference beyond bf16 quantization bound"

    print("KERNEL_OK")
</pallas_src>

<mosaic_0001>
module attributes {stable_mosaic.version = 11 : i64} {
  func.func @_basic_block_kernel(%arg0: i32, %arg1: memref<1x16x16x128xf32, #tpu.memory_space<vmem>>, %arg2: memref<1152x128xbf16, #tpu.memory_space<vmem>>, %arg3: memref<1152x128xbf16, #tpu.memory_space<vmem>>, %arg4: memref<1x128xf32, #tpu.memory_space<vmem>>, %arg5: memref<1x128xf32, #tpu.memory_space<vmem>>, %arg6: memref<1x16x16x128xf32, #tpu.memory_space<vmem>>) attributes {dimension_semantics = [#tpu.dimension_semantics<parallel>], iteration_bounds = array<i64: 2>, scalar_prefetch = 0 : i64, scratch_operands = 0 : i64, tpu.core_type = #tpu.core_type<tc>, window_params = [{transform_indices = @transform_0, window_bounds = array<i64: 1, 16, 16, 128>}, {pipeline_mode = #tpu.pipeline_mode<synchronous>, transform_indices = @transform_1, window_bounds = array<i64: 1152, 128>}, {pipeline_mode = #tpu.pipeline_mode<synchronous>, transform_indices = @transform_2, window_bounds = array<i64: 1152, 128>}, {pipeline_mode = #tpu.pipeline_mode<synchronous>, transform_indices = @transform_3, window_bounds = array<i64: 1, 128>}, {pipeline_mode = #tpu.pipeline_mode<synchronous>, transform_indices = @transform_4, window_bounds = array<i64: 1, 128>}, {transform_indices = @transform_5, window_bounds = array<i64: 1, 16, 16, 128>}]} {
    %c0 = arith.constant 0 : index
    %c0_0 = arith.constant 0 : index
    %c0_1 = arith.constant 0 : index
    %c0_2 = arith.constant 0 : index
    %0 = vector.load %arg1[%c0, %c0_0, %c0_1, %c0_2] : memref<1x16x16x128xf32, #tpu.memory_space<vmem>>, vector<1x16x16x128xf32>
    %1 = vector.shape_cast %0 : vector<1x16x16x128xf32> to vector<16x16x128xf32>
    %cst = arith.constant 0.000000e+00 : f32
    %2 = vector.broadcast %cst : f32 to vector<1x16x128xf32>
    %cst_3 = arith.constant 0.000000e+00 : f32
    %3 = vector.broadcast %cst_3 : f32 to vector<18x1x128xf32>
    %4 = tpu.concatenate %2, %1, %2 in 0 : vector<1x16x128xf32>, vector<16x16x128xf32>, vector<1x16x128xf32> -> vector<18x16x128xf32>
    %5 = tpu.concatenate %3, %4, %3 in 1 : vector<18x1x128xf32>, vector<18x16x128xf32>, vector<18x1x128xf32> -> vector<18x18x128xf32>
    %6 = vector.extract_strided_slice %5 {offsets = [0, 0, 0], sizes = [16, 16, 128], strides = [1, 1, 1]} : vector<18x18x128xf32> to vector<16x16x128xf32>
    %7 = vector.shape_cast %6 : vector<16x16x128xf32> to vector<256x128xf32>
    %8 = arith.truncf %7 : vector<256x128xf32> to vector<256x128xbf16>
    %9 = vector.extract_strided_slice %5 {offsets = [0, 1, 0], sizes = [16, 16, 128], strides = [1, 1, 1]} : vector<18x18x128xf32> to vector<16x16x128xf32>
    %10 = vector.shape_cast %9 : vector<16x16x128xf32> to vector<256x128xf32>
    %11 = arith.truncf %10 : vector<256x128xf32> to vector<256x128xbf16>
    %12 = vector.extract_strided_slice %5 {offsets = [0, 2, 0], sizes = [16, 16, 128], strides = [1, 1, 1]} : vector<18x18x128xf32> to vector<16x16x128xf32>
    %13 = vector.shape_cast %12 : vector<16x16x128xf32> to vector<256x128xf32>
    %14 = arith.truncf %13 : vector<256x128xf32> to vector<256x128xbf16>
    %15 = vector.extract_strided_slice %5 {offsets = [1, 0, 0], sizes = [16, 16, 128], strides = [1, 1, 1]} : vector<18x18x128xf32> to vector<16x16x128xf32>
    %16 = vector.shape_cast %15 : vector<16x16x128xf32> to vector<256x128xf32>
    %17 = arith.truncf %16 : vector<256x128xf32> to vector<256x128xbf16>
    %18 = vector.extract_strided_slice %5 {offsets = [1, 1, 0], sizes = [16, 16, 128], strides = [1, 1, 1]} : vector<18x18x128xf32> to vector<16x16x128xf32>
    %19 = vector.shape_cast %18 : vector<16x16x128xf32> to vector<256x128xf32>
    %20 = arith.truncf %19 : vector<256x128xf32> to vector<256x128xbf16>
    %21 = vector.extract_strided_slice %5 {offsets = [1, 2, 0], sizes = [16, 16, 128], strides = [1, 1, 1]} : vector<18x18x128xf32> to vector<16x16x128xf32>
    %22 = vector.shape_cast %21 : vector<16x16x128xf32> to vector<256x128xf32>
    %23 = arith.truncf %22 : vector<256x128xf32> to vector<256x128xbf16>
    %24 = vector.extract_strided_slice %5 {offsets = [2, 0, 0], sizes = [16, 16, 128], strides = [1, 1, 1]} : vector<18x18x128xf32> to vector<16x16x128xf32>
    %25 = vector.shape_cast %24 : vector<16x16x128xf32> to vector<256x128xf32>
    %26 = arith.truncf %25 : vector<256x128xf32> to vector<256x128xbf16>
    %27 = vector.extract_strided_slice %5 {offsets = [2, 1, 0], sizes = [16, 16, 128], strides = [1, 1, 1]} : vector<18x18x128xf32> to vector<16x16x128xf32>
    %28 = vector.shape_cast %27 : vector<16x16x128xf32> to vector<256x128xf32>
    %29 = arith.truncf %28 : vector<256x128xf32> to vector<256x128xbf16>
    %30 = vector.extract_strided_slice %5 {offsets = [2, 2, 0], sizes = [16, 16, 128], strides = [1, 1, 1]} : vector<18x18x128xf32> to vector<16x16x128xf32>
    %31 = vector.shape_cast %30 : vector<16x16x128xf32> to vector<256x128xf32>
    %32 = arith.truncf %31 : vector<256x128xf32> to vector<256x128xbf16>
    %33 = tpu.concatenate %8, %11, %14, %17, %20, %23, %26, %29, %32 in 1 : vector<256x128xbf16>, vector<256x128xbf16>, vector<256x128xbf16>, vector<256x128xbf16>, vector<256x128xbf16>, vector<256x128xbf16>, vector<256x128xbf16>, vector<256x128xbf16>, vector<256x128xbf16> -> vector<256x1152xbf16>
    %c0_4 = arith.constant 0 : index
    %c0_5 = arith.constant 0 : index
    %34 = vector.load %arg2[%c0_4, %c0_5] : memref<1152x128xbf16, #tpu.memory_space<vmem>>, vector<1152x128xbf16>
    %cst_6 = arith.constant dense<0.000000e+00> : vector<256x128xf32>
    %35 = tpu.matmul %33, %34, %cst_6 {dimension_numbers = #tpu.dot_dimension_numbers<[1], [0], [0], [1], [0, 0, 1, 1], [], []>} : vector<256x1152xbf16>, vector<1152x128xbf16>, vector<256x128xf32> -> vector<256x128xf32>
    %c0_7 = arith.constant 0 : index
    %c0_8 = arith.constant 0 : index
    %36 = vector.load %arg4[%c0_7, %c0_8] : memref<1x128xf32, #tpu.memory_space<vmem>>, vector<1x128xf32>
    %37 = vector.broadcast %36 : vector<1x128xf32> to vector<256x128xf32>
    %38 = arith.addf %35, %37 : vector<256x128xf32>
    %cst_9 = arith.constant 0.000000e+00 : f32
    %39 = vector.broadcast %cst_9 : f32 to vector<256x128xf32>
    %40 = arith.maximumf %38, %39 : vector<256x128xf32>
    %41 = vector.shape_cast %40 : vector<256x128xf32> to vector<16x16x128xf32>
    %cst_10 = arith.constant 0.000000e+00 : f32
    %42 = vector.broadcast %cst_10 : f32 to vector<1x16x128xf32>
    %cst_11 = arith.constant 0.000000e+00 : f32
    %43 = vector.broadcast %cst_11 : f32 to vector<18x1x128xf32>
    %44 = tpu.concatenate %42, %41, %42 in 0 : vector<1x16x128xf32>, vector<16x16x128xf32>, vector<1x16x128xf32> -> vector<18x16x128xf32>
    %45 = tpu.concatenate %43, %44, %43 in 1 : vector<18x1x128xf32>, vector<18x16x128xf32>, vector<18x1x128xf32> -> vector<18x18x128xf32>
    %46 = vector.extract_strided_slice %45 {offsets = [0, 0, 0], sizes = [16, 16, 128], strides = [1, 1, 1]} : vector<18x18x128xf32> to vector<16x16x128xf32>
    %47 = vector.shape_cast %46 : vector<16x16x128xf32> to vector<256x128xf32>
    %48 = arith.truncf %47 : vector<256x128xf32> to vector<256x128xbf16>
    %49 = vector.extract_strided_slice %45 {offsets = [0, 1, 0], sizes = [16, 16, 128], strides = [1, 1, 1]} : vector<18x18x128xf32> to vector<16x16x128xf32>
    %50 = vector.shape_cast %49 : vector<16x16x128xf32> to vector<256x128xf32>
    %51 = arith.truncf %50 : vector<256x128xf32> to vector<256x128xbf16>
    %52 = vector.extract_strided_slice %45 {offsets = [0, 2, 0], sizes = [16, 16, 128], strides = [1, 1, 1]} : vector<18x18x128xf32> to vector<16x16x128xf32>
    %53 = vector.shape_cast %52 : vector<16x16x128xf32> to vector<256x128xf32>
    %54 = arith.truncf %53 : vector<256x128xf32> to vector<256x128xbf16>
    %55 = vector.extract_strided_slice %45 {offsets = [1, 0, 0], sizes = [16, 16, 128], strides = [1, 1, 1]} : vector<18x18x128xf32> to vector<16x16x128xf32>
    %56 = vector.shape_cast %55 : vector<16x16x128xf32> to vector<256x128xf32>
    %57 = arith.truncf %56 : vector<256x128xf32> to vector<256x128xbf16>
    %58 = vector.extract_strided_slice %45 {offsets = [1, 1, 0], sizes = [16, 16, 128], strides = [1, 1, 1]} : vector<18x18x128xf32> to vector<16x16x128xf32>
    %59 = vector.shape_cast %58 : vector<16x16x128xf32> to vector<256x128xf32>
    %60 = arith.truncf %59 : vector<256x128xf32> to vector<256x128xbf16>
    %61 = vector.extract_strided_slice %45 {offsets = [1, 2, 0], sizes = [16, 16, 128], strides = [1, 1, 1]} : vector<18x18x128xf32> to vector<16x16x128xf32>
    %62 = vector.shape_cast %61 : vector<16x16x128xf32> to vector<256x128xf32>
    %63 = arith.truncf %62 : vector<256x128xf32> to vector<256x128xbf16>
    %64 = vector.extract_strided_slice %45 {offsets = [2, 0, 0], sizes = [16, 16, 128], strides = [1, 1, 1]} : vector<18x18x128xf32> to vector<16x16x128xf32>
    %65 = vector.shape_cast %64 : vector<16x16x128xf32> to vector<256x128xf32>
    %66 = arith.truncf %65 : vector<256x128xf32> to vector<256x128xbf16>
    %67 = vector.extract_strided_slice %45 {offsets = [2, 1, 0], sizes = [16, 16, 128], strides = [1, 1, 1]} : vector<18x18x128xf32> to vector<16x16x128xf32>
    %68 = vector.shape_cast %67 : vector<16x16x128xf32> to vector<256x128xf32>
    %69 = arith.truncf %68 : vector<256x128xf32> to vector<256x128xbf16>
    %70 = vector.extract_strided_slice %45 {offsets = [2, 2, 0], sizes = [16, 16, 128], strides = [1, 1, 1]} : vector<18x18x128xf32> to vector<16x16x128xf32>
    %71 = vector.shape_cast %70 : vector<16x16x128xf32> to vector<256x128xf32>
    %72 = arith.truncf %71 : vector<256x128xf32> to vector<256x128xbf16>
    %73 = tpu.concatenate %48, %51, %54, %57, %60, %63, %66, %69, %72 in 1 : vector<256x128xbf16>, vector<256x128xbf16>, vector<256x128xbf16>, vector<256x128xbf16>, vector<256x128xbf16>, vector<256x128xbf16>, vector<256x128xbf16>, vector<256x128xbf16>, vector<256x128xbf16> -> vector<256x1152xbf16>
    %c0_12 = arith.constant 0 : index
    %c0_13 = arith.constant 0 : index
    %74 = vector.load %arg3[%c0_12, %c0_13] : memref<1152x128xbf16, #tpu.memory_space<vmem>>, vector<1152x128xbf16>
    %cst_14 = arith.constant dense<0.000000e+00> : vector<256x128xf32>
    %75 = tpu.matmul %73, %74, %cst_14 {dimension_numbers = #tpu.dot_dimension_numbers<[1], [0], [0], [1], [0, 0, 1, 1], [], []>} : vector<256x1152xbf16>, vector<1152x128xbf16>, vector<256x128xf32> -> vector<256x128xf32>
    %c0_15 = arith.constant 0 : index
    %c0_16 = arith.constant 0 : index
    %76 = vector.load %arg5[%c0_15, %c0_16] : memref<1x128xf32, #tpu.memory_space<vmem>>, vector<1x128xf32>
    %77 = vector.broadcast %76 : vector<1x128xf32> to vector<256x128xf32>
    %78 = arith.addf %75, %77 : vector<256x128xf32>
    %79 = vector.shape_cast %1 : vector<16x16x128xf32> to vector<256x128xf32>
    %80 = arith.addf %78, %79 : vector<256x128xf32>
    %cst_17 = arith.constant 0.000000e+00 : f32
    %81 = vector.broadcast %cst_17 : f32 to vector<256x128xf32>
    %82 = arith.maximumf %80, %81 : vector<256x128xf32>
    %83 = vector.shape_cast %82 : vector<256x128xf32> to vector<1x16x16x128xf32>
    %c0_18 = arith.constant 0 : index
    %c0_19 = arith.constant 0 : index
    %c0_20 = arith.constant 0 : index
    %c0_21 = arith.constant 0 : index
    %84 = vector.load %arg6[%c0_18, %c0_19, %c0_20, %c0_21] : memref<1x16x16x128xf32, #tpu.memory_space<vmem>>, vector<1x16x16x128xf32>
    tpu.vector_store %arg6[%c0_18, %c0_19, %c0_20, %c0_21], %83 {strides = array<i32>} : memref<1x16x16x128xf32, #tpu.memory_space<vmem>>, vector<1x16x16x128xf32>,
    return
  }
  func.func @transform_0(%arg0: i32) -> (i32, i32, i32, i32) {
    %c0_i32 = arith.constant 0 : i32
    %c0_i32_0 = arith.constant 0 : i32
    %c0_i32_1 = arith.constant 0 : i32
    %c0_i32_2 = arith.constant 0 : i32
    return %arg0, %c0_i32, %c0_i32_0, %c0_i32_1 : i32, i32, i32, i32
  }
  func.func @transform_1(%arg0: i32) -> (i32, i32) {
    %c0_i32 = arith.constant 0 : i32
    %c0_i32_0 = arith.constant 0 : i32
    %c0_i32_1 = arith.constant 0 : i32
    return %c0_i32, %c0_i32_0 : i32, i32
  }
  func.func @transform_2(%arg0: i32) -> (i32, i32) {
    %c0_i32 = arith.constant 0 : i32
    %c0_i32_0 = arith.constant 0 : i32
    %c0_i32_1 = arith.constant 0 : i32
    return %c0_i32, %c0_i32_0 : i32, i32
  }
  func.func @transform_3(%arg0: i32) -> (i32, i32) {
    %c0_i32 = arith.constant 0 : i32
    %c0_i32_0 = arith.constant 0 : i32
    %c0_i32_1 = arith.constant 0 : i32
    return %c0_i32, %c0_i32_0 : i32, i32
  }
  func.func @transform_4(%arg0: i32) -> (i32, i32) {
    %c0_i32 = arith.constant 0 : i32
    %c0_i32_0 = arith.constant 0 : i32
    %c0_i32_1 = arith.constant 0 : i32
    return %c0_i32, %c0_i32_0 : i32, i32
  }
  func.func @transform_5(%arg0: i32) -> (i32, i32, i32, i32) {
    %c0_i32 = arith.constant 0 : i32
    %c0_i32_0 = arith.constant 0 : i32
    %c0_i32_1 = arith.constant 0 : i32
    %c0_i32_2 = arith.constant 0 : i32
    return %arg0, %c0_i32, %c0_i32_0, %c0_i32_1 : i32, i32, i32, i32
  }
}

</mosaic_0001>

<bundles_post_ra>
// kernel: tpu_custom_call.1
= control target key start
LH: loop header
LB: loop body
LE: loop exit
PB: predicated region body
PF: predicated region fallthrough
CT: control target
= control target key end

     0   :  { %10 = vsyncpa [#allocation3], 0  ;;  %s8835_s0 = inlined_call_operand.hbm [shape: f32[2,16,16,128], index: 0, kind: input, shape index: {}]   ;;  %s8836_s1 = inlined_call_operand.hbm [shape: bf16[1152,128], index: 1, kind: input, shape index: {}]   ;;  %s8837_s2 = inlined_call_operand.hbm [shape: bf16[1152,128], index: 2, kind: input, shape index: {}]   ;;  %s8838_s3 = inlined_call_operand.vmem [shape: f32[1,128], index: 3, kind: input, shape index: {}]   ;;  %s8839_s4 = inlined_call_operand.vmem [shape: f32[1,128], index: 4, kind: input, shape index: {}]   ;;  %s8840_s5 = inlined_call_operand.hbm [shape: f32[2,16,16,128], index: 5, kind: output, shape index: {}]  }
   0x1   :  { %12 = vsyncpa [#allocation3 + $0x1], 0 }
   0x2   :  { %13 = vsyncpa [#allocation6], 0 }
   0x3   :  { %14 = vsyncpa [#allocation4], 0 }
   0x4   :  { %16 = vsyncpa [#allocation4 + $0x1], 0  ;;  %s6313_s18 = smov 0   ;;  %s6315_s19 = smov 0  }
   0x5   :  { %s6317_s20 = smov 0   ;;  %s6319_s21 = smov 0  }
   0x6 LB: > { %s6334_s22 = sadd.s32 4294967295, %s6269_s21   ;;  %s4272_s23 = sadd.s32 4294967294, %s6269_s21   ;;  %s6269_s21 = sphi %s6319_s21, %s9078_s21   ;;  %s6265_s20 = sphi %s6317_s20, %s9077_s20   ;;  %s6261_s19 = sphi %s6315_s19, %s9076_s19   ;;  %s6257_s18 = sphi %s6313_s18, %s9075_s18  }
   0x7   : > { %p42_p0 = scmp.ne.s32.totalorder %s6261_s19, %s6257_s18  ;;  %p8841_p1 = scmp.eq.s32.totalorder %s6334_s22, 0 }
   0x8   : > { %p156_p3 = scmp.eq.s32.totalorder %s4272_s23, 1  ;;  %p4273_p5 = scmp.ge.s32.totalorder %s6269_s21, 1 }
   0x9   : > { %p6343_p4 = por %p8841_p1, %p42_p0  ;;  %p163_p7 = scmp.lt.s32.totalorder %s6269_s21, 3 }
   0xa   : > { %p6348_p6 = por %p156_p3, %p42_p0  ;;  %s6271_s27 = smov [#allocation5]  }
   0xb   : > { %s8875_s24 = scalar_select %p6343_p4, 1, 0 }
   0xc   : > { %s8876_s25 = scalar_select %p6348_p6, 1, 0 }
   0xd   : > { %p6353_p8 = pnand %p4273_p5, %p163_p7  ;;  %s175_s28 = sshll.u32 %s6271_s27, 4  ;;  %s6357_s28 = int_to_ptr.vmem [resolvable:$true] %s175_s28 }
   0xe   : > { %s6272_s30 = smov [#allocation7]   ;;  %s6113_s9 = scalar_lea.hbm %s8836_s1, 9216 }
   0xf   : > { %p5874_p9 = pneg %p6353_p8  ;;  %s188_s6 = sshll.u32 %s6272_s30, 4  ;;  %s6368_s6 = int_to_ptr.vmem [resolvable:$true] %s188_s6 }
  0x10   : > { %p6114_p12 = scmp.ne.s32.totalorder %s8836_s1, %s6113_s9  ;;  %p6120_p5 = scmp.lt.u32.totalorder %s6113_s9, %s8836_s1 }
  0x11   : > { %p6364_p11 = pnand %p5874_p9, %p8841_p1 }
  0x13   : > { %p6115_p13 = pneg %p6364_p11 }
  0x15   : > { %p6116_p0 = pnand %p6115_p13, %p6114_p12 }
  0x17   : > { %p6117_p3 = pneg %p6116_p0 }
  0x19   : > { %p6122_p7 = pnand %p6120_p5, %p6117_p3 }
  0x1b   : > { %6125 = shalt.err (!%p6122_p7)
}
  0x1c   : > { %s6126_s14 = scalar_lea.vmem %s6357_s28, 9216  ;;  %p6134_p2 = scmp.lt.s32.totalorder %s6357_s28, %s6357_s28 }
  0x1d   : > { %p6127_p9 = scmp.ne.s32.totalorder %s6357_s28, %s6126_s14  ;;  %p6135_p12 = scmp.lt.s32.totalorder %s6126_s14, %s6126_s14 }
  0x1f   : > { %p6129_p10 = pnand %p6127_p9, %p6115_p13  ;;  %p6136_p0 = por %p6135_p12, %p6134_p2 }
  0x21   : > { %p6130_p1 = pneg %p6129_p10 }
  0x23   : > { %p6137_p6 = pnand %p6136_p0, %p6130_p1 }
  0x25   : > { %6140 = shalt.err (!%p6137_p6)
}
  0x26   : > { %s6273_s15 = smov 64   ;;  %s6274_s16 = smov 4  }
  0x27   : > { %5877 = dma.hbm_to_vmem [thread:$0]  (!%p6364_p11), %s8836_s1, 9216, %s6357_s28, [#allocation6], %s6273_s15, %s6273_s15, %s6274_s16  }
  0x28   : > { %s6141_s7 = scalar_lea.hbm %s8837_s2, 9216 }
  0x29   : > { %p6142_p2 = scmp.ne.s32.totalorder %s8837_s2, %s6141_s7  ;;  %p6148_p10 = scmp.lt.u32.totalorder %s6141_s7, %s8837_s2 }
  0x2b   : > { %p6144_p1 = pnand %p6142_p2, %p6115_p13 }
  0x2d   : > { %p6145_p6 = pneg %p6144_p1 }
  0x2f   : > { %p6150_p3 = pnand %p6148_p10, %p6145_p6 }
  0x31   : > { %6153 = shalt.err (!%p6150_p3)
}
  0x32   : > { %s6154_s28 = scalar_lea.vmem %s6368_s6, 9216  ;;  %p6162_p12 = scmp.lt.s32.totalorder %s6368_s6, %s6368_s6 }
  0x33   : > { %p6155_p5 = scmp.ne.s32.totalorder %s6368_s6, %s6154_s28  ;;  %p6163_p0 = scmp.lt.s32.totalorder %s6154_s28, %s6154_s28 }
  0x35   : > { %p6157_p7 = pnand %p6155_p5, %p6115_p13  ;;  %p6164_p2 = por %p6163_p0, %p6162_p12 }
  0x37   : > { %p6158_p9 = pneg %p6157_p7 }
  0x39   : > { %p6165_p1 = pnand %p6164_p2, %p6158_p9 }
  0x3b   : > { %6168 = shalt.err (!%p6165_p1)
}
  0x3c   : > { %5880 = dma.hbm_to_vmem [thread:$0]  (!%p6364_p11), %s8837_s2, 9216, %s6368_s6, [#allocation6], %s6273_s15, %s6273_s15, %s6274_s16  }
  0x3d   : > { %s6423_s14 = sadd.s32 1, %s6269_s21   ;;  %s29_s29 = sadd.s32 1, %s6265_s20 }
  0x3e   : > { %s26_s17 = ssub.s32 %s6269_s21, %s6423_s14  ;;  %p36_p13 = scmp.ne.s32.totalorder %s6265_s20, %s6261_s19 }
  0x3f   : > { %p27_p6 = scmp.eq.s32.totalorder %s26_s17, 0  ;;  %p37_p10 = scmp.eq.s32.totalorder %s6269_s21, 0 }
  0x40   : > { %p8879_p3 = scmp.eq.s32.totalorder %s6334_s22, 1  ;;  %p5891_p7 = scmp.lt.s32.totalorder %s6269_s21, 2 }
  0x41   : > { %s6439_s27 = scalar_select %p27_p6, %s6265_s20, %s29_s29  }
  0x42   : > { %p6433_p5 = por %p8879_p3, %p36_p13  ;;  %p38_p9 = por %p37_p10, %p36_p13 }
  0x43   : > { %s208_s30 = sand.u32 1, %s6265_s20   ;;  %s4820_s6 = sshll.u32 %s6269_s21, 12 }
  0x44   : > { %s8880_s23 = scalar_select %p6433_p5, 1, 0 }
  0x45   : > { %s4277_s7 = sshll.u32 %s208_s30, 8  ;;  %s6446_s8 = scalar_lea.hbm %s8835_s0, %s4820_s6 }
  0x46   : > { %s212_s9 = scalar_lea.vmem [#allocation2], %s4277_s7  ;;  %p6450_p11 = pnand %p5891_p7, %p38_p9 }
  0x47   : > { %s219_s10 = sshll.u32 %s212_s9, 4  ;;  %s6454_s28 = scalar_lea.sflag [#allocation3], %s208_s30  ;;  %s6448_s10 = int_to_ptr.vmem [resolvable:$true] %s219_s10 }
  0x48   : > { %s6169_s12 = scalar_lea.hbm %s6446_s8, 4096  ;;  %p6171_p0 = pneg %p6450_p11 }
  0x49   : > { %p6170_p12 = scmp.ne.s32.totalorder %s6446_s8, %s6169_s12  ;;  %s6174_s17 = scalar_lea.hbm %s8835_s0, 8192 }
  0x4a   : > { %p6175_p13 = scmp.lt.u32.totalorder %s6446_s8, %s8835_s0  ;;  %p6176_p6 = scmp.lt.u32.totalorder %s6174_s17, %s6169_s12 }
  0x4b   : > { %p6172_p2 = pnand %p6171_p0, %p6170_p12  ;;  %p6178_p3 = scmp.lt.u32.totalorder %s6169_s12, %s6446_s8 }
  0x4c   : > { %p6177_p10 = por %p6176_p6, %p6175_p13 }
  0x4d   : > { %p6173_p1 = pneg %p6172_p2 }
  0x4e   : > { %p6179_p7 = por %p6178_p3, %p6177_p10 }
  0x50   : > { %p6180_p9 = pnand %p6179_p7, %p6173_p1 }
  0x52   : > { %6183 = shalt.err (!%p6180_p9)
}
  0x53   : > { %s6184_s30 = scalar_lea.vmem %s6448_s10, 4096  ;;  %s6275_s15 = smov [#allocation2]  }
  0x54   : > { %p6185_p12 = scmp.ne.s32.totalorder %s6448_s10, %s6184_s30  ;;  %s6189_s16 = sshll.u32 %s6275_s15, 4  ;;  %s6190_s16 = int_to_ptr.vmem [resolvable:$false] %s6189_s16 }
  0x55   : > { %s6191_s9 = scalar_lea.vmem %s6190_s16, 8192  ;;  %p6192_p4 = scmp.lt.s32.totalorder %s6448_s10, %s6190_s16 }
  0x56   : > { %p6187_p2 = pnand %p6185_p12, %p6171_p0  ;;  %p6193_p13 = scmp.lt.s32.totalorder %s6191_s9, %s6184_s30 }
  0x58   : > { %p6188_p5 = pneg %p6187_p2  ;;  %p6194_p6 = por %p6193_p13, %p6192_p4 }
  0x5a   : > { %p6195_p10 = pnand %p6194_p6, %p6188_p5 }
  0x5c   : > { %6198 = shalt.err (!%p6195_p10)
}
  0x5d   : > { %s6276_s12 = smov 128   ;;  %s6277_s13 = smov 8  }
  0x5e   : > { %5884 = dma.hbm_to_vmem [thread:$0]  (!%p6450_p11), %s6446_s8, 4096, %s6448_s10, %s6454_s28, %s6276_s12, %s6276_s12, %s6277_s13  }
  0x5f   : > { %231 = sbr.rel (%p6353_p8) target bundleno = 1169 (0x491), region = 40 }
  0x66   : > { %s6485_s29 = sand.u32 1, %s6261_s19   ;;  %p8882_p4 = scmp.ne.s32.totalorder %s8875_s24, 0 }
  0x67   : > { %s4281_s17 = sshll.u32 %s6485_s29, 8  ;;  %s234_s7 = scalar_lea.sflag [#allocation3], %s6485_s29 }
  0x68   : > { %s6491_s6 = scalar_lea.vmem [#allocation2], %s4281_s17 }
  0x69   : > { %6244 = dma.done.wait (%p8882_p4), %s234_s7, 4096  }
  0x6a   : > { %6246 = vsyncadd (%p8882_p4), %s234_s7, 4294963200  ;;  %p8883_p5 = scmp.eq.s32.totalorder %s6334_s22, 0 }
  0x6c   : > { %6248 = dma.done.wait (%p8883_p5), [#allocation6], 18432   ;;  %p8884_p8 = pmov %p8883_p5 }
  0x6d   : > { %vm338_vm0 = vcmask 1040384   ;;  %v6278_v0 = vmov 0.0   ;;  %vm521_vm1 = vcmask 1046528   ;;  %v5937_v9 = vld [vmem:[#allocation5 + $0x40] sm:$0xff]   ;;  %v5941_v14 = vld [vmem:[#allocation5 + $0x48] sm:$0xff]   ;;  %v5945_v18 = vld [vmem:[#allocation5 + $0x50] sm:$0xff]  }
  0x6e   : > { %6250 = vsyncadd (%p8884_p8), [#allocation6], 4294948864  ;;  %v6501_v1 = vrot.slane %v6278_v0, 7  ;;  %v5938_v11 = vld [vmem:[#allocation5] sm:$0xff]   ;;  %4822 = vmatprep.subr.bf16.mxu0 %v5937_v9  ;;  %v5942_v15 = vld [vmem:[#allocation5 + $0x8] sm:$0xff]   ;;  %vm6279_vm3 = vmmov 1  }
  0x6f   : > { %v5939_v12 = vld [vmem:[#allocation5 + $0xc0] sm:$0xff]   ;;  %4823 = vmatpush3.bf16.msra.mxu0 %v5938_v11  ;;  %v5943_v16 = vld [vmem:[#allocation5 + $0xc8] sm:$0xff]   ;;  %v5946_v19 = vld [vmem:[#allocation5 + $0x10] sm:$0xff]   ;;  %vm650_vm5 = vcmask 1045504   ;;  %s8692_s11 = scalar_lea.vmem [#allocation8], %s4281_s17  ;;  %s4821_s28 = sshll.u32 %s6334_s22, 12 }
  0x70   : > { %v6505_v2 = vsel %vm338_vm0, 0.0, %v6501_v1  ;;  %v6509_v3 = vsel %vm338_vm0, %v6501_v1, 0.0  ;;  %v523_v4 = vrot.slane %v6501_v1, 1  ;;  %v5940_v13 = vld [vmem:[#allocation5 + $0x80] sm:$0xff]   ;;  %4934 = vmatprep.subr.bf16.mxu1 %v5939_v12  ;;  %4824 = vmatprep.subr.bf16.mxu0 %v5941_v14  ;;  %v5944_v17 = vld [vmem:[#allocation5 + $0x88] sm:$0xff]   ;;  %v5947_v20 = vld [vmem:[#allocation5 + $0xd0] sm:$0xff]   ;;  %v6535_v46 = vpack.c.bf16 %v6501_v1, %v6501_v1  ;;  %s8786_s9 = scalar_lea.hbm %s8840_s5, %s4821_s28 }
  0x71   : > { %v522_v5 = vrot.slane %v6505_v2, 1  ;;  %v525_v6 = vrot.slane %v6509_v3, 1  ;;  %4935 = vmatpush3.bf16.msra.mxu1 %v5940_v13  ;;  %v5948_v21 = vld [vmem:[#allocation5 + $0x90] sm:$0xff]   ;;  %v5949_v22 = vld [vmem:[#allocation5 + $0x58] sm:$0xff]   ;;  %vm6520_vm2 = vmneg %vm338_vm0  ;;  %v651_v39 = vrot.slane %v6505_v2, 2  ;;  %v652_v41 = vrot.slane %v6501_v1, 2 }
  0x72   : > { %4936 = vmatprep.subr.bf16.mxu1 %v5943_v16  ;;  %v5950_v24 = vld [vmem:[#allocation5 + $0x18] sm:$0xff]   ;;  %v5953_v27 = vld [vmem:[#allocation5 + $0x60] sm:$0xff]   ;;  %v5957_v31 = vld [vmem:[#allocation5 + $0x68] sm:$0xff]   ;;  %v654_v43 = vrot.slane %v6509_v3, 2  ;;  %8890 = vst [vmem:[#allocation13_spill] sm:$0xff] %v6535_v46  ;;  %s4180_s30 = sshll.u32 %s8692_s11, 4  ;;  %s8788_s30 = int_to_ptr.vmem [resolvable:$true] %s4180_s30 }
  0x73   : > { %v524_v7 = vsel %vm521_vm1, %v522_v5, %v523_v4  ;;  %v526_v8 = vsel %vm521_vm1, %v523_v4, %v525_v6  ;;  %4825 = vmatpush3.bf16.msra.mxu0 %v5942_v15  ;;  %v5951_v25 = vld [vmem:[#allocation5 + $0xd8] sm:$0xff]   ;;  %v5954_v28 = vld [vmem:[#allocation5 + $0x20] sm:$0xff]   ;;  %v5958_v32 = vld [vmem:[#allocation5 + $0x28] sm:$0xff]   ;;  %v653_v49 = vsel %vm650_vm5, %v651_v39, %v652_v41  ;;  %s4167_s22 = scalar_lea.sflag [#allocation4], %s6485_s29  ;;  %s6199_s12 = scalar_lea.vmem %s8788_s30, 4096 }
  0x74   : > { %v6516_v10 = vpack.c.bf16 %v526_v8, %v524_v7  ;;  %4826 = vmatprep.subr.bf16.mxu0 %v5945_v18  ;;  %v5952_v26 = vld [vmem:[#allocation5 + $0x98] sm:$0xff]   ;;  %v5955_v29 = vld [vmem:[#allocation5 + $0xe0] sm:$0xff]   ;;  %v5959_v33 = vld [vmem:[#allocation5 + $0xe8] sm:$0xff]   ;;  %v655_v50 = vsel %vm650_vm5, %v652_v41, %v654_v43  ;;  %p6200_p11 = scmp.ne.s32.totalorder %s8788_s30, %s6199_s12  ;;  %p9072_p0 = scmp.ne.s32.totalorder %s8880_s23, 0 }
  0x75   : > { %4937 = vmatpush3.bf16.msra.mxu1 %v5944_v17  ;;  %v5956_v30 = vld [vmem:[#allocation5 + $0xa0] sm:$0xff]   ;;  %v5960_v34 = vld [vmem:[#allocation5 + $0xa8] sm:$0xff]   ;;  %vm6526_vm4 = vmpackc.low %vm6279_vm3, %vm6520_vm2  ;;  %v6545_v57 = vpack.c.bf16 %v655_v50, %v653_v49  ;;  %s6280_s13 = smov [#allocation8]  }
  0x76   : > { %8885 = vst [vmem:[#allocation12_spill] sm:$0xff] %v6516_v10  ;;  %1413 = vmatprep.mubr.bf16.mxu0 %v6516_v10  ;;  %4938 = vmatprep.subr.bf16.mxu1 %v5947_v20  ;;  %v5961_v36 = vld [vmem:[#allocation5 + $0x70] sm:$0xff]   ;;  %v5965_v42 = vld [vmem:[#allocation5 + $0x78] sm:$0xff]   ;;  %v5969_v48 = vld [vmem:[#allocation5 + $0x140] sm:$0xff]   ;;  %p6201_p1 = pnand %p6200_p11, %p9072_p0  ;;  %s6203_s17 = sshll.u32 %s6280_s13, 4  ;;  %s6204_s17 = int_to_ptr.vmem [resolvable:$false] %s6203_s17 }
  0x77   : > { %4827 = vmatpush3.bf16.msra.mxu0 %v5946_v19  ;;  %v5962_v37 = vld [vmem:[#allocation5 + $0x30] sm:$0xff]   ;;  %v5966_v44 = vld [vmem:[#allocation5 + $0x38] sm:$0xff]   ;;  %v273_v51 = vld [vmem:[%s6491_s6] sm:$0xff]  ;;  %8891 = vst [vmem:[#allocation14_spill] sm:$0xff] %v6545_v57  ;;  %s6205_s7 = scalar_lea.vmem %s6204_s17, 8192  ;;  %p6206_p7 = scmp.lt.s32.totalorder %s8788_s30, %s6204_s17 }
  0x78   : > { %4828 = vmatprep.subr.bf16.mxu0 %v5949_v22  ;;  %v5963_v38 = vld [vmem:[#allocation5 + $0xf0] sm:$0xff]   ;;  %v5967_v45 = vld [vmem:[#allocation5 + $0xf8] sm:$0xff]   ;;  %v274_v52 = vld [vmem:[%s6491_s6 + $0x8] sm:$0xff]  ;;  %v341_v53 = vrot.slane %v273_v51, 7  ;;  %p6202_p3 = pneg %p6201_p1  ;;  %p6207_p9 = scmp.lt.s32.totalorder %s6205_s7, %s6199_s12 }
  0x79   : > { %4939 = vmatpush3.bf16.msra.mxu1 %v5948_v21  ;;  %v5964_v40 = vld [vmem:[#allocation5 + $0xb0] sm:$0xff]   ;;  %v5968_v47 = vld [vmem:[#allocation5 + $0xb8] sm:$0xff]   ;;  %v342_v54 = vrot.slane %v274_v52, 7  ;;  %v5970_v55 = vld [vmem:[#allocation5 + $0x100] sm:$0xff]  }
  0x7a   : > { %4940 = vmatprep.subr.bf16.mxu1 %v5951_v25  ;;  %v275_v56 = vld [vmem:[%s6491_s6 + $0x10] sm:$0xff]  ;;  %v276_v58 = vld [vmem:[%s6491_s6 + $0x18] sm:$0xff]  ;;  %v440_v62 = vsel %vm338_vm0, 0.0, %v341_v53  ;;  %v5971_v0 = vld [vmem:[#allocation5 + $0x148] sm:$0xff]   ;;  %p6208_p12 = por %p6207_p9, %p6206_p7 }
  0x7b   : > { %4829 = vmatpush3.bf16.msra.mxu0 %v5950_v24  ;;  %v344_v59 = vrot.slane %v275_v56, 7  ;;  %v343_v60 = vsel %vm338_vm0, %v341_v53, %v342_v54  ;;  %v457_v61 = vsel %vm338_vm0, %v342_v54, 0.0  ;;  %v345_v63 = vrot.slane %v276_v58, 7  ;;  %v5972_v5 = vld [vmem:[#allocation5 + $0x108] sm:$0xff]   ;;  %v277_v11 = vld [vmem:[%s6491_s6 + $0x20] sm:$0xff]  ;;  %v5973_v17 = vld [vmem:[#allocation5 + $0x150] sm:$0xff]  }
  0x7c   : > { %4830 = vmatprep.subr.bf16.mxu0 %v5953_v27  ;;  %v528_v1 = vrot.slane %v343_v60, 1  ;;  %v657_v2 = vrot.slane %v343_v60, 2  ;;  %v4364_v3 = vpack.c.bf16 %v343_v60, %v341_v53  ;;  %v527_v4 = vrot.slane %v440_v62, 1  ;;  %v278_v16 = vld [vmem:[%s6491_s6 + $0x28] sm:$0xff]  ;;  %v279_v22 = vld [vmem:[%s6491_s6 + $0x30] sm:$0xff]  ;;  %v5976_v49 = vld [vmem:[#allocation5 + $0x118] sm:$0xff]   ;;  %p6209_p2 = pnand %p6208_p12, %p6202_p3 }
  0x7d   : > { %4941 = vmatpush3.bf16.msra.mxu1 %v5952_v26  ;;  %v530_v6 = vrot.slane %v457_v61, 1  ;;  %v346_v7 = vsel %vm338_vm0, %v344_v59, %v345_v63  ;;  %v656_v8 = vrot.slane %v440_v62, 2  ;;  %v659_v9 = vrot.slane %v457_v61, 2  ;;  %v281_v54 = vld [vmem:[%s6491_s6 + $0x40] sm:$0xff]  ;;  %v282_v61 = vld [vmem:[%s6491_s6 + $0x48] sm:$0xff] }
  0x7e   : > { %4942 = vmatprep.subr.bf16.mxu1 %v5955_v29  ;;  %4425 = vmatprep.mubr.msk.bf16.mxu1 %vm6526_vm4, %v4364_v3  ;;  %v529_v12 = vsel %vm521_vm1, %v527_v4, %v528_v1  ;;  %v6556_v13 = vpack.c.bf16 %v346_v7, %v344_v59  ;;  %v441_v14 = vsel %vm338_vm0, 0.0, %v344_v59  ;;  %v458_v15 = vsel %vm338_vm0, %v345_v63, 0.0 }
  0x7f   : > { %4831 = vmatpush3.bf16.msra.mxu0 %v5954_v28  ;;  %v531_v18 = vsel %vm521_vm1, %v528_v1, %v530_v6  ;;  %v658_v19 = vsel %vm650_vm5, %v656_v8, %v657_v2  ;;  %v660_v20 = vsel %vm650_vm5, %v657_v2, %v659_v9  ;;  %v532_v21 = vrot.slane %v441_v14, 1  ;;  %v5978_v1 = vld [vmem:[#allocation5 + $0x120] sm:$0xff]   ;;  %v5979_v8 = vld [vmem:[#allocation5 + $0x168] sm:$0xff]  }
  0x80   : > { %4832 = vmatprep.subr.bf16.mxu0 %v5957_v31  ;;  %v6566_v23 = vpack.c.bf16 %v531_v18, %v529_v12  ;;  %v533_v24 = vrot.slane %v346_v7, 1  ;;  %v535_v25 = vrot.slane %v458_v15, 1  ;;  %v6571_v26 = vpack.c.bf16 %v660_v20, %v658_v19 }
  0x81   : > { %4943 = vmatpush3.bf16.msra.mxu1 %v5956_v30  ;;  %v347_v27 = vrot.slane %v277_v11, 7  ;;  %v348_v28 = vrot.slane %v278_v16, 7  ;;  %v661_v29 = vrot.slane %v441_v14, 2  ;;  %v5974_v30 = vld [vmem:[#allocation5 + $0x110] sm:$0xff]   ;;  %v350_v41 = vrot.slane %v279_v22, 7  ;;  %v5980_v16 = vld [vmem:[#allocation5 + $0x128] sm:$0xff]  }
  0x82   : > { %4944 = vmatprep.subr.bf16.mxu1 %v5959_v33  ;;  %v534_v31 = vsel %vm521_vm1, %v532_v21, %v533_v24  ;;  %v662_v33 = vrot.slane %v346_v7, 2  ;;  %v353_v6 = vrot.slane %v281_v54, 7  ;;  %v354_v7 = vrot.slane %v282_v61, 7  ;;  %v283_v21 = vld [vmem:[%s6491_s6 + $0x50] sm:$0xff] }
  0x83   : > { %4833 = vmatpush3.bf16.msra.mxu0 %v5958_v32  ;;  %v536_v32 = vsel %vm521_vm1, %v533_v24, %v535_v25  ;;  %v349_v39 = vsel %vm338_vm0, %v347_v27, %v348_v28  ;;  %v459_v43 = vsel %vm338_vm0, %v348_v28, 0.0  ;;  %v6588_v50 = vsel %vm338_vm0, 0.0, %v350_v41  ;;  %v284_v28 = vld [vmem:[%s6491_s6 + $0x58] sm:$0xff] }
  0x84   : > { %4834 = vmatprep.subr.bf16.mxu0 %v5961_v36  ;;  %v280_v36 = vld [vmem:[%s6491_s6 + $0x38] sm:$0xff]  ;;  %v663_v56 = vsel %vm650_vm5, %v661_v29, %v662_v33  ;;  %v542_v62 = vrot.slane %v6588_v50, 1  ;;  %v6623_v14 = vsel %vm338_vm0, 0.0, %v353_v6  ;;  %v6632_v20 = vsel %vm338_vm0, %v353_v6, %v354_v7  ;;  %v5982_v29 = vld [vmem:[#allocation5 + $0x130] sm:$0xff]  }
  0x85   : > { %4945 = vmatpush3.bf16.msra.mxu1 %v5960_v34  ;;  %v664_v34 = vrot.slane %v458_v15, 2  ;;  %v6626_v15 = vsel %vm338_vm0, %v354_v7, 0.0  ;;  %v547_v24 = vrot.slane %v6623_v14, 1  ;;  %v548_v25 = vrot.slane %v6632_v20, 1  ;;  %v5989_v7 = vld [vmem:[#allocation5 + $0x1d8] sm:$0xff]  }
  0x86   : > { %4946 = vmatprep.subr.bf16.mxu1 %v5963_v38  ;;  %v6579_v38 = vpack.c.bf16 %v536_v32, %v534_v31  ;;  %v5983_v32 = vld [vmem:[#allocation5 + $0x1c0] sm:$0xff]  }
  0x87   : > { %4835 = vmatpush3.bf16.msra.mxu0 %v5962_v37  ;;  %v5975_v37 = vld [vmem:[#allocation5 + $0x158] sm:$0xff]   ;;  %v665_v58 = vsel %vm650_vm5, %v662_v33, %v664_v34 }
  0x88   : > { %4836 = vmatprep.subr.bf16.mxu0 %v5965_v42  ;;  %v6583_v42 = vpack.c.bf16 %v349_v39, %v347_v27  ;;  %v6614_v4 = vpack.c.bf16 %v665_v58, %v663_v56  ;;  %v5987_v56 = vld [vmem:[#allocation5 + $0x1d0] sm:$0xff]  }
  0x89   : > { %4947 = vmatpush3.bf16.msra.mxu1 %v5964_v40  ;;  %v442_v40 = vsel %vm338_vm0, 0.0, %v347_v27  ;;  %v550_v27 = vrot.slane %v6626_v15, 1 }
  0x8a   : > { %4948 = vmatprep.subr.bf16.mxu1 %v5967_v45  ;;  %v538_v45 = vrot.slane %v349_v39, 1  ;;  %v666_v2 = vrot.slane %v442_v40, 2 }
  0x8b   : > { %4837 = vmatpush3.bf16.msra.mxu0 %v5966_v44  ;;  %v537_v44 = vrot.slane %v442_v40, 1  ;;  %v6655_v40 = vpack.c.bf16 %v6632_v20, %v353_v6 }
  0x8c   : > { %5046 = vmatprep.subr.bf16.mxu0 %v5969_v48  ;;  %v351_v48 = vrot.slane %v280_v36, 7  ;;  %v356_v36 = vrot.slane %v283_v21, 7 }
  0x8d   : > { %4949 = vmatpush3.bf16.msra.mxu1 %v5968_v47  ;;  %v540_v47 = vrot.slane %v459_v43, 1  ;;  %v539_v51 = vsel %vm521_vm1, %v537_v44, %v538_v45  ;;  %v286_v44 = vld [vmem:[%s6491_s6 + $0x68] sm:$0xff] }
  0x8e   : > { %4361 = vmatmul.mubr.msk.bf16.vlgmr.msra.gmra.mrb[0].mxu0 %vm6526_vm4, %v6535_v46  ;;  %v6594_v53 = vsel %vm338_vm0, %v351_v48, 0.0  ;;  %v6605_v60 = vsel %vm338_vm0, %v350_v41, %v351_v48  ;;  %5158 = vmatprep.subr.bf16.mxu1 %v5983_v32  ;;  %v6661_v48 = vsel %vm338_vm0, 0.0, %v356_v36 }
  0x8f   : > { %5047 = vmatpush3.bf16.msra.mxu0 %v5970_v55  ;;  %1421 = vmatprep.mubr.bf16.mxu0 %v6566_v23  ;;  %v541_v52 = vsel %vm521_vm1, %v538_v45, %v540_v47  ;;  %v5977_v55 = vld [vmem:[#allocation5 + $0x160] sm:$0xff]   ;;  %v543_v63 = vrot.slane %v6605_v60, 1  ;;  %v6618_v9 = vpack.c.bf16 %v6605_v60, %v350_v41  ;;  %v672_v31 = vrot.slane %v6605_v60, 2  ;;  %v5985_v47 = vld [vmem:[#allocation5 + $0x1c8] sm:$0xff]  }
  0x90   : > { %5048 = vmatprep.subr.bf16.mxu0 %v5971_v0  ;;  %1575 = vmatmul.mubr.bf16.vlgmr.msra.gmra.mrb[0].mxu1 %v6545_v57  ;;  %v6602_v59 = vpack.c.bf16 %v541_v52, %v539_v51  ;;  %v545_v0 = vrot.slane %v6594_v53, 1  ;;  %v674_v34 = vrot.slane %v6594_v53, 2  ;;  %v549_v41 = vsel %vm521_vm1, %v547_v24, %v548_v25  ;;  %v5984_v45 = vld [vmem:[#allocation5 + $0x180] sm:$0xff]   ;;  %v5986_v51 = vld [vmem:[#allocation5 + $0x188] sm:$0xff]  }
  0x91   : > { %4429 = vmatprep.mubr.msk.bf16.mxu1 %vm6526_vm4, %v6556_v13  ;;  %v544_v11 = vsel %vm521_vm1, %v542_v62, %v543_v63  ;;  %5159 = vmatpush3.bf16.msra.mxu1 %v5984_v45  ;;  %v552_v58 = vrot.slane %v6661_v48, 1 }
  0x92   : > { %v546_v12 = vsel %vm521_vm1, %v543_v63, %v545_v0  ;;  %v675_v52 = vsel %vm650_vm5, %v672_v31, %v674_v34  ;;  %5160 = vmatprep.subr.bf16.mxu1 %v5985_v47  ;;  %v360_v63 = vrot.slane %v286_v44, 7  ;;  %v287_v0 = vld [vmem:[%s6491_s6 + $0x70] sm:$0xff] }
  0x93   : > { %5049 = vmatpush3.bf16.msra.mxu0 %v5972_v5  ;;  %v669_v5 = vrot.slane %v459_v43, 2  ;;  %v6638_v22 = vpack.c.bf16 %v546_v12, %v544_v11  ;;  %v551_v43 = vsel %vm521_vm1, %v548_v25, %v550_v27  ;;  %v681_v11 = vrot.slane %v6661_v48, 2  ;;  %v288_v12 = vld [vmem:[%s6491_s6 + $0x78] sm:$0xff] }
  0x94   : > { %5050 = vmatprep.subr.bf16.mxu0 %v5973_v17  ;;  %v5981_v17 = vld [vmem:[#allocation5 + $0x170] sm:$0xff]   ;;  %v6669_v53 = vpack.c.bf16 %v551_v43, %v549_v41  ;;  %v6711_v27 = vrot.slane %v287_v0, 7  ;;  %v363_v32 = vrot.slane %v288_v12, 7  ;;  %v5992_v41 = vld [vmem:[#allocation5 + $0x138] sm:$0xff]  }
  0x95   : > { %5161 = vmatpush3.bf16.msra.mxu1 %v5986_v51  ;;  %v5993_v51 = vld [vmem:[#allocation5 + $0x1e0] sm:$0xff]   ;;  %v292_v0 = vld [vmem:[%s6491_s6 + $0x98] sm:$0xff] }
  0x96   : > { %4365 = vmatmul.mubr.msk.bf16.gmra.mrb[4].mxu0 %vm6526_vm4, %v4364_v3  ;;  %v667_v3 = vrot.slane %v349_v39, 2  ;;  %v285_v39 = vld [vmem:[%s6491_s6 + $0x60] sm:$0xff]  ;;  %5162 = vmatprep.subr.bf16.mxu1 %v5987_v56  ;;  %v6728_v44 = vsel %vm338_vm0, 0.0, %v6711_v27  ;;  %v6731_v45 = vsel %vm338_vm0, %v363_v32, 0.0 }
  0x97   : > { %5051 = vmatpush3.bf16.msra.mxu0 %v5974_v30  ;;  %1429 = vmatprep.mubr.bf16.mxu0 %v6579_v38  ;;  %v671_v30 = vrot.slane %v6588_v50, 2  ;;  %v359_v62 = vrot.slane %v285_v39, 7  ;;  %v694_v12 = vrot.slane %v6731_v45, 2 }
  0x98   : > { %5052 = vmatprep.subr.bf16.mxu0 %v5975_v37  ;;  %1583 = vmatmul.mubr.bf16.gmra.mrb[4].mxu1 %v6571_v26  ;;  %v668_v18 = vsel %vm650_vm5, %v666_v2, %v667_v3  ;;  %v670_v19 = vsel %vm650_vm5, %v667_v3, %v669_v5  ;;  %v357_v37 = vrot.slane %v284_v28, 7  ;;  %v677_v3 = vrot.slane %v6632_v20, 2  ;;  %v5991_v20 = vld [vmem:[#allocation5 + $0x178] sm:$0xff]  }
  0x99   : > { %4433 = vmatprep.mubr.msk.bf16.mxu1 %vm6526_vm4, %v6583_v42  ;;  %v6649_v33 = vpack.c.bf16 %v670_v19, %v668_v18  ;;  %v673_v50 = vsel %vm650_vm5, %v671_v30, %v672_v31  ;;  %v679_v5 = vrot.slane %v6626_v15, 2  ;;  %v6690_v6 = vsel %vm338_vm0, 0.0, %v359_v62  ;;  %v290_v19 = vld [vmem:[%s6491_s6 + $0x88] sm:$0xff]  ;;  %v5990_v28 = vld [vmem:[#allocation5 + $0x198] sm:$0xff]  }
  0x9a   : > { %v6672_v54 = vsel %vm338_vm0, %v356_v36, %v357_v37  ;;  %v6685_v2 = vpack.c.bf16 %v675_v52, %v673_v50  ;;  %v6703_v18 = vsel %vm338_vm0, %v360_v63, 0.0  ;;  %v6707_v21 = vsel %vm338_vm0, %v359_v62, %v360_v63 }
  0x9b   : > { %5053 = vmatpush3.bf16.msra.mxu0 %v5976_v49  ;;  %v6664_v49 = vsel %vm338_vm0, %v357_v37, 0.0  ;;  %v553_v60 = vrot.slane %v6672_v54, 1  ;;  %v682_v15 = vrot.slane %v6672_v54, 2  ;;  %v557_v25 = vrot.slane %v6690_v6, 1 }
  0x9c   : > { %5054 = vmatprep.subr.bf16.mxu0 %v5977_v55  ;;  %v676_v55 = vrot.slane %v6623_v14, 2  ;;  %v555_v61 = vrot.slane %v6664_v49, 1  ;;  %v289_v14 = vld [vmem:[%s6491_s6 + $0x80] sm:$0xff]  ;;  %v684_v24 = vrot.slane %v6664_v49, 2  ;;  %v680_v30 = vsel %vm650_vm5, %v677_v3, %v679_v5  ;;  %v291_v49 = vld [vmem:[%s6491_s6 + $0x90] sm:$0xff] }
  0x9d   : > { %v558_v31 = vrot.slane %v6707_v21, 1  ;;  %v686_v37 = vrot.slane %v6690_v6, 2  ;;  %v687_v39 = vrot.slane %v6707_v21, 2  ;;  %v689_v43 = vrot.slane %v6703_v18, 2 }
  0x9e   : > { %4369 = vmatmul.mubr.msk.bf16.gmra.mrb[8].mxu0 %vm6526_vm4, %v6556_v13  ;;  %v6733_v47 = vrot.slane %v289_v14, 7  ;;  %v366_v50 = vrot.slane %v290_v19, 7  ;;  %v691_v5 = vrot.slane %v6728_v44, 2  ;;  %v293_v19 = vld [vmem:[%s6491_s6 + $0xa0] sm:$0xff] }
  0x9f   : > { %1437 = vmatprep.mubr.bf16.mxu0 %v6602_v59  ;;  %5055 = vmatpush3.bf16.msra.mxu0 %v5978_v1  ;;  %v5988_v1 = vld [vmem:[#allocation5 + $0x190] sm:$0xff]  }
  0xa0   : > { %5056 = vmatprep.subr.bf16.mxu0 %v5979_v8  ;;  %1591 = vmatmul.mubr.bf16.gmra.mrb[8].mxu1 %v6614_v4  ;;  %v6694_v8 = vpack.c.bf16 %v6672_v54, %v356_v36  ;;  %v560_v36 = vrot.slane %v6703_v18, 1  ;;  %v6742_v54 = vpack.c.bf16 %v6707_v21, %v359_v62  ;;  %v6750_v56 = vsel %vm338_vm0, 0.0, %v6733_v47 }
  0xa1   : > { %4437 = vmatprep.mubr.msk.bf16.mxu1 %vm6526_vm4, %v6618_v9  ;;  %5163 = vmatpush3.bf16.msra.mxu1 %v5988_v1  ;;  %v562_v62 = vrot.slane %v6728_v44, 1  ;;  %v5995_v1 = vld [vmem:[#allocation5 + $0x1e8] sm:$0xff]   ;;  %v6764_v14 = vsel %vm338_vm0, %v6733_v47, %v366_v50  ;;  %v6770_v18 = vrot.slane %v291_v49, 7  ;;  %v295_v49 = vld [vmem:[%s6491_s6 + $0xb0] sm:$0xff] }
  0xa2   : > { %5164 = vmatprep.subr.bf16.mxu1 %v5989_v7  ;;  %8892 = vst [vmem:[#allocation15_spill] sm:$0xff] %v6742_v54 }
  0xa3   : > { %5057 = vmatpush3.bf16.msra.mxu0 %v5980_v16  ;;  %v554_v16 = vsel %vm521_vm1, %v552_v58, %v553_v60  ;;  %v5994_v58 = vld [vmem:[#allocation5 + $0x1a0] sm:$0xff]  }
  0xa4   : > { %5058 = vmatprep.subr.bf16.mxu0 %v5981_v17  ;;  %v556_v17 = vsel %vm521_vm1, %v553_v60, %v555_v61  ;;  %v559_v60 = vsel %vm521_vm1, %v557_v25, %v558_v31  ;;  %v561_v61 = vsel %vm521_vm1, %v558_v31, %v560_v36  ;;  %v5996_v25 = vld [vmem:[#allocation5 + $0x1a8] sm:$0xff]   ;;  %v5997_v31 = vld [vmem:[#allocation5 + $0x1f0] sm:$0xff]   ;;  %v369_v36 = vrot.slane %v292_v0, 7 }
  0xa5   : > { %v6720_v34 = vpack.c.bf16 %v556_v17, %v554_v16  ;;  %5165 = vmatpush3.bf16.msra.mxu1 %v5990_v28  ;;  %v6767_v16 = vsel %vm338_vm0, %v366_v50, 0.0  ;;  %v567_v17 = vrot.slane %v6750_v56, 1  ;;  %v683_v28 = vsel %vm650_vm5, %v681_v11, %v682_v15  ;;  %v296_v50 = vld [vmem:[%s6491_s6 + $0xb8] sm:$0xff]  ;;  %v5998_v0 = vld [vmem:[#allocation5 + $0x1b0] sm:$0xff]   ;;  %v6837_v11 = vld [vmem:[#allocation5 + $0x200] sm:$0xff]  }
  0xa6   : > { %4373 = vmatmul.mubr.msk.bf16.gmra.mrb[12].mxu0 %vm6526_vm4, %v6583_v42  ;;  %5166 = vmatprep.subr.bf16.mxu1 %v5993_v51  ;;  %v375_v48 = vrot.slane %v296_v50, 7 }
  0xa7   : > { %1445 = vmatprep.mubr.bf16.mxu0 %v6638_v22  ;;  %5059 = vmatpush3.bf16.msra.mxu0 %v5982_v29  ;;  %v678_v29 = vsel %vm650_vm5, %v676_v55, %v677_v3  ;;  %v6746_v55 = vsel %vm338_vm0, %v6711_v27, %v363_v32  ;;  %v565_v3 = vrot.slane %v6731_v45, 1  ;;  %v6783_v32 = vpack.c.bf16 %v561_v61, %v559_v60 }
  0xa8   : > { %1599 = vmatmul.mubr.bf16.gmra.mrb[12].mxu1 %v6649_v33  ;;  %5060 = vmatprep.subr.bf16.mxu0 %v5991_v20  ;;  %v6739_v52 = vpack.c.bf16 %v680_v30, %v678_v29  ;;  %v563_v63 = vrot.slane %v6746_v55, 1  ;;  %v692_v7 = vrot.slane %v6746_v55, 2  ;;  %v294_v20 = vld [vmem:[%s6491_s6 + $0xa8] sm:$0xff]  ;;  %v685_v29 = vsel %vm650_vm5, %v682_v15, %v684_v24 }
  0xa9   : > { %4441 = vmatprep.mubr.msk.bf16.mxu1 %vm6526_vm4, %v6655_v40  ;;  %5167 = vmatpush3.bf16.msra.mxu1 %v5994_v58  ;;  %v568_v30 = vrot.slane %v6764_v14, 1  ;;  %v6795_v51 = vpack.c.bf16 %v685_v29, %v683_v28  ;;  %v6798_v58 = vsel %vm338_vm0, %v369_v36, 0.0  ;;  %v6800_v60 = vrot.slane %v293_v19, 7  ;;  %v5999_v28 = vld [vmem:[#allocation5 + $0x1f8] sm:$0xff]   ;;  %v298_v24 = vld [vmem:[%s6491_s6 + $0xc8] sm:$0xff] }
  0xaa   : > { %5168 = vmatprep.subr.bf16.mxu1 %v5995_v1  ;;  %v372_v61 = vrot.slane %v294_v20, 7  ;;  %v6807_v1 = vpack.c.bf16 %v6746_v55, %v6711_v27  ;;  %v688_v19 = vsel %vm650_vm5, %v686_v37, %v687_v39  ;;  %v690_v20 = vsel %vm650_vm5, %v687_v39, %v689_v43  ;;  %v300_v39 = vld [vmem:[%s6491_s6 + $0xd8] sm:$0xff] }
  0xab   : > { %5061 = vmatpush3.bf16.msra.mxu0 %v5992_v41  ;;  %v6787_v41 = vsel %vm338_vm0, 0.0, %v6770_v18  ;;  %v564_v27 = vsel %vm521_vm1, %v562_v62, %v563_v63  ;;  %v6822_v29 = vsel %vm338_vm0, %v6770_v18, %v369_v36  ;;  %v6826_v6 = vsel %vm338_vm0, 0.0, %v6800_v60  ;;  %v297_v62 = vld [vmem:[%s6491_s6 + $0xc0] sm:$0xff] }
  0xac   : > { %8893 = vst [vmem:[#allocation16_spill] sm:$0xff] %v6807_v1  ;;  %v6829_v21 = vsel %vm338_vm0, %v372_v61, 0.0  ;;  %v566_v37 = vsel %vm521_vm1, %v563_v63, %v565_v3  ;;  %v6841_v36 = vsel %vm338_vm0, %v6800_v60, %v372_v61  ;;  %v299_v63 = vld [vmem:[%s6491_s6 + $0xd0] sm:$0xff]  ;;  %v6000_v3 = vld [vmem:[#allocation5 + $0x1b8] sm:$0xff]   ;;  %5766 = vmatprep.subr.bf16.mxu0 %v6837_v11  ;;  %v378_v43 = vrot.slane %v298_v24, 7 }
  0xad   : > { %5169 = vmatpush3.bf16.msra.mxu1 %v5996_v25  ;;  %v6844_v25 = vrot.slane %v295_v49, 7  ;;  %v6855_v49 = vpack.c.bf16 %v566_v37, %v564_v27  ;;  %v6874_v37 = vrot.slane %v297_v62, 7  ;;  %v6883_v15 = vrot.slane %v299_v63, 7 }
  0xae   : > { %4377 = vmatmul.mubr.msk.bf16.gmra.mrb[16].mxu0 %vm6526_vm4, %v6618_v9  ;;  %5170 = vmatprep.subr.bf16.mxu1 %v5997_v31  ;;  %v6865_v31 = vpack.c.bf16 %v690_v20, %v688_v19  ;;  %v6888_v24 = vpack.c.bf16 %v6764_v14, %v6733_v47  ;;  %v693_v63 = vsel %vm650_vm5, %v691_v5, %v692_v7  ;;  %v8897_v10 = vrot.slane %v6822_v29, 1 }
  0xaf   : > { %1453 = vmatprep.mubr.bf16.mxu0 %v6669_v53  ;;  %8894 = vst [vmem:[#allocation17_spill] sm:$0xff] %v6855_v49  ;;  %v6859_v50 = vsel %vm338_vm0, 0.0, %v6844_v25  ;;  %v6871_v61 = vsel %vm338_vm0, %v6844_v25, %v375_v48  ;;  %v6892_v62 = vsel %vm338_vm0, 0.0, %v6874_v37  ;;  %v695_v47 = vsel %vm650_vm5, %v692_v7, %v694_v12  ;;  %v301_v12 = vld [vmem:[%s6491_s6 + $0xe0] sm:$0xff] }
  0xb0   : > { %1607 = vmatmul.mubr.bf16.gmra.mrb[16].mxu1 %v6685_v2  ;;  %v569_v27 = vsel %vm521_vm1, %v567_v17, %v568_v30  ;;  %v6919_v5 = vsel %vm338_vm0, %v6874_v37, %v378_v43  ;;  %v381_v7 = vrot.slane %v300_v39, 7  ;;  %v6943_v17 = vpack.c.bf16 %v695_v47, %v693_v63 }
  0xb1   : > { %4445 = vmatprep.mubr.msk.bf16.mxu1 %vm6526_vm4, %v6694_v8  ;;  %5171 = vmatpush3.bf16.msra.mxu1 %v5998_v0  ;;  %v6862_v0 = vsel %vm338_vm0, %v375_v48, 0.0  ;;  %v302_v48 = vld [vmem:[%s6491_s6 + $0xe8] sm:$0xff]  ;;  %v6949_v20 = vpack.c.bf16 %v6822_v29, %v6770_v18  ;;  %v6962_v55 = vrot.slane %v301_v12, 7  ;;  %v8899_v12 = vrot.slane %v6798_v58, 1 }
  0xb2   : > { %5172 = vmatprep.subr.bf16.mxu1 %v5999_v28  ;;  %v8895_v28 = vrot.slane %v6767_v16, 1  ;;  %v6941_v45 = vsel %vm338_vm0, %v381_v7, 0.0  ;;  %v6953_v57 = vsel %vm338_vm0, %v6883_v15, %v381_v7  ;;  %v384_v18 = vrot.slane %v302_v48, 7 }
  0xb3   : > { %v593_v63 = vrot.slane %v6953_v57, 1  ;;  %v595_v47 = vrot.slane %v6941_v45, 1  ;;  %v8900_v48 = vmov %v8897_v10 }
  0xb4   : > { %v571_v44 = vsel %vm521_vm1, %v568_v30, %v8895_v28  ;;  %v6931_v30 = vsel %vm338_vm0, 0.0, %v6883_v15 }
  0xb5   : > { %5173 = vmatpush3.bf16.msra.mxu1 %v6000_v3  ;;  %v6895_v3 = vsel %vm338_vm0, %v378_v43, 0.0  ;;  %v303_v43 = vld [vmem:[%s6491_s6 + $0xf0] sm:$0xff]  ;;  %v6937_v39 = vpack.c.bf16 %v571_v44, %v569_v27  ;;  %v592_v44 = vrot.slane %v6931_v30, 1  ;;  %v8902_v27 = vrot.slane %v6750_v56, 2 }
  0xb6   : > { %4381 = vmatmul.mubr.msk.bf16.gmra.mrb[20].mxu0 %vm6526_vm4, %v6655_v40  ;;  %v590_v28 = vrot.slane %v6895_v3, 1  ;;  %v6968_v46 = vrot.slane %v303_v43, 7  ;;  %v8901_v43 = vrot.slane %v6764_v14, 2  ;;  %v7004_v56 = vpack.c.bf16 %v6841_v36, %v6800_v60 }
  0xb7   : > { %1461 = vmatprep.mubr.bf16.mxu0 %v6720_v34  ;;  %8896 = vst [vmem:[#allocation18_spill] sm:$0xff] %v6937_v39  ;;  %v8906_v14 = vrot.slane %v6826_v6, 1  ;;  %v8909_v60 = vrot.slane %v6822_v29, 2  ;;  %v8914_v29 = vrot.slane %v6871_v61, 1 }
  0xb8   : > { %1615 = vmatmul.mubr.bf16.gmra.mrb[20].mxu1 %v6739_v52  ;;  %v698_v7 = vsel %vm650_vm5, %v8902_v27, %v8901_v43 }
  0xb9   : > { %4449 = vmatprep.mubr.msk.bf16.mxu1 %vm6526_vm4, %v6742_v54 }
  0xbe   : > { %4385 = vmatmul.mubr.msk.bf16.gmra.mrb[24].mxu0 %vm6526_vm4, %v6694_v8 }
  0xbf   : > { %1469 = vmatprep.mubr.bf16.mxu0 %v6783_v32 }
  0xc0   : > { %1623 = vmatmul.mubr.bf16.gmra.mrb[24].mxu1 %v6795_v51 }
  0xc1   : > { %4453 = vmatprep.mubr.msk.bf16.mxu1 %vm6526_vm4, %v6807_v1 }
  0xc6   : > { %4389 = vmatmul.mubr.msk.bf16.gmra.mrb[28].mxu0 %vm6526_vm4, %v6742_v54 }
  0xc7   : > { %1477 = vmatprep.mubr.bf16.mxu0 %v6855_v49 }
  0xc8   : > { %1631 = vmatmul.mubr.bf16.gmra.mrb[28].mxu1 %v6865_v31 }
  0xc9   : > { %4457 = vmatprep.mubr.msk.bf16.mxu1 %vm6526_vm4, %v6888_v24 }
  0xce   : > { %4393 = vmatmul.mubr.msk.bf16.gmra.mrb[32].mxu0 %vm6526_vm4, %v6807_v1  ;;  %v8898_v1 = vrot.slane %v6787_v41, 1 }
  0xcf   : > { %1485 = vmatprep.mubr.bf16.mxu0 %v6937_v39  ;;  %v576_v39 = vsel %vm521_vm1, %v8900_v48, %v8899_v12 }
  0xd0   : > { %v574_v49 = vsel %vm521_vm1, %v8898_v1, %v8897_v10  ;;  %1639 = vmatmul.mubr.bf16.gmra.mrb[32].mxu1 %v6943_v17  ;;  %v8903_v10 = vrot.slane %v6767_v16, 2  ;;  %v8904_v1 = vmov %v8901_v43  ;;  %v8905_v16 = vrot.slane %v6841_v36, 1 }
  0xd1   : > { %4461 = vmatprep.mubr.msk.bf16.mxu1 %vm6526_vm4, %v6949_v20  ;;  %v6994_v54 = vpack.c.bf16 %v576_v39, %v574_v49  ;;  %v8907_v49 = vrot.slane %v6829_v21, 1  ;;  %v8911_v43 = vrot.slane %v6798_v58, 2  ;;  %v7047_v58 = vpack.c.bf16 %v6871_v61, %v6844_v25 }
  0xd2   : > { %v700_v19 = vsel %vm650_vm5, %v8904_v1, %v8903_v10  ;;  %v579_v27 = vsel %vm521_vm1, %v8906_v14, %v8905_v16  ;;  %v8908_v39 = vmov %v8905_v16  ;;  %v8912_v10 = vmov %v8909_v60 }
  0xd3   : > { %v6999_v12 = vpack.c.bf16 %v700_v19, %v698_v7  ;;  %v581_v48 = vsel %vm521_vm1, %v8908_v39, %v8907_v49  ;;  %v8910_v19 = vrot.slane %v6787_v41, 2  ;;  %v705_v1 = vsel %vm650_vm5, %v8912_v10, %v8911_v43 }
  0xd4   : > { %v7030_v16 = vpack.c.bf16 %v581_v48, %v579_v27  ;;  %v7039_v49 = vsel %vm338_vm0, 0.0, %v6962_v55  ;;  %v7042_v41 = vsel %vm338_vm0, %v384_v18, 0.0  ;;  %v8915_v27 = vrot.slane %v6859_v50, 1 }
  0xd5   : > { %v703_v7 = vsel %vm650_vm5, %v8910_v19, %v8909_v60  ;;  %v8916_v48 = vrot.slane %v6862_v0, 1  ;;  %v8917_v60 = vmov %v8914_v29  ;;  %v597_v25 = vrot.slane %v7039_v49, 1 }
  0xd6   : > { %4397 = vmatmul.mubr.msk.bf16.gmra.mrb[36].mxu0 %vm6526_vm4, %v6888_v24  ;;  %8913 = vst [vmem:[#allocation19_spill] sm:$0xff] %v7030_v16  ;;  %v7035_v14 = vpack.c.bf16 %v705_v1, %v703_v7  ;;  %v584_v39 = vsel %vm521_vm1, %v8915_v27, %v8914_v29  ;;  %v7061_v7 = vsel %vm338_vm0, %v6962_v55, %v384_v18  ;;  %v8918_v10 = vrot.slane %v6841_v36, 2 }
  0xd7   : > { %1493 = vmatprep.mubr.bf16.mxu0 %v6994_v54  ;;  %v586_v19 = vsel %vm521_vm1, %v8917_v60, %v8916_v48  ;;  %v598_v43 = vrot.slane %v7061_v7, 1  ;;  %v8919_v1 = vrot.slane %v6826_v6, 2  ;;  %v8920_v18 = vrot.slane %v6829_v21, 2 }
  0xd8   : > { %1647 = vmatmul.mubr.bf16.gmra.mrb[36].mxu1 %v6999_v12  ;;  %v8921_v27 = vmov %v8918_v10  ;;  %v7079_v60 = vpack.c.bf16 %v586_v19, %v584_v39  ;;  %v7089_v6 = vpack.c.bf16 %v6919_v5, %v6874_v37  ;;  %v8922_v21 = vrot.slane %v6919_v5, 1 }
  0xd9   : > { %4465 = vmatprep.mubr.msk.bf16.mxu1 %vm6526_vm4, %v7004_v56  ;;  %v708_v29 = vsel %vm650_vm5, %v8919_v1, %v8918_v10  ;;  %v710_v48 = vsel %vm650_vm5, %v8921_v27, %v8920_v18  ;;  %v8923_v36 = vrot.slane %v6892_v62, 1  ;;  %v8925_v1 = vrot.slane %v6871_v61, 2 }
  0xda   : > { %v8924_v39 = vmov %v8922_v21  ;;  %v8926_v37 = vrot.slane %v6859_v50, 2  ;;  %v8927_v18 = vrot.slane %v6862_v0, 2  ;;  %v7124_v50 = vpack.c.bf16 %v6953_v57, %v6883_v15 }
  0xdb   : > { %v589_v10 = vsel %vm521_vm1, %v8923_v36, %v8922_v21  ;;  %v591_v19 = vsel %vm521_vm1, %v8924_v39, %v590_v28  ;;  %v8928_v27 = vmov %v8925_v1  ;;  %v304_v28 = vld [vmem:[%s6491_s6 + $0xf8] sm:$0xff]  ;;  %v594_v0 = vsel %vm521_vm1, %v592_v44, %v593_v63 }
  0xdc   : > { %v7113_v21 = vpack.c.bf16 %v591_v19, %v589_v10  ;;  %v596_v61 = vsel %vm521_vm1, %v593_v63, %v595_v47  ;;  %v600_v10 = vrot.slane %v7042_v41, 1  ;;  %v387_v39 = vrot.slane %v304_v28, 7 }
  0xdd   : > { %v8929_v19 = vrot.slane %v6919_v5, 2  ;;  %v7143_v47 = vpack.c.bf16 %v596_v61, %v594_v0  ;;  %v8935_v28 = vrot.slane %v6941_v45, 2 }
  0xde   : > { %4401 = vmatmul.mubr.msk.bf16.gmra.mrb[40].mxu0 %vm6526_vm4, %v6949_v20  ;;  %v601_v5 = vsel %vm521_vm1, %v598_v43, %v600_v10 }
  0xdf   : > { %1501 = vmatprep.mubr.bf16.mxu0 %v7030_v16  ;;  %v7084_v16 = vpack.c.bf16 %v710_v48, %v708_v29  ;;  %v713_v29 = vsel %vm650_vm5, %v8926_v37, %v8925_v1  ;;  %v715_v48 = vsel %vm650_vm5, %v8928_v27, %v8927_v18  ;;  %v8930_v1 = vrot.slane %v6892_v62, 2 }
  0xe0   : > { %1655 = vmatmul.mubr.bf16.gmra.mrb[40].mxu1 %v7035_v14  ;;  %v7119_v36 = vpack.c.bf16 %v715_v48, %v713_v29  ;;  %v8931_v37 = vrot.slane %v6895_v3, 2  ;;  %v8932_v44 = vmov %v8929_v19  ;;  %v7153_v62 = vpack.c.bf16 %v7061_v7, %v6962_v55 }
  0xe1   : > { %4469 = vmatprep.mubr.msk.bf16.mxu1 %vm6526_vm4, %v7047_v58  ;;  %v718_v15 = vsel %vm650_vm5, %v8930_v1, %v8929_v19  ;;  %v599_v3 = vsel %vm521_vm1, %v597_v25, %v598_v43  ;;  %v8933_v18 = vrot.slane %v6953_v57, 2  ;;  %v8934_v27 = vrot.slane %v6931_v30, 2 }
  0xe2   : > { %v720_v63 = vsel %vm650_vm5, %v8932_v44, %v8931_v37  ;;  %v7171_v55 = vpack.c.bf16 %v601_v5, %v599_v3  ;;  %v388_v25 = vsel %vm338_vm0, %v6968_v46, %v387_v39  ;;  %v455_v30 = vsel %vm338_vm0, 0.0, %v6968_v46 }
  0xe3   : > { %v7148_v29 = vpack.c.bf16 %v720_v63, %v718_v15  ;;  %v723_v48 = vsel %vm650_vm5, %v8934_v27, %v8933_v18  ;;  %v8936_v0 = vmov %v8933_v18  ;;  %v472_v43 = vsel %vm338_vm0, %v387_v39, 0.0 }
  0xe4   : > { %v725_v61 = vsel %vm650_vm5, %v8936_v0, %v8935_v28  ;;  %v782_v10 = vrot.slane %v455_v30, 1  ;;  %v783_v45 = vrot.slane %v388_v25, 1  ;;  %v785_v19 = vrot.slane %v472_v43, 1  ;;  %v6002_v0 = vld [vmem:[#allocation5 + $0x208] sm:$0xff]  }
  0xe5   : > { %v7181_v57 = vpack.c.bf16 %v725_v61, %v723_v48  ;;  %v726_v1 = vrot.slane %v7039_v49, 2  ;;  %v7188_v44 = vpack.c.bf16 %v388_v25, %v6968_v46  ;;  %v727_v39 = vrot.slane %v7061_v7, 2  ;;  %v6003_v61 = vld [vmem:[#allocation5 + $0x210] sm:$0xff]  }
  0xe6   : > { %4405 = vmatmul.mubr.msk.bf16.gmra.mrb[44].mxu0 %vm6526_vm4, %v7004_v56  ;;  %v784_v15 = vsel %vm521_vm1, %v782_v10, %v783_v45  ;;  %v786_v37 = vsel %vm521_vm1, %v783_v45, %v785_v19  ;;  %v729_v63 = vrot.slane %v7042_v41, 2  ;;  %v790_v5 = vrot.slane %v455_v30, 2 }
  0xe7   : > { %1509 = vmatprep.mubr.bf16.mxu0 %v7079_v60  ;;  %v7192_v3 = vpack.c.bf16 %v786_v37, %v784_v15  ;;  %v791_v18 = vrot.slane %v388_v25, 2  ;;  %v793_v49 = vrot.slane %v472_v43, 2  ;;  %v728_v27 = vsel %vm650_vm5, %v726_v1, %v727_v39 }
  0xe8   : > { %1663 = vmatmul.mubr.bf16.gmra.mrb[44].mxu1 %v7084_v16  ;;  %v730_v46 = vsel %vm650_vm5, %v727_v39, %v729_v63 }
  0xe9   : > { %4473 = vmatprep.mubr.msk.bf16.mxu1 %vm6526_vm4, %v7089_v6  ;;  %v792_v48 = vsel %vm650_vm5, %v790_v5, %v791_v18  ;;  %v794_v7 = vsel %vm650_vm5, %v791_v18, %v793_v49  ;;  %v7207_v28 = vpack.c.bf16 %v730_v46, %v728_v27  ;;  %v6009_v46 = vld [vmem:[#allocation7 + $0x40] sm:$0xff]  }
  0xea   : > { %v7202_v41 = vpack.c.bf16 %v794_v7, %v792_v48  ;;  %v6010_v48 = vld [vmem:[#allocation7] sm:$0xff]   ;;  %5294 = vmatprep.subr.bf16.mxu1 %v6009_v46 }
  0xee   : > { %4409 = vmatmul.mubr.msk.bf16.gmra.mrb[48].mxu0 %vm6526_vm4, %v7047_v58 }
  0xef   : > { %1517 = vmatprep.mubr.bf16.mxu0 %v7113_v21 }
  0xf0   : > { %1671 = vmatmul.mubr.bf16.gmra.mrb[48].mxu1 %v7119_v36 }
  0xf1   : > { %4477 = vmatprep.mubr.msk.bf16.mxu1 %vm6526_vm4, %v7124_v50 }
  0xf6   : > { %4413 = vmatmul.mubr.msk.bf16.gmra.mrb[52].mxu0 %vm6526_vm4, %v7089_v6 }
  0xf7   : > { %1525 = vmatprep.mubr.bf16.mxu0 %v7143_v47 }
  0xf8   : > { %1679 = vmatmul.mubr.bf16.gmra.mrb[52].mxu1 %v7148_v29 }
  0xf9   : > { %4481 = vmatprep.mubr.msk.bf16.mxu1 %vm6526_vm4, %v7153_v62 }
  0xfe   : > { %4417 = vmatmul.mubr.msk.bf16.gmra.mrb[56].mxu0 %vm6526_vm4, %v7124_v50 }
  0xff   : > { %1533 = vmatprep.mubr.bf16.mxu0 %v7171_v55 }
 0x100   : > { %1687 = vmatmul.mubr.bf16.gmra.mrb[56].mxu1 %v7181_v57 }
 0x101   : > { %4485 = vmatprep.mubr.msk.bf16.mxu1 %vm6526_vm4, %v7188_v44 }
 0x106   : > { %4421 = vmatmul.mubr.msk.bf16.gmra.mrb[60].mxu0 %vm6526_vm4, %v7153_v62 }
 0x107   : > { %1735 = vmatprep.mubr.bf16.mxu0 %v6571_v26  ;;  %v6004_v26 = vld [vmem:[#allocation5 + $0x218] sm:$0xff]  }
 0x108   : > { %1695 = vmatmul.mubr.bf16.gmra.mrb[60].mxu1 %v7207_v28 }
 0x109   : > { %1896 = vmatprep.mubr.bf16.mxu1 %v6579_v38 }
 0x10e   : > { %1736 = vmatmul.mubr.bf16.vlgmr.msra.gmra.mrb[64].mxu0 %v6566_v23  ;;  %v6005_v23 = vld [vmem:[#allocation5 + $0x220] sm:$0xff]  }
 0x10f   : > { %5767 = vmatpush3.bf16.msra.mxu0 %v6837_v11  ;;  %1743 = vmatprep.mubr.bf16.mxu0 %v6614_v4 }
 0x110   : > { %5768 = vmatprep.subr.bf16.mxu0 %v6002_v0  ;;  %4489 = vmatmul.mubr.msk.bf16.vlgmr.msra.gmra.mrb[64].mxu1 %vm6526_vm4, %v6556_v13  ;;  %v6006_v13 = vld [vmem:[#allocation5 + $0x228] sm:$0xff]  }
 0x111   : > { %1904 = vmatprep.mubr.bf16.mxu1 %v6602_v59  ;;  %5295 = vmatpush3.bf16.msra.mxu1 %v6010_v48 }
 0x113   : > { %5769 = vmatpush3.bf16.msra.mxu0 %v6002_v0 }
 0x114   : > { %5770 = vmatprep.subr.bf16.mxu0 %v6003_v61 }
 0x116   : > { %1744 = vmatmul.mubr.bf16.gmra.mrb[68].mxu0 %v6579_v38  ;;  %v6007_v38 = vld [vmem:[#allocation5 + $0x230] sm:$0xff]  }
 0x117   : > { %1751 = vmatprep.mubr.bf16.mxu0 %v6649_v33  ;;  %5771 = vmatpush3.bf16.msra.mxu0 %v6003_v61 }
 0x118   : > { %5772 = vmatprep.subr.bf16.mxu0 %v6004_v26  ;;  %4493 = vmatmul.mubr.msk.bf16.gmra.mrb[68].mxu1 %vm6526_vm4, %v6583_v42  ;;  %v6008_v42 = vld [vmem:[#allocation5 + $0x238] sm:$0xff]  }
 0x119   : > { %1912 = vmatprep.mubr.bf16.mxu1 %v6638_v22 }
 0x11b   : > { %5773 = vmatpush3.bf16.msra.mxu0 %v6004_v26 }
 0x11c   : > { %5774 = vmatprep.subr.bf16.mxu0 %v6005_v23 }
 0x11e   : > { %1752 = vmatmul.mubr.bf16.gmra.mrb[72].mxu0 %v6602_v59  ;;  %v8937_v59 = vld [vmem:[#allocation15_spill] sm:$0xff] }
 0x11f   : > { %1759 = vmatprep.mubr.bf16.mxu0 %v6685_v2  ;;  %5775 = vmatpush3.bf16.msra.mxu0 %v6005_v23 }
 0x120   : > { %5776 = vmatprep.subr.bf16.mxu0 %v6006_v13  ;;  %4497 = vmatmul.mubr.msk.bf16.gmra.mrb[72].mxu1 %vm6526_vm4, %v6618_v9  ;;  %v8938_v9 = vld [vmem:[#allocation17_spill] sm:$0xff] }
 0x121   : > { %1920 = vmatprep.mubr.bf16.mxu1 %v6669_v53 }
 0x123   : > { %5777 = vmatpush3.bf16.msra.mxu0 %v6006_v13 }
 0x124   : > { %5778 = vmatprep.subr.bf16.mxu0 %v6007_v38 }
 0x126   : > { %1760 = vmatmul.mubr.bf16.gmra.mrb[76].mxu0 %v6638_v22  ;;  %v8939_v22 = vld [vmem:[#allocation16_spill] sm:$0xff] }
 0x127   : > { %1767 = vmatprep.mubr.bf16.mxu0 %v6739_v52  ;;  %5779 = vmatpush3.bf16.msra.mxu0 %v6007_v38 }
 0x128   : > { %5780 = vmatprep.subr.bf16.mxu0 %v6008_v42  ;;  %4501 = vmatmul.mubr.msk.bf16.gmra.mrb[76].mxu1 %vm6526_vm4, %v6655_v40  ;;  %v8940_v40 = vld [vmem:[#allocation18_spill] sm:$0xff] }
 0x129   : > { %1928 = vmatprep.mubr.bf16.mxu1 %v6720_v34 }
 0x12b   : > { %5781 = vmatpush3.bf16.msra.mxu0 %v6008_v42 }
 0x12e   : > { %1768 = vmatmul.mubr.bf16.gmra.mrb[80].mxu0 %v6669_v53  ;;  %v8941_v53 = vld [vmem:[#allocation19_spill] sm:$0xff] }
 0x12f   : > { %1775 = vmatprep.mubr.bf16.mxu0 %v6795_v51 }
 0x130   : > { %4505 = vmatmul.mubr.msk.bf16.gmra.mrb[80].mxu1 %vm6526_vm4, %v6694_v8 }
 0x131   : > { %1936 = vmatprep.mubr.bf16.mxu1 %v6783_v32 }
 0x136   : > { %1776 = vmatmul.mubr.bf16.gmra.mrb[84].mxu0 %v6720_v34 }
 0x137   : > { %1783 = vmatprep.mubr.bf16.mxu0 %v6865_v31 }
 0x138   : > { %4509 = vmatmul.mubr.msk.bf16.gmra.mrb[84].mxu1 %vm6526_vm4, %v8937_v59 }
 0x139   : > { %1944 = vmatprep.mubr.bf16.mxu1 %v8938_v9 }
 0x13e   : > { %1784 = vmatmul.mubr.bf16.gmra.mrb[88].mxu0 %v6783_v32 }
 0x13f   : > { %1791 = vmatprep.mubr.bf16.mxu0 %v6943_v17 }
 0x140   : > { %4513 = vmatmul.mubr.msk.bf16.gmra.mrb[88].mxu1 %vm6526_vm4, %v8939_v22 }
 0x141   : > { %1952 = vmatprep.mubr.bf16.mxu1 %v8940_v40 }
 0x146   : > { %1792 = vmatmul.mubr.bf16.gmra.mrb[92].mxu0 %v8938_v9 }
 0x147   : > { %1799 = vmatprep.mubr.bf16.mxu0 %v6999_v12 }
 0x148   : > { %4517 = vmatmul.mubr.msk.bf16.gmra.mrb[92].mxu1 %vm6526_vm4, %v6888_v24 }
 0x149   : > { %1960 = vmatprep.mubr.bf16.mxu1 %v6994_v54 }
 0x14e   : > { %1800 = vmatmul.mubr.bf16.gmra.mrb[96].mxu0 %v8940_v40 }
 0x14f   : > { %1807 = vmatprep.mubr.bf16.mxu0 %v7035_v14 }
 0x150   : > { %4521 = vmatmul.mubr.msk.bf16.gmra.mrb[96].mxu1 %vm6526_vm4, %v6949_v20 }
 0x151   : > { %1968 = vmatprep.mubr.bf16.mxu1 %v8941_v53 }
 0x156   : > { %1808 = vmatmul.mubr.bf16.gmra.mrb[100].mxu0 %v6994_v54  ;;  %v7281_v54 = vld [vmem:[%s8838_s3] ss:$0 sm:$0xff] }
 0x157   : > { %1815 = vmatprep.mubr.bf16.mxu0 %v7084_v16 }
 0x158   : > { %4525 = vmatmul.mubr.msk.bf16.gmra.mrb[100].mxu1 %vm6526_vm4, %v7004_v56 }
 0x159   : > { %1976 = vmatprep.mubr.bf16.mxu1 %v7079_v60 }
 0x15e   : > { %1816 = vmatmul.mubr.bf16.gmra.mrb[104].mxu0 %v8941_v53 }
 0x15f   : > { %1823 = vmatprep.mubr.bf16.mxu0 %v7119_v36 }
 0x160   : > { %4529 = vmatmul.mubr.msk.bf16.gmra.mrb[104].mxu1 %vm6526_vm4, %v7047_v58 }
 0x161   : > { %v4838_v8 = vpop.f32.mrb[0].mxu0  ;;  %1984 = vmatprep.mubr.bf16.mxu1 %v7113_v21 }
 0x162   : > { %v4839_v34 = vpop.f32.mrb[1].mxu0 }
 0x163   : > { %v4840_v32 = vadd.f32 %v4839_v34, %v4838_v8  ;;  %v4841_v11 = vpop.f32.mrb[2].mxu0  ;;  %v4950_v25 = vpop.f32.mrb[0].mxu1 }
 0x164   : > { %v4842_v20 = vpop.f32.mrb[3].mxu0  ;;  %v4951_v30 = vpop.f32.mrb[1].mxu1 }
 0x165   : > { %v4843_v24 = vadd.f32 %v4842_v20, %v4841_v11  ;;  %v1416_v56 = vadd.f32 %v4840_v32, %v7281_v54  ;;  %v4952_v10 = vadd.f32 %v4951_v30, %v4950_v25  ;;  %v4953_v45 = vpop.f32.mrb[2].mxu1 }
 0x166   : > { %1824 = vmatmul.mubr.bf16.gmra.mrb[108].mxu0 %v7079_v60  ;;  %v4954_v58 = vpop.f32.mrb[3].mxu1 }
 0x167   : > { %v1419_v43 = vadd.f32 %v4843_v24, %v7281_v54  ;;  %1831 = vmatprep.mubr.bf16.mxu0 %v7148_v29  ;;  %v4955_v19 = vadd.f32 %v4954_v58, %v4953_v45  ;;  %v7288_v15 = vadd.f32 %v4952_v10, %v1416_v56 }
 0x168   : > { %4533 = vmatmul.mubr.msk.bf16.gmra.mrb[108].mxu1 %vm6526_vm4, %v7089_v6 }
 0x169   : > { %v4844_v1 = vpop.f32.mrb[4].mxu0  ;;  %1992 = vmatprep.mubr.bf16.mxu1 %v7143_v47  ;;  %v7294_v60 = vadd.f32 %v4955_v19, %v1419_v43 }
 0x16a   : > { %v4845_v37 = vpop.f32.mrb[5].mxu0 }
 0x16b   : > { %v4846_v39 = vadd.f32 %v4845_v37, %v4844_v1  ;;  %v4847_v63 = vpop.f32.mrb[6].mxu0  ;;  %v4956_v49 = vpop.f32.mrb[4].mxu1  ;;  %v6011_v37 = vld [vmem:[#allocation7 + $0x48] sm:$0xff]  }
 0x16c   : > { %v4848_v5 = vpop.f32.mrb[7].mxu0  ;;  %v4957_v7 = vpop.f32.mrb[5].mxu1  ;;  %5296 = vmatprep.subr.bf16.mxu1 %v6011_v37 }
 0x16d   : > { %v1424_v18 = vadd.f32 %v4846_v39, %v7281_v54  ;;  %v4849_v27 = vadd.f32 %v4848_v5, %v4847_v63  ;;  %v4958_v6 = vadd.f32 %v4957_v7, %v4956_v49  ;;  %v4959_v61 = vpop.f32.mrb[6].mxu1  ;;  %v6012_v39 = vld [vmem:[#allocation7 + $0x8] sm:$0xff]  }
 0x16e   : > { %1832 = vmatmul.mubr.bf16.gmra.mrb[112].mxu0 %v7113_v21  ;;  %v4960_v26 = vpop.f32.mrb[7].mxu1  ;;  %5297 = vmatpush3.bf16.msra.mxu1 %v6012_v39 }
 0x16f   : > { %v1427_v0 = vadd.f32 %v4849_v27, %v7281_v54  ;;  %1839 = vmatprep.mubr.bf16.mxu0 %v7181_v57  ;;  %v4961_v23 = vadd.f32 %v4960_v26, %v4959_v61  ;;  %v7300_v38 = vadd.f32 %v4958_v6, %v1424_v18  ;;  %v8942_v6 = vld [vmem:[#allocation12_spill] sm:$0xff] }
 0x170   : > { %4537 = vmatmul.mubr.msk.bf16.gmra.mrb[112].mxu1 %vm6526_vm4, %v7124_v50 }
 0x171   : > { %v4850_v13 = vpop.f32.mrb[8].mxu0  ;;  %2000 = vmatprep.mubr.bf16.mxu1 %v7171_v55  ;;  %v7306_v9 = vadd.f32 %v4961_v23, %v1427_v0 }
 0x172   : > { %v4851_v42 = vpop.f32.mrb[9].mxu0 }
 0x173   : > { %v4852_v59 = vadd.f32 %v4851_v42, %v4850_v13  ;;  %v4853_v21 = vpop.f32.mrb[10].mxu0  ;;  %v4962_v53 = vpop.f32.mrb[8].mxu1 }
 0x174   : > { %v4854_v22 = vpop.f32.mrb[11].mxu0  ;;  %v4963_v34 = vpop.f32.mrb[9].mxu1 }
 0x175   : > { %v1432_v40 = vadd.f32 %v4852_v59, %v7281_v54  ;;  %v4855_v8 = vadd.f32 %v4854_v22, %v4853_v21  ;;  %v4964_v11 = vadd.f32 %v4963_v34, %v4962_v53  ;;  %v4965_v20 = vpop.f32.mrb[10].mxu1 }
 0x176   : > { %1840 = vmatmul.mubr.bf16.gmra.mrb[116].mxu0 %v7143_v47  ;;  %v4966_v50 = vpop.f32.mrb[11].mxu1 }
 0x177   : > { %v1435_v32 = vadd.f32 %v4855_v8, %v7281_v54  ;;  %1847 = vmatprep.mubr.bf16.mxu0 %v7207_v28  ;;  %v4967_v24 = vadd.f32 %v4966_v50, %v4965_v20  ;;  %v7312_v25 = vadd.f32 %v4964_v11, %v1432_v40 }
 0x178   : > { %4541 = vmatmul.mubr.msk.bf16.gmra.mrb[116].mxu1 %vm6526_vm4, %v7153_v62 }
 0x179   : > { %v4856_v56 = vpop.f32.mrb[12].mxu0  ;;  %2008 = vmatprep.mubr.bf16.mxu1 %v7192_v3  ;;  %v7318_v47 = vadd.f32 %v4967_v24, %v1435_v32  ;;  %v8943_v32 = vld [vmem:[#allocation13_spill] sm:$0xff] }
 0x17a   : > { %v4857_v30 = vpop.f32.mrb[13].mxu0 }
 0x17b   : > { %v4858_v43 = vadd.f32 %v4857_v30, %v4856_v56  ;;  %v4859_v10 = vpop.f32.mrb[14].mxu0  ;;  %v4968_v19 = vpop.f32.mrb[12].mxu1 }
 0x17c   : > { %v4860_v45 = vpop.f32.mrb[15].mxu0  ;;  %v4969_v63 = vpop.f32.mrb[13].mxu1 }
 0x17d   : > { %v1440_v58 = vadd.f32 %v4858_v43, %v7281_v54  ;;  %v4861_v1 = vadd.f32 %v4860_v45, %v4859_v10  ;;  %v4970_v62 = vadd.f32 %v4969_v63, %v4968_v19  ;;  %v4971_v18 = vpop.f32.mrb[14].mxu1  ;;  %v6013_v43 = vld [vmem:[#allocation7 + $0x50] sm:$0xff]  }
 0x17e   : > { %1848 = vmatmul.mubr.bf16.gmra.mrb[120].mxu0 %v7171_v55  ;;  %v4972_v49 = vpop.f32.mrb[15].mxu1  ;;  %v6014_v10 = vld [vmem:[#allocation7 + $0x10] sm:$0xff]   ;;  %5298 = vmatprep.subr.bf16.mxu1 %v6013_v43 }
 0x17f   : > { %v1443_v5 = vadd.f32 %v4861_v1, %v7281_v54  ;;  %1855 = vmatprep.mubr.bf16.mxu0 %v7202_v41  ;;  %v4973_v27 = vadd.f32 %v4972_v49, %v4971_v18  ;;  %v7324_v48 = vadd.f32 %v4970_v62, %v1440_v58  ;;  %5299 = vmatpush3.bf16.msra.mxu1 %v6014_v10 }
 0x180   : > { %4545 = vmatmul.mubr.msk.bf16.gmra.mrb[120].mxu1 %vm6526_vm4, %v7188_v44 }
 0x181   : > { %v4862_v46 = vpop.f32.mrb[16].mxu0  ;;  %2016 = vmatprep.mubr.bf16.mxu1 %v8942_v6  ;;  %v7330_v61 = vadd.f32 %v4973_v27, %v1443_v5 }
 0x182   : > { %v4863_v7 = vpop.f32.mrb[17].mxu0 }
 0x183   : > { %v4864_v0 = vadd.f32 %v4863_v7, %v4862_v46  ;;  %v4865_v55 = vpop.f32.mrb[18].mxu0  ;;  %v4974_v13 = vpop.f32.mrb[16].mxu1 }
 0x184   : > { %v4866_v26 = vpop.f32.mrb[19].mxu0  ;;  %v4975_v59 = vpop.f32.mrb[17].mxu1 }
 0x185   : > { %v1448_v23 = vadd.f32 %v4864_v0, %v7281_v54  ;;  %v4867_v42 = vadd.f32 %v4866_v26, %v4865_v55  ;;  %v4976_v22 = vadd.f32 %v4975_v59, %v4974_v13  ;;  %v4977_v40 = vpop.f32.mrb[18].mxu1 }
 0x186   : > { %1856 = vmatmul.mubr.bf16.gmra.mrb[124].mxu0 %v7192_v3  ;;  %v4978_v44 = vpop.f32.mrb[19].mxu1 }
 0x187   : > { %v1451_v21 = vadd.f32 %v4867_v42, %v7281_v54  ;;  %5782 = vmatprep.mubr.bf16.mxu0 %v6614_v4  ;;  %v4979_v53 = vadd.f32 %v4978_v44, %v4977_v40  ;;  %v7336_v34 = vadd.f32 %v4976_v22, %v1448_v23 }
 0x188   : > { %4549 = vmatmul.mubr.msk.bf16.gmra.mrb[124].mxu1 %vm6526_vm4, %v8943_v32 }
 0x189   : > { %v4868_v8 = vpop.f32.mrb[20].mxu0  ;;  %v7341_v24 = vadd.f32 %v4979_v53, %v1451_v21  ;;  %3297 = vmatprep.mubr.bf16.mxu1 %v8942_v6 }
 0x18a   : > { %v4869_v11 = vpop.f32.mrb[21].mxu0 }
 0x18b   : > { %v4870_v20 = vadd.f32 %v4869_v11, %v4868_v8  ;;  %v4871_v50 = vpop.f32.mrb[22].mxu0  ;;  %v4980_v4 = vpop.f32.mrb[20].mxu1 }
 0x18c   : > { %v4872_v3 = vpop.f32.mrb[23].mxu0  ;;  %v4981_v45 = vpop.f32.mrb[21].mxu1 }
 0x18d   : > { %v1456_v56 = vadd.f32 %v4870_v20, %v7281_v54  ;;  %v4873_v30 = vadd.f32 %v4872_v3, %v4871_v50  ;;  %v4982_v19 = vadd.f32 %v4981_v45, %v4980_v4  ;;  %v4983_v1 = vpop.f32.mrb[22].mxu1  ;;  %v6015_v50 = vld [vmem:[#allocation7 + $0x58] sm:$0xff]  }
 0x18e   : > { %5783 = vmatmul.mubr.bf16.vlgmr.msra.gmra.mrb[128].mxu0 %v6649_v33  ;;  %v4984_v37 = vpop.f32.mrb[23].mxu1  ;;  %v6016_v3 = vld [vmem:[#allocation7 + $0x18] sm:$0xff]   ;;  %5300 = vmatprep.subr.bf16.mxu1 %v6015_v50 }
 0x18f   : > { %v1459_v58 = vadd.f32 %v4873_v30, %v7281_v54  ;;  %5786 = vmatprep.mubr.bf16.mxu0 %v6685_v2  ;;  %v4985_v39 = vadd.f32 %v4984_v37, %v4983_v1  ;;  %v7348_v5 = vadd.f32 %v4982_v19, %v1456_v56  ;;  %5301 = vmatpush3.bf16.msra.mxu1 %v6016_v3 }
 0x191   : > { %v4874_v63 = vpop.f32.mrb[24].mxu0  ;;  %v7350_v27 = vadd.f32 %v4985_v39, %v1459_v58 }
 0x192   : > { %v4875_v62 = vpop.f32.mrb[25].mxu0 }
 0x193   : > { %v4876_v18 = vadd.f32 %v4875_v62, %v4874_v63  ;;  %v4877_v49 = vpop.f32.mrb[26].mxu0  ;;  %v4986_v7 = vpop.f32.mrb[24].mxu1 }
 0x194   : > { %v4878_v46 = vpop.f32.mrb[27].mxu0  ;;  %v4987_v55 = vpop.f32.mrb[25].mxu1 }
 0x195   : > { %v1464_v33 = vadd.f32 %v4876_v18, %v7281_v54  ;;  %v4879_v0 = vadd.f32 %v4878_v46, %v4877_v49  ;;  %v4988_v26 = vadd.f32 %v4987_v55, %v4986_v7  ;;  %v4989_v23 = vpop.f32.mrb[26].mxu1 }
 0x196   : > { %5787 = vmatmul.mubr.bf16.gmra.mrb[132].mxu0 %v6739_v52  ;;  %v4990_v13 = vpop.f32.mrb[27].mxu1 }
 0x197   : > { %v1467_v2 = vadd.f32 %v4879_v0, %v7281_v54  ;;  %5790 = vmatprep.mubr.bf16.mxu0 %v6795_v51  ;;  %v4991_v42 = vadd.f32 %v4990_v13, %v4989_v23  ;;  %v7356_v21 = vadd.f32 %v4988_v26, %v1464_v33 }
 0x199   : > { %v4880_v59 = vpop.f32.mrb[28].mxu0  ;;  %v7358_v53 = vadd.f32 %v4991_v42, %v1467_v2 }
 0x19a   : > { %v4881_v22 = vpop.f32.mrb[29].mxu0 }
 0x19b   : > { %v4882_v40 = vadd.f32 %v4881_v22, %v4880_v59  ;;  %v4883_v44 = vpop.f32.mrb[30].mxu0  ;;  %v4992_v52 = vpop.f32.mrb[28].mxu1 }
 0x19c   : > { %v4884_v8 = vpop.f32.mrb[31].mxu0  ;;  %v4993_v56 = vpop.f32.mrb[29].mxu1 }
 0x19d   : > { %v1472_v11 = vadd.f32 %v4882_v40, %v7281_v54  ;;  %v4885_v20 = vadd.f32 %v4884_v8, %v4883_v44  ;;  %v4994_v4 = vadd.f32 %v4993_v56, %v4992_v52  ;;  %v4995_v30 = vpop.f32.mrb[30].mxu1  ;;  %v6017_v44 = vld [vmem:[#allocation7 + $0x60] sm:$0xff]  }
 0x19e   : > { %5791 = vmatmul.mubr.bf16.gmra.mrb[136].mxu0 %v6865_v31  ;;  %v4996_v43 = vpop.f32.mrb[31].mxu1  ;;  %v6018_v8 = vld [vmem:[#allocation7 + $0x20] sm:$0xff]   ;;  %5302 = vmatprep.subr.bf16.mxu1 %v6017_v44 }
 0x19f   : > { %v1475_v51 = vadd.f32 %v4885_v20, %v7281_v54  ;;  %5794 = vmatprep.mubr.bf16.mxu0 %v6943_v17  ;;  %v4997_v10 = vadd.f32 %v4996_v43, %v4995_v30  ;;  %v7364_v58 = vadd.f32 %v4994_v4, %v1472_v11  ;;  %5303 = vmatpush3.bf16.msra.mxu1 %v6018_v8 }
 0x1a1   : > { %v4886_v45 = vpop.f32.mrb[32].mxu0  ;;  %v7366_v39 = vadd.f32 %v4997_v10, %v1475_v51 }
 0x1a2   : > { %v4887_v19 = vpop.f32.mrb[33].mxu0 }
 0x1a3   : > { %v4888_v1 = vadd.f32 %v4887_v19, %v4886_v45  ;;  %v4889_v37 = vpop.f32.mrb[34].mxu0  ;;  %v4998_v62 = vpop.f32.mrb[32].mxu1 }
 0x1a4   : > { %v4890_v63 = vpop.f32.mrb[35].mxu0  ;;  %v4999_v49 = vpop.f32.mrb[33].mxu1 }
 0x1a5   : > { %v1480_v31 = vadd.f32 %v4888_v1, %v7281_v54  ;;  %v4891_v18 = vadd.f32 %v4890_v63, %v4889_v37  ;;  %v5000_v46 = vadd.f32 %v4999_v49, %v4998_v62  ;;  %v5001_v33 = vpop.f32.mrb[34].mxu1 }
 0x1a6   : > { %5795 = vmatmul.mubr.bf16.gmra.mrb[140].mxu0 %v6999_v12  ;;  %v5002_v7 = vpop.f32.mrb[35].mxu1 }
 0x1a7   : > { %v1483_v17 = vadd.f32 %v4891_v18, %v7281_v54  ;;  %5798 = vmatprep.mubr.bf16.mxu0 %v7035_v14  ;;  %v7372_v0 = vadd.f32 %v5000_v46, %v1480_v31  ;;  %v5003_v55 = vadd.f32 %v5002_v7, %v5001_v33 }
 0x1a9   : > { %v4892_v2 = vpop.f32.mrb[36].mxu0  ;;  %v7374_v23 = vadd.f32 %v5003_v55, %v1483_v17 }
 0x1aa   : > { %v4893_v26 = vpop.f32.mrb[37].mxu0 }
 0x1ab   : > { %v4894_v13 = vadd.f32 %v4893_v26, %v4892_v2  ;;  %v4895_v42 = vpop.f32.mrb[38].mxu0  ;;  %v5004_v12 = vpop.f32.mrb[36].mxu1 }
 0x1ac   : > { %v4896_v59 = vpop.f32.mrb[39].mxu0  ;;  %v5005_v11 = vpop.f32.mrb[37].mxu1 }
 0x1ad   : > { %v1488_v22 = vadd.f32 %v4894_v13, %v7281_v54  ;;  %v4897_v40 = vadd.f32 %v4896_v59, %v4895_v42  ;;  %v5006_v52 = vadd.f32 %v5005_v11, %v5004_v12  ;;  %v5007_v20 = vpop.f32.mrb[38].mxu1  ;;  %v6019_v42 = vld [vmem:[#allocation7 + $0x68] sm:$0xff]  }
 0x1ae   : > { %5799 = vmatmul.mubr.bf16.gmra.mrb[144].mxu0 %v7084_v16  ;;  %v5008_v50 = vpop.f32.mrb[39].mxu1  ;;  %v6020_v59 = vld [vmem:[#allocation7 + $0x28] sm:$0xff]   ;;  %5304 = vmatprep.subr.bf16.mxu1 %v6019_v42 }
 0x1af   : > { %v1491_v14 = vadd.f32 %v4897_v40, %v7281_v54  ;;  %5802 = vmatprep.mubr.bf16.mxu0 %v7119_v36  ;;  %v7380_v3 = vadd.f32 %v5006_v52, %v1488_v22  ;;  %v5009_v56 = vadd.f32 %v5008_v50, %v5007_v20  ;;  %5305 = vmatpush3.bf16.msra.mxu1 %v6020_v59 }
 0x1b1   : > { %v4898_v51 = vpop.f32.mrb[40].mxu0  ;;  %v7382_v30 = vadd.f32 %v5009_v56, %v1491_v14 }
 0x1b2   : > { %v4899_v4 = vpop.f32.mrb[41].mxu0 }
 0x1b3   : > { %v4900_v43 = vadd.f32 %v4899_v4, %v4898_v51  ;;  %v4901_v10 = vpop.f32.mrb[42].mxu0  ;;  %v5010_v19 = vpop.f32.mrb[40].mxu1 }
 0x1b4   : > { %v4902_v45 = vpop.f32.mrb[43].mxu0  ;;  %v5011_v37 = vpop.f32.mrb[41].mxu1 }
 0x1b5   : > { %v1496_v16 = vadd.f32 %v4900_v43, %v7281_v54  ;;  %v4903_v1 = vadd.f32 %v4902_v45, %v4901_v10  ;;  %v5012_v63 = vadd.f32 %v5011_v37, %v5010_v19  ;;  %v5013_v31 = vpop.f32.mrb[42].mxu1  ;;  %v8944_v45 = vld [vmem:[#allocation14_spill] sm:$0xff] }
 0x1b6   : > { %5803 = vmatmul.mubr.bf16.gmra.mrb[148].mxu0 %v7148_v29  ;;  %v5014_v62 = vpop.f32.mrb[43].mxu1 }
 0x1b7   : > { %v1499_v36 = vadd.f32 %v4903_v1, %v7281_v54  ;;  %5806 = vmatprep.mubr.bf16.mxu0 %v7181_v57  ;;  %v7388_v18 = vadd.f32 %v5012_v63, %v1496_v16  ;;  %v5015_v49 = vadd.f32 %v5014_v62, %v5013_v31 }
 0x1b9   : > { %v4904_v17 = vpop.f32.mrb[44].mxu0  ;;  %v7390_v33 = vadd.f32 %v5015_v49, %v1499_v36 }
 0x1ba   : > { %v4905_v46 = vpop.f32.mrb[45].mxu0 }
 0x1bb   : > { %v4906_v7 = vadd.f32 %v4905_v46, %v4904_v17  ;;  %v4907_v55 = vpop.f32.mrb[46].mxu0  ;;  %v5016_v29 = vpop.f32.mrb[44].mxu1 }
 0x1bc   : > { %v4908_v2 = vpop.f32.mrb[47].mxu0  ;;  %v5017_v22 = vpop.f32.mrb[45].mxu1 }
 0x1bd   : > { %v1504_v26 = vadd.f32 %v4906_v7, %v7281_v54  ;;  %v4909_v13 = vadd.f32 %v4908_v2, %v4907_v55  ;;  %v5018_v12 = vadd.f32 %v5017_v22, %v5016_v29  ;;  %v5019_v40 = vpop.f32.mrb[46].mxu1  ;;  %v6022_v29 = vld [vmem:[#allocation7 + $0x30] sm:$0xff]  }
 0x1be   : > { %5807 = vmatmul.mubr.bf16.gmra.mrb[152].mxu0 %v7207_v28  ;;  %v5020_v44 = vpop.f32.mrb[47].mxu1 }
 0x1bf   : > { %v1507_v57 = vadd.f32 %v4909_v13, %v7281_v54  ;;  %5810 = vmatprep.mubr.bf16.mxu0 %v7202_v41  ;;  %v7396_v8 = vadd.f32 %v5018_v12, %v1504_v26  ;;  %v5021_v11 = vadd.f32 %v5020_v44, %v5019_v40  ;;  %v6021_v26 = vld [vmem:[#allocation7 + $0x70] sm:$0xff]   ;;  %v6024_v40 = vld [vmem:[#allocation7 + $0x80] sm:$0xff]  }
 0x1c0   : > { %5306 = vmatprep.subr.bf16.mxu1 %v6021_v26 }
 0x1c1   : > { %v4910_v14 = vpop.f32.mrb[48].mxu0  ;;  %v7398_v20 = vadd.f32 %v5021_v11, %v1507_v57  ;;  %v6023_v57 = vld [vmem:[#allocation7 + $0xc0] sm:$0xff]   ;;  %5307 = vmatpush3.bf16.msra.mxu1 %v6022_v29 }
 0x1c2   : > { %v4911_v52 = vpop.f32.mrb[49].mxu0  ;;  %5406 = vmatprep.subr.bf16.mxu0 %v6023_v57 }
 0x1c3   : > { %v4912_v50 = vadd.f32 %v4911_v52, %v4910_v14  ;;  %v4913_v56 = vpop.f32.mrb[50].mxu0  ;;  %v5022_v4 = vpop.f32.mrb[48].mxu1  ;;  %5407 = vmatpush3.bf16.msra.mxu0 %v6024_v40 }
 0x1c4   : > { %v4914_v51 = vpop.f32.mrb[51].mxu0  ;;  %v5023_v10 = vpop.f32.mrb[49].mxu1 }
 0x1c5   : > { %v1512_v28 = vadd.f32 %v4912_v50, %v7281_v54  ;;  %v4915_v43 = vadd.f32 %v4914_v51, %v4913_v56  ;;  %v5024_v16 = vadd.f32 %v5023_v10, %v5022_v4  ;;  %v5025_v19 = vpop.f32.mrb[50].mxu1 }
 0x1c6   : > { %5811 = vmatmul.mubr.bf16.gmra.mrb[156].mxu0 %v8944_v45  ;;  %v5026_v1 = vpop.f32.mrb[51].mxu1 }
 0x1c7   : > { %v1515_v41 = vadd.f32 %v4915_v43, %v7281_v54  ;;  %v7403_v37 = vadd.f32 %v5024_v16, %v1512_v28  ;;  %v5027_v36 = vadd.f32 %v5026_v1, %v5025_v19  ;;  %v6025_v28 = vld [vmem:[#allocation7 + $0xc8] sm:$0xff]  }
 0x1c8   : > { %v6026_v43 = vld [vmem:[#allocation7 + $0x88] sm:$0xff]   ;;  %5408 = vmatprep.subr.bf16.mxu0 %v6025_v28 }
 0x1c9   : > { %v4916_v63 = vpop.f32.mrb[52].mxu0  ;;  %v7405_v62 = vadd.f32 %v5027_v36, %v1515_v41  ;;  %5409 = vmatpush3.bf16.msra.mxu0 %v6026_v43 }
 0x1ca   : > { %v4917_v31 = vpop.f32.mrb[53].mxu0 }
 0x1cb   : > { %v4918_v49 = vadd.f32 %v4917_v31, %v4916_v63  ;;  %v4919_v17 = vpop.f32.mrb[54].mxu0  ;;  %v5028_v55 = vpop.f32.mrb[52].mxu1  ;;  %v6027_v31 = vld [vmem:[#allocation7 + $0xd0] sm:$0xff]  }
 0x1cc   : > { %v4920_v46 = vpop.f32.mrb[55].mxu0  ;;  %v5029_v13 = vpop.f32.mrb[53].mxu1  ;;  %5410 = vmatprep.subr.bf16.mxu0 %v6027_v31 }
 0x1cd   : > { %v1520_v7 = vadd.f32 %v4918_v49, %v7281_v54  ;;  %v4921_v2 = vadd.f32 %v4920_v46, %v4919_v17  ;;  %v5030_v59 = vadd.f32 %v5029_v13, %v5028_v55  ;;  %v5031_v22 = vpop.f32.mrb[54].mxu1  ;;  %v6028_v17 = vld [vmem:[#allocation7 + $0x90] sm:$0xff]  }
 0x1ce   : > { %v5032_v12 = vpop.f32.mrb[55].mxu1  ;;  %5411 = vmatpush3.bf16.msra.mxu0 %v6028_v17  ;;  %v6036_v17 = vld [vmem:[#allocation7 + $0xa8] sm:$0xff]  }
 0x1cf   : > { %v1523_v42 = vadd.f32 %v4921_v2, %v7281_v54  ;;  %v7409_v44 = vadd.f32 %v5030_v59, %v1520_v7  ;;  %v5033_v11 = vadd.f32 %v5032_v12, %v5031_v22  ;;  %v6032_v22 = vld [vmem:[#allocation7 + $0x98] sm:$0xff]  }
 0x1d1   : > { %v4922_v14 = vpop.f32.mrb[56].mxu0  ;;  %v7411_v50 = vadd.f32 %v5033_v11, %v1523_v42  ;;  %v6031_v42 = vld [vmem:[#allocation7 + $0xd8] sm:$0xff]  }
 0x1d2   : > { %v4923_v52 = vpop.f32.mrb[57].mxu0  ;;  %v6029_v11 = vld [vmem:[#allocation7 + $0x78] sm:$0xff]   ;;  %5412 = vmatprep.subr.bf16.mxu0 %v6031_v42 }
 0x1d3   : > { %v4924_v56 = vadd.f32 %v4923_v52, %v4922_v14  ;;  %v4925_v51 = vpop.f32.mrb[58].mxu0  ;;  %v5034_v41 = vpop.f32.mrb[56].mxu1  ;;  %v6030_v14 = vld [vmem:[#allocation7 + $0x38] sm:$0xff]   ;;  %5413 = vmatpush3.bf16.msra.mxu0 %v6032_v22  ;;  %5308 = vmatprep.subr.bf16.mxu1 %v6029_v11  ;;  %v6037_v22 = vld [vmem:[#allocation7 + $0xf0] sm:$0xff]  }
 0x1d4   : > { %v4926_v4 = vpop.f32.mrb[59].mxu0  ;;  %v5035_v19 = vpop.f32.mrb[57].mxu1  ;;  %5309 = vmatpush3.bf16.msra.mxu1 %v6030_v14 }
 0x1d5   : > { %v1528_v10 = vadd.f32 %v4924_v56, %v7281_v54  ;;  %v4927_v16 = vadd.f32 %v4926_v4, %v4925_v51  ;;  %v5036_v36 = vadd.f32 %v5035_v19, %v5034_v41  ;;  %v5037_v63 = vpop.f32.mrb[58].mxu1  ;;  %v6033_v4 = vld [vmem:[#allocation7 + $0xe0] sm:$0xff]  }
 0x1d6   : > { %v5038_v49 = vpop.f32.mrb[59].mxu1  ;;  %5414 = vmatprep.subr.bf16.mxu0 %v6033_v4 }
 0x1d7   : > { %v1531_v1 = vadd.f32 %v4927_v16, %v7281_v54  ;;  %v7415_v46 = vadd.f32 %v5036_v36, %v1528_v10  ;;  %v5039_v7 = vadd.f32 %v5038_v49, %v5037_v63  ;;  %v6034_v10 = vld [vmem:[#allocation7 + $0xa0] sm:$0xff]   ;;  %v6035_v49 = vld [vmem:[#allocation7 + $0xe8] sm:$0xff]   ;;  %4626 = vmatmul.mubr.msk.bf16.vlgmr.msra.gmra.mrb[128].mxu1 %vm6526_vm4, %v8943_v32 }
 0x1d8   : > { %5415 = vmatpush3.bf16.msra.mxu0 %v6034_v10 }
 0x1d9   : > { %v4928_v55 = vpop.f32.mrb[60].mxu0  ;;  %v7417_v26 = vadd.f32 %v5039_v7, %v1531_v1  ;;  %5416 = vmatprep.subr.bf16.mxu0 %v6035_v49 }
 0x1da   : > { %v4929_v2 = vpop.f32.mrb[61].mxu0 }
 0x1db   : > { %v4930_v29 = vadd.f32 %v4929_v2, %v4928_v55  ;;  %v4931_v13 = vpop.f32.mrb[62].mxu0  ;;  %v5040_v12 = vpop.f32.mrb[60].mxu1 }
 0x1dc   : > { %v4932_v59 = vpop.f32.mrb[63].mxu0  ;;  %v5041_v52 = vpop.f32.mrb[61].mxu1  ;;  %5417 = vmatpush3.bf16.msra.mxu0 %v6036_v17 }
 0x1dd   : > { %v1536_v57 = vadd.f32 %v4930_v29, %v7281_v54  ;;  %v4933_v40 = vadd.f32 %v4932_v59, %v4931_v13  ;;  %v5042_v51 = vadd.f32 %v5041_v52, %v5040_v12  ;;  %v5043_v28 = vpop.f32.mrb[62].mxu1  ;;  %v6038_v12 = vld [vmem:[#allocation7 + $0xb0] sm:$0xff]   ;;  %5418 = vmatprep.subr.bf16.mxu0 %v6037_v22 }
 0x1de   : > { %v5044_v43 = vpop.f32.mrb[63].mxu1 }
 0x1df   : > { %v1539_v56 = vadd.f32 %v4933_v40, %v7281_v54  ;;  %v7421_v41 = vadd.f32 %v5042_v51, %v1536_v57  ;;  %v5045_v16 = vadd.f32 %v5044_v43, %v5043_v28  ;;  %v6040_v28 = vld [vmem:[#allocation7 + $0xf8] sm:$0xff]  }
 0x1e0   : > { %5419 = vmatpush3.bf16.msra.mxu0 %v6038_v12  ;;  %v6042_v43 = vld [vmem:[#allocation7 + $0xb8] sm:$0xff]  }
 0x1e1   : > { %v5062_v19 = vpop.f32.mrb[64].mxu0  ;;  %v7423_v36 = vadd.f32 %v5045_v16, %v1539_v56  ;;  %5420 = vmatprep.subr.bf16.mxu0 %v6040_v28 }
 0x1e2   : > { %v5063_v1 = vpop.f32.mrb[65].mxu0 }
 0x1e3   : > { %v5064_v63 = vadd.f32 %v5063_v1, %v5062_v19  ;;  %v5065_v31 = vpop.f32.mrb[66].mxu0  ;;  %v5174_v55 = vpop.f32.mrb[64].mxu1 }
 0x1e4   : > { %v5066_v54 = vpop.f32.mrb[67].mxu0  ;;  %v5175_v29 = vpop.f32.mrb[65].mxu1  ;;  %5421 = vmatpush3.bf16.msra.mxu0 %v6042_v43 }
 0x1e5   : > { %v1738_v7 = vadd.f32 %v5064_v63, %v7288_v15  ;;  %v5067_v2 = vadd.f32 %v5066_v54, %v5065_v31  ;;  %v5176_v42 = vadd.f32 %v5175_v29, %v5174_v55  ;;  %v5177_v59 = vpop.f32.mrb[66].mxu1 }
 0x1e6   : > { %v5178_v57 = vpop.f32.mrb[67].mxu1 }
 0x1e7   : > { %v1741_v13 = vadd.f32 %v5067_v2, %v7294_v60  ;;  %v5179_v40 = vadd.f32 %v5178_v57, %v5177_v59  ;;  %v7430_v14 = vadd.f32 %v5176_v42, %v1738_v7 }
 0x1e9   : > { %v5068_v11 = vpop.f32.mrb[68].mxu0  ;;  %v7432_v51 = vadd.f32 %v5179_v40, %v1741_v13 }
 0x1ea   : > { %v5069_v52 = vpop.f32.mrb[69].mxu0 }
 0x1eb   : > { %v5070_v15 = vadd.f32 %v5069_v52, %v5068_v11  ;;  %v5071_v56 = vpop.f32.mrb[70].mxu0  ;;  %v5180_v10 = vpop.f32.mrb[68].mxu1 }
 0x1ec   : > { %v5072_v4 = vpop.f32.mrb[71].mxu0  ;;  %v5181_v19 = vpop.f32.mrb[69].mxu1 }
 0x1ed   : > { %v1746_v60 = vadd.f32 %v5070_v15, %v7300_v38  ;;  %v5073_v16 = vadd.f32 %v5072_v4, %v5071_v56  ;;  %v5182_v63 = vadd.f32 %v5181_v19, %v5180_v10  ;;  %v5183_v31 = vpop.f32.mrb[70].mxu1  ;;  %v6039_v38 = vld [vmem:[#allocation7 + $0x140] sm:$0xff]  }
 0x1ee   : > { %v5184_v49 = vpop.f32.mrb[71].mxu1  ;;  %5518 = vmatprep.subr.bf16.mxu1 %v6039_v38 }
 0x1ef   : > { %v1749_v1 = vadd.f32 %v5073_v16, %v7306_v9  ;;  %v5185_v54 = vadd.f32 %v5184_v49, %v5183_v31  ;;  %v7436_v7 = vadd.f32 %v5182_v63, %v1746_v60  ;;  %v6041_v9 = vld [vmem:[#allocation7 + $0x100] sm:$0xff]  }
 0x1f0   : > { %5519 = vmatpush3.bf16.msra.mxu1 %v6041_v9 }
 0x1f1   : > { %v5074_v17 = vpop.f32.mrb[72].mxu0  ;;  %v7438_v13 = vadd.f32 %v5185_v54, %v1749_v1 }
 0x1f2   : > { %v5075_v55 = vpop.f32.mrb[73].mxu0 }
 0x1f3   : > { %v5076_v2 = vadd.f32 %v5075_v55, %v5074_v17  ;;  %v5077_v29 = vpop.f32.mrb[74].mxu0  ;;  %v5186_v22 = vpop.f32.mrb[72].mxu1 }
 0x1f4   : > { %v5078_v42 = vpop.f32.mrb[75].mxu0  ;;  %v5187_v12 = vpop.f32.mrb[73].mxu1 }
 0x1f5   : > { %v1754_v59 = vadd.f32 %v5076_v2, %v7312_v25  ;;  %v5079_v57 = vadd.f32 %v5078_v42, %v5077_v29  ;;  %v5188_v11 = vadd.f32 %v5187_v12, %v5186_v22  ;;  %v5189_v52 = vpop.f32.mrb[74].mxu1 }
 0x1f6   : > { %v5190_v15 = vpop.f32.mrb[75].mxu1 }
 0x1f7   : > { %v1757_v40 = vadd.f32 %v5079_v57, %v7318_v47  ;;  %v5191_v56 = vadd.f32 %v5190_v15, %v5189_v52  ;;  %v7442_v4 = vadd.f32 %v5188_v11, %v1754_v59 }
 0x1f9   : > { %v5080_v28 = vpop.f32.mrb[76].mxu0  ;;  %v7444_v16 = vadd.f32 %v5191_v56, %v1757_v40  ;;  %v6043_v40 = vld [vmem:[#allocation7 + $0x148] sm:$0xff]  }
 0x1fa   : > { %v5081_v43 = vpop.f32.mrb[77].mxu0  ;;  %5520 = vmatprep.subr.bf16.mxu1 %v6043_v40  ;;  %v6044_v56 = vld [vmem:[#allocation7 + $0x108] sm:$0xff]  }
 0x1fb   : > { %v5082_v60 = vadd.f32 %v5081_v43, %v5080_v28  ;;  %v5083_v10 = vpop.f32.mrb[78].mxu0  ;;  %v5192_v1 = vpop.f32.mrb[76].mxu1  ;;  %5521 = vmatpush3.bf16.msra.mxu1 %v6044_v56 }
 0x1fc   : > { %v5084_v25 = vpop.f32.mrb[79].mxu0  ;;  %v5193_v31 = vpop.f32.mrb[77].mxu1 }
 0x1fd   : > { %v1762_v19 = vadd.f32 %v5082_v60, %v7324_v48  ;;  %v5085_v63 = vadd.f32 %v5084_v25, %v5083_v10  ;;  %v5194_v49 = vadd.f32 %v5193_v31, %v5192_v1  ;;  %v5195_v54 = vpop.f32.mrb[78].mxu1 }
 0x1fe   : > { %v5196_v17 = vpop.f32.mrb[79].mxu1 }
 0x1ff   : > { %v1765_v47 = vadd.f32 %v5085_v63, %v7330_v61  ;;  %v5197_v55 = vadd.f32 %v5196_v17, %v5195_v54  ;;  %v7448_v29 = vadd.f32 %v5194_v49, %v1762_v19 }
 0x201   : > { %v5086_v2 = vpop.f32.mrb[80].mxu0  ;;  %v7450_v22 = vadd.f32 %v5197_v55, %v1765_v47 }
 0x202   : > { %v5087_v38 = vpop.f32.mrb[81].mxu0 }
 0x203   : > { %v5088_v42 = vadd.f32 %v5087_v38, %v5086_v2  ;;  %v5089_v59 = vpop.f32.mrb[82].mxu0  ;;  %v5198_v9 = vpop.f32.mrb[80].mxu1 }
 0x204   : > { %v5090_v57 = vpop.f32.mrb[83].mxu0  ;;  %v5199_v11 = vpop.f32.mrb[81].mxu1 }
 0x205   : > { %v1770_v48 = vadd.f32 %v5088_v42, %v7336_v34  ;;  %v5091_v12 = vadd.f32 %v5090_v57, %v5089_v59  ;;  %v5200_v52 = vadd.f32 %v5199_v11, %v5198_v9  ;;  %v5201_v15 = vpop.f32.mrb[82].mxu1 }
 0x206   : > { %v5202_v28 = vpop.f32.mrb[83].mxu1 }
 0x207   : > { %v1773_v61 = vadd.f32 %v5091_v12, %v7341_v24  ;;  %v5203_v43 = vadd.f32 %v5202_v28, %v5201_v15  ;;  %v7454_v10 = vadd.f32 %v5200_v52, %v1770_v48  ;;  %v6045_v28 = vld [vmem:[#allocation7 + $0x150] sm:$0xff]  }
 0x208   : > { %5522 = vmatprep.subr.bf16.mxu1 %v6045_v28 }
 0x209   : > { %v5092_v60 = vpop.f32.mrb[84].mxu0  ;;  %v7456_v34 = vadd.f32 %v5203_v43, %v1773_v61 }
 0x20a   : > { %v5093_v25 = vpop.f32.mrb[85].mxu0 }
 0x20b   : > { %v5094_v19 = vadd.f32 %v5093_v25, %v5092_v60  ;;  %v5095_v1 = vpop.f32.mrb[86].mxu0  ;;  %v5204_v47 = vpop.f32.mrb[84].mxu1 }
 0x20c   : > { %v5096_v63 = vpop.f32.mrb[87].mxu0  ;;  %v5205_v49 = vpop.f32.mrb[85].mxu1 }
 0x20d   : > { %v1778_v31 = vadd.f32 %v5094_v19, %v7348_v5  ;;  %v5097_v24 = vadd.f32 %v5096_v63, %v5095_v1  ;;  %v5206_v17 = vadd.f32 %v5205_v49, %v5204_v47  ;;  %v5207_v55 = vpop.f32.mrb[86].mxu1  ;;  %v6046_v1 = vld [vmem:[#allocation7 + $0x110] sm:$0xff]  }
 0x20e   : > { %v5208_v2 = vpop.f32.mrb[87].mxu1  ;;  %5523 = vmatpush3.bf16.msra.mxu1 %v6046_v1 }
 0x20f   : > { %v1781_v54 = vadd.f32 %v5097_v24, %v7350_v27  ;;  %v5209_v38 = vadd.f32 %v5208_v2, %v5207_v55  ;;  %v7460_v59 = vadd.f32 %v5206_v17, %v1778_v31 }
 0x211   : > { %v5098_v42 = vpop.f32.mrb[88].mxu0  ;;  %v7462_v12 = vadd.f32 %v5209_v38, %v1781_v54 }
 0x212   : > { %v5099_v57 = vpop.f32.mrb[89].mxu0 }
 0x213   : > { %v5100_v48 = vadd.f32 %v5099_v57, %v5098_v42  ;;  %v5101_v9 = vpop.f32.mrb[90].mxu0  ;;  %v5210_v11 = vpop.f32.mrb[88].mxu1 }
 0x214   : > { %v5102_v40 = vpop.f32.mrb[91].mxu0  ;;  %v5211_v52 = vpop.f32.mrb[89].mxu1 }
 0x215   : > { %v1786_v5 = vadd.f32 %v5100_v48, %v7356_v21  ;;  %v5103_v61 = vadd.f32 %v5102_v40, %v5101_v9  ;;  %v5212_v15 = vadd.f32 %v5211_v52, %v5210_v11  ;;  %v5213_v56 = vpop.f32.mrb[90].mxu1 }
 0x216   : > { %v5214_v43 = vpop.f32.mrb[91].mxu1 }
 0x217   : > { %v1789_v27 = vadd.f32 %v5103_v61, %v7358_v53  ;;  %v5215_v60 = vadd.f32 %v5214_v43, %v5213_v56  ;;  %v7466_v19 = vadd.f32 %v5212_v15, %v1786_v5 }
 0x219   : > { %v5104_v25 = vpop.f32.mrb[92].mxu0  ;;  %v7468_v24 = vadd.f32 %v5215_v60, %v1789_v27 }
 0x21a   : > { %v5105_v63 = vpop.f32.mrb[93].mxu0 }
 0x21b   : > { %v5106_v31 = vadd.f32 %v5105_v63, %v5104_v25  ;;  %v5107_v47 = vpop.f32.mrb[94].mxu0  ;;  %v5216_v53 = vpop.f32.mrb[92].mxu1 }
 0x21c   : > { %v5108_v21 = vpop.f32.mrb[95].mxu0  ;;  %v5217_v17 = vpop.f32.mrb[93].mxu1 }
 0x21d   : > { %v1794_v49 = vadd.f32 %v5106_v31, %v7364_v58  ;;  %v5109_v54 = vadd.f32 %v5108_v21, %v5107_v47  ;;  %v5218_v2 = vadd.f32 %v5217_v17, %v5216_v53  ;;  %v5219_v38 = vpop.f32.mrb[94].mxu1  ;;  %v6047_v31 = vld [vmem:[#allocation7 + $0x158] sm:$0xff]  }
 0x21e   : > { %v5220_v42 = vpop.f32.mrb[95].mxu1  ;;  %5524 = vmatprep.subr.bf16.mxu1 %v6047_v31 }
 0x21f   : > { %v1797_v55 = vadd.f32 %v5109_v54, %v7366_v39  ;;  %v5221_v57 = vadd.f32 %v5220_v42, %v5219_v38  ;;  %v7472_v9 = vadd.f32 %v5218_v2, %v1794_v49 }
 0x221   : > { %v5110_v48 = vpop.f32.mrb[96].mxu0  ;;  %v7474_v61 = vadd.f32 %v5221_v57, %v1797_v55 }
 0x222   : > { %v5111_v40 = vpop.f32.mrb[97].mxu0 }
 0x223   : > { %v5112_v5 = vadd.f32 %v5111_v40, %v5110_v48  ;;  %v5113_v11 = vpop.f32.mrb[98].mxu0  ;;  %v5222_v27 = vpop.f32.mrb[96].mxu1  ;;  %v6049_v48 = vld [vmem:[#allocation7 + $0x1c0] sm:$0xff]  }
 0x224   : > { %v5114_v52 = vpop.f32.mrb[99].mxu0  ;;  %v5223_v56 = vpop.f32.mrb[97].mxu1  ;;  %5630 = vmatprep.subr.bf16.mxu0 %v6049_v48 }
 0x225   : > { %v1802_v58 = vadd.f32 %v5112_v5, %v7372_v0  ;;  %v5115_v15 = vadd.f32 %v5114_v52, %v5113_v11  ;;  %v5224_v28 = vadd.f32 %v5223_v56, %v5222_v27  ;;  %v5225_v43 = vpop.f32.mrb[98].mxu1  ;;  %v6048_v0 = vld [vmem:[#allocation7 + $0x118] sm:$0xff]  }
 0x226   : > { %v5226_v60 = vpop.f32.mrb[99].mxu1  ;;  %5525 = vmatpush3.bf16.msra.mxu1 %v6048_v0 }
 0x227   : > { %v1805_v39 = vadd.f32 %v5115_v15, %v7374_v23  ;;  %v5227_v25 = vadd.f32 %v5226_v60, %v5225_v43  ;;  %v7478_v63 = vadd.f32 %v5224_v28, %v1802_v58  ;;  %v6052_v60 = vld [vmem:[#allocation7 + $0x120] sm:$0xff]  }
 0x229   : > { %v5116_v1 = vpop.f32.mrb[100].mxu0  ;;  %v7480_v53 = vadd.f32 %v5227_v25, %v1805_v39 }
 0x22a   : > { %v5117_v47 = vpop.f32.mrb[101].mxu0 }
 0x22b   : > { %v5118_v21 = vadd.f32 %v5117_v47, %v5116_v1  ;;  %v5119_v49 = vpop.f32.mrb[102].mxu0  ;;  %v5228_v55 = vpop.f32.mrb[100].mxu1 }
 0x22c   : > { %v5120_v54 = vpop.f32.mrb[103].mxu0  ;;  %v5229_v2 = vpop.f32.mrb[101].mxu1 }
 0x22d   : > { %v1810_v17 = vadd.f32 %v5118_v21, %v7380_v3  ;;  %v5121_v23 = vadd.f32 %v5120_v54, %v5119_v49  ;;  %v5230_v42 = vadd.f32 %v5229_v2, %v5228_v55  ;;  %v5231_v57 = vpop.f32.mrb[102].mxu1 }
 0x22e   : > { %v5232_v40 = vpop.f32.mrb[103].mxu1 }
 0x22f   : > { %v1813_v38 = vadd.f32 %v5121_v23, %v7382_v30  ;;  %v5233_v5 = vadd.f32 %v5232_v40, %v5231_v57  ;;  %v7484_v52 = vadd.f32 %v5230_v42, %v1810_v17  ;;  %v6051_v30 = vld [vmem:[#allocation7 + $0x160] sm:$0xff]  }
 0x230   : > { %5526 = vmatprep.subr.bf16.mxu1 %v6051_v30 }
 0x231   : > { %v5122_v11 = vpop.f32.mrb[104].mxu0  ;;  %v7486_v56 = vadd.f32 %v5233_v5, %v1813_v38  ;;  %5527 = vmatpush3.bf16.msra.mxu1 %v6052_v60 }
 0x232   : > { %v5123_v58 = vpop.f32.mrb[105].mxu0 }
 0x233   : > { %v5124_v27 = vadd.f32 %v5123_v58, %v5122_v11  ;;  %v5125_v15 = vpop.f32.mrb[106].mxu0  ;;  %v5234_v28 = vpop.f32.mrb[104].mxu1 }
 0x234   : > { %v5126_v3 = vpop.f32.mrb[107].mxu0  ;;  %v5235_v25 = vpop.f32.mrb[105].mxu1 }
 0x235   : > { %v1818_v39 = vadd.f32 %v5124_v27, %v7388_v18  ;;  %v5127_v43 = vadd.f32 %v5126_v3, %v5125_v15  ;;  %v5236_v31 = vadd.f32 %v5235_v25, %v5234_v28  ;;  %v5237_v47 = vpop.f32.mrb[106].mxu1 }
 0x236   : > { %v5238_v21 = vpop.f32.mrb[107].mxu1 }
 0x237   : > { %v1821_v1 = vadd.f32 %v5127_v43, %v7390_v33  ;;  %v5239_v49 = vadd.f32 %v5238_v21, %v5237_v47  ;;  %v7490_v54 = vadd.f32 %v5236_v31, %v1818_v39  ;;  %v6056_v31 = vld [vmem:[#allocation7 + $0x128] sm:$0xff]  }
 0x239   : > { %v5128_v0 = vpop.f32.mrb[108].mxu0  ;;  %v7492_v18 = vadd.f32 %v5239_v49, %v1821_v1  ;;  %v6055_v1 = vld [vmem:[#allocation7 + $0x168] sm:$0xff]  }
 0x23a   : > { %v5129_v17 = vpop.f32.mrb[109].mxu0  ;;  %5528 = vmatprep.subr.bf16.mxu1 %v6055_v1 }
 0x23b   : > { %v5130_v55 = vadd.f32 %v5129_v17, %v5128_v0  ;;  %v5131_v23 = vpop.f32.mrb[110].mxu0  ;;  %v5240_v42 = vpop.f32.mrb[108].mxu1  ;;  %5529 = vmatpush3.bf16.msra.mxu1 %v6056_v31 }
 0x23c   : > { %v5132_v2 = vpop.f32.mrb[111].mxu0  ;;  %v5241_v33 = vpop.f32.mrb[109].mxu1 }
 0x23d   : > { %v1826_v38 = vadd.f32 %v5130_v55, %v7396_v8  ;;  %v5133_v57 = vadd.f32 %v5132_v2, %v5131_v23  ;;  %v5242_v40 = vadd.f32 %v5241_v33, %v5240_v42  ;;  %v5243_v5 = vpop.f32.mrb[110].mxu1 }
 0x23e   : > { %v5244_v11 = vpop.f32.mrb[111].mxu1 }
 0x23f   : > { %v1829_v48 = vadd.f32 %v5133_v57, %v7398_v20  ;;  %v5245_v58 = vadd.f32 %v5244_v11, %v5243_v5  ;;  %v7496_v15 = vadd.f32 %v5242_v40, %v1826_v38 }
 0x241   : > { %v5134_v27 = vpop.f32.mrb[112].mxu0  ;;  %v7498_v43 = vadd.f32 %v5245_v58, %v1829_v48 }
 0x242   : > { %v5135_v3 = vpop.f32.mrb[113].mxu0 }
 0x243   : > { %v5136_v39 = vadd.f32 %v5135_v3, %v5134_v27  ;;  %v5137_v28 = vpop.f32.mrb[114].mxu0  ;;  %v5246_v60 = vpop.f32.mrb[112].mxu1 }
 0x244   : > { %v5138_v30 = vpop.f32.mrb[115].mxu0  ;;  %v5247_v20 = vpop.f32.mrb[113].mxu1 }
 0x245   : > { %v1834_v8 = vadd.f32 %v5136_v39, %v7403_v37  ;;  %v5139_v25 = vadd.f32 %v5138_v30, %v5137_v28  ;;  %v5248_v21 = vadd.f32 %v5247_v20, %v5246_v60  ;;  %v5249_v49 = vpop.f32.mrb[114].mxu1 }
 0x246   : > { %v5250_v0 = vpop.f32.mrb[115].mxu1 }
 0x247   : > { %v1837_v47 = vadd.f32 %v5139_v25, %v7405_v62  ;;  %v5251_v17 = vadd.f32 %v5250_v0, %v5249_v49  ;;  %v7502_v23 = vadd.f32 %v5248_v21, %v1834_v8  ;;  %v6060_v21 = vld [vmem:[#allocation7 + $0x130] sm:$0xff]  }
 0x249   : > { %v5140_v55 = vpop.f32.mrb[116].mxu0  ;;  %v7504_v37 = vadd.f32 %v5251_v17, %v1837_v47  ;;  %v6059_v47 = vld [vmem:[#allocation7 + $0x170] sm:$0xff]  }
 0x24a   : > { %v5141_v2 = vpop.f32.mrb[117].mxu0  ;;  %5530 = vmatprep.subr.bf16.mxu1 %v6059_v47 }
 0x24b   : > { %v5142_v38 = vadd.f32 %v5141_v2, %v5140_v55  ;;  %v5143_v42 = vpop.f32.mrb[118].mxu0  ;;  %v5252_v48 = vpop.f32.mrb[116].mxu1  ;;  %5531 = vmatpush3.bf16.msra.mxu1 %v6060_v21 }
 0x24c   : > { %v5144_v57 = vpop.f32.mrb[119].mxu0  ;;  %v5253_v62 = vpop.f32.mrb[117].mxu1 }
 0x24d   : > { %v1842_v33 = vadd.f32 %v5142_v38, %v7409_v44  ;;  %v5145_v40 = vadd.f32 %v5144_v57, %v5143_v42  ;;  %v5254_v11 = vadd.f32 %v5253_v62, %v5252_v48  ;;  %v5255_v58 = vpop.f32.mrb[118].mxu1 }
 0x24e   : > { %v5256_v27 = vpop.f32.mrb[119].mxu1 }
 0x24f   : > { %v1845_v5 = vadd.f32 %v5145_v40, %v7411_v50  ;;  %v5257_v3 = vadd.f32 %v5256_v27, %v5255_v58  ;;  %v7508_v28 = vadd.f32 %v5254_v11, %v1842_v33 }
 0x251   : > { %v5146_v39 = vpop.f32.mrb[120].mxu0  ;;  %v7510_v25 = vadd.f32 %v5257_v3, %v1845_v5 }
 0x252   : > { %v5147_v30 = vpop.f32.mrb[121].mxu0 }
 0x253   : > { %v5148_v8 = vadd.f32 %v5147_v30, %v5146_v39  ;;  %v5149_v60 = vpop.f32.mrb[122].mxu0  ;;  %v5258_v31 = vpop.f32.mrb[120].mxu1 }
 0x254   : > { %v5150_v1 = vpop.f32.mrb[123].mxu0  ;;  %v5259_v50 = vpop.f32.mrb[121].mxu1 }
 0x255   : > { %v1850_v44 = vadd.f32 %v5148_v8, %v7415_v46  ;;  %v5151_v20 = vadd.f32 %v5150_v1, %v5149_v60  ;;  %v5260_v0 = vadd.f32 %v5259_v50, %v5258_v31  ;;  %v5261_v17 = vpop.f32.mrb[122].mxu1 }
 0x256   : > { %v5262_v55 = vpop.f32.mrb[123].mxu1 }
 0x257   : > { %v1853_v49 = vadd.f32 %v5151_v20, %v7417_v26  ;;  %v5263_v2 = vadd.f32 %v5262_v55, %v5261_v17  ;;  %v7514_v42 = vadd.f32 %v5260_v0, %v1850_v44  ;;  %v6063_v0 = vld [vmem:[#allocation7 + $0x178] sm:$0xff]  }
 0x258   : > { %v6064_v17 = vld [vmem:[#allocation7 + $0x138] sm:$0xff]   ;;  %5532 = vmatprep.subr.bf16.mxu1 %v6063_v0 }
 0x259   : > { %v5152_v38 = vpop.f32.mrb[124].mxu0  ;;  %v7516_v46 = vadd.f32 %v5263_v2, %v1853_v49  ;;  %5533 = vmatpush3.bf16.msra.mxu1 %v6064_v17 }
 0x25a   : > { %v5153_v57 = vpop.f32.mrb[125].mxu0 }
 0x25b   : > { %v5154_v33 = vadd.f32 %v5153_v57, %v5152_v38  ;;  %v5155_v48 = vpop.f32.mrb[126].mxu0  ;;  %v5264_v5 = vpop.f32.mrb[124].mxu1 }
 0x25c   : > { %v5156_v40 = vpop.f32.mrb[127].mxu0  ;;  %v5265_v26 = vpop.f32.mrb[125].mxu1 }
 0x25d   : > { %v1858_v62 = vadd.f32 %v5154_v33, %v7421_v41  ;;  %v5157_v11 = vadd.f32 %v5156_v40, %v5155_v48  ;;  %v5266_v27 = vadd.f32 %v5265_v26, %v5264_v5  ;;  %v5267_v3 = vpop.f32.mrb[126].mxu1 }
 0x25e   : > { %v5268_v39 = vpop.f32.mrb[127].mxu1 }
 0x25f   : > { %v1861_v58 = vadd.f32 %v5157_v11, %v7423_v36  ;;  %v5269_v30 = vadd.f32 %v5268_v39, %v5267_v3  ;;  %v7520_v60 = vadd.f32 %v5266_v27, %v1858_v62 }
 0x261   : > { %v5784_v8 = vpop.f32.mrb[128].mxu0  ;;  %v7524_v47 = vadd.f32 %v5269_v30, %v1861_v58 }
 0x262   : > { %v2068_v1 = vadd.f32 %v5784_v8, %v7436_v7  ;;  %v2059_v44 = vpop.f32.mrb[129].mxu0 }
 0x263   : > { %v2060_v31 = vadd.f32 %v2059_v44, %v7430_v14  ;;  %v5785_v20 = vpop.f32.mrb[130].mxu0 }
 0x264   : > { %v2188_v41 = vmax.f32 %v2068_v1, 0.0  ;;  %v2071_v21 = vadd.f32 %v5785_v20, %v7438_v13  ;;  %v2062_v50 = vpop.f32.mrb[131].mxu0 }
 0x265   : > { %v2186_v36 = vmax.f32 %v2060_v31, 0.0  ;;  %v2063_v49 = vadd.f32 %v2062_v50, %v7432_v51 }
 0x266   : > { %v2253_v55 = vrot.slane %v2188_v41, 7  ;;  %v2189_v2 = vmax.f32 %v2071_v21, 0.0  ;;  %v7607_v41 = vld [vmem:[#allocation7 + $0x200] sm:$0xff]  }
 0x267   : > { %v2250_v38 = vrot.slane %v2186_v36, 7  ;;  %v2187_v57 = vmax.f32 %v2063_v49, 0.0  ;;  %5814 = vmatprep.subr.bf16.mxu1 %v7607_v41 }
 0x268   : > { %v7529_v7 = vsel %vm338_vm0, 0.0, %v2253_v55  ;;  %v2254_v14 = vrot.slane %v2189_v2, 7 }
 0x269   : > { %v2428_v33 = vrot.slane %v7529_v7, 1  ;;  %v2346_v13 = vsel %vm338_vm0, 0.0, %v2250_v38  ;;  %v2251_v48 = vrot.slane %v2187_v57, 7  ;;  %v5788_v40 = vpop.f32.mrb[132].mxu0 }
 0x26a   : > { %v2423_v62 = vrot.slane %v2346_v13, 1  ;;  %v7535_v5 = vsel %vm338_vm0, %v2253_v55, %v2254_v14  ;;  %v7538_v11 = vsel %vm338_vm0, %v2254_v14, 0.0  ;;  %v2075_v26 = vpop.f32.mrb[133].mxu0  ;;  %v2543_v58 = vrot.slane %v2346_v13, 2 }
 0x26b   : > { %v2429_v27 = vrot.slane %v7535_v5, 1  ;;  %v2431_v3 = vrot.slane %v7538_v11, 1  ;;  %v5789_v30 = vpop.f32.mrb[134].mxu0  ;;  %v7544_v8 = vsel %vm338_vm0, %v2250_v38, %v2251_v48  ;;  %v7547_v1 = vsel %vm338_vm0, %v2251_v48, 0.0 }
 0x26c   : > { %v2084_v44 = vadd.f32 %v5788_v40, %v7448_v29  ;;  %v2076_v31 = vadd.f32 %v2075_v26, %v7442_v4  ;;  %v2078_v20 = vpop.f32.mrb[135].mxu0  ;;  %v2424_v21 = vrot.slane %v7544_v8, 1  ;;  %v2426_v50 = vrot.slane %v7547_v1, 1 }
 0x26d   : > { %v2544_v36 = vrot.slane %v7544_v8, 2  ;;  %v2087_v17 = vadd.f32 %v5789_v30, %v7450_v22  ;;  %v2079_v2 = vadd.f32 %v2078_v20, %v7444_v16  ;;  %v4629_v57 = vpack.c.bf16 %v7544_v8, %v2250_v38  ;;  %v6053_v30 = vld [vmem:[#allocation7 + $0x1c8] sm:$0xff]  }
 0x26e   : > { %v2192_v49 = vmax.f32 %v2084_v44, 0.0  ;;  %v2190_v0 = vmax.f32 %v2076_v31, 0.0  ;;  %v7559_v29 = vpack.c.bf16 %v7535_v5, %v2253_v55  ;;  %v2425_v4 = vsel %vm521_vm1, %v2423_v62, %v2424_v21  ;;  %v6050_v44 = vld [vmem:[#allocation7 + $0x180] sm:$0xff]  }
 0x26f   : > { %v2427_v14 = vsel %vm521_vm1, %v2424_v21, %v2426_v50  ;;  %v2193_v40 = vmax.f32 %v2087_v17, 0.0  ;;  %v2191_v26 = vmax.f32 %v2079_v2, 0.0  ;;  %4690 = vmatprep.mubr.msk.bf16.mxu0 %vm6526_vm4, %v4629_v57  ;;  %v2430_v38 = vsel %vm521_vm1, %v2428_v33, %v2429_v27  ;;  %v6057_v33 = vld [vmem:[#allocation7 + $0x1d0] sm:$0xff]  }
 0x270   : > { %v7563_v13 = vrot.slane %v2192_v49, 7  ;;  %v2256_v48 = vrot.slane %v2190_v0, 7  ;;  %v7567_v16 = vpack.c.bf16 %v2427_v14, %v2425_v4  ;;  %v2432_v55 = vsel %vm521_vm1, %v2429_v27, %v2431_v3  ;;  %3459 = vmatmul.mubr.bf16.vlgmr.msra.gmra.mrb[160].mxu0 %v8944_v45  ;;  %v6054_v14 = vld [vmem:[#allocation7 + $0x188] sm:$0xff]  }
 0x271   : > { %v5792_v22 = vpop.f32.mrb[136].mxu0  ;;  %v2545_v62 = vsel %vm650_vm5, %v2543_v58, %v2544_v36  ;;  %v2260_v20 = vrot.slane %v2193_v40, 7  ;;  %v2257_v21 = vrot.slane %v2191_v26, 7  ;;  %v2546_v49 = vrot.slane %v7547_v1, 2  ;;  %4694 = vmatprep.mubr.msk.bf16.mxu0 %vm6526_vm4, %v7559_v29  ;;  %5631 = vmatpush3.bf16.msra.mxu0 %v6050_v44 }
 0x272   : > { %v7574_v8 = vsel %vm338_vm0, 0.0, %v7563_v13  ;;  %v7577_v31 = vsel %vm338_vm0, 0.0, %v2256_v48  ;;  %v2091_v50 = vpop.f32.mrb[137].mxu0  ;;  %3305 = vmatprep.mubr.bf16.mxu1 %v7567_v16  ;;  %5632 = vmatprep.subr.bf16.mxu0 %v6053_v30  ;;  %v2100_v40 = vadd.f32 %v5792_v22, %v7460_v59  ;;  %v7616_v39 = vpack.c.bf16 %v2432_v55, %v2430_v38  ;;  %v6058_v38 = vld [vmem:[#allocation7 + $0x190] sm:$0xff]  }
 0x273   : > { %v2433_v58 = vrot.slane %v7577_v31, 1  ;;  %v5793_v3 = vpop.f32.mrb[138].mxu0  ;;  %v7590_v0 = vsel %vm338_vm0, %v7563_v13, %v2260_v20  ;;  %v7593_v17 = vsel %vm338_vm0, %v2260_v20, 0.0  ;;  %v7596_v1 = vsel %vm338_vm0, %v2256_v48, %v2257_v21  ;;  %4630 = vmatmul.mubr.msk.bf16.gmra.mrb[132].mxu1 %vm6526_vm4, %v4629_v57 }
 0x274   : > { %v7599_v2 = vsel %vm338_vm0, %v2257_v21, 0.0  ;;  %v2094_v4 = vpop.f32.mrb[139].mxu0  ;;  %v2434_v51 = vrot.slane %v7596_v1, 1  ;;  %v2092_v26 = vadd.f32 %v2091_v50, %v7454_v10  ;;  %v2103_v27 = vadd.f32 %v5793_v3, %v7462_v12  ;;  %3313 = vmatprep.mubr.bf16.mxu1 %v7616_v39 }
 0x275   : > { %v2436_v57 = vrot.slane %v7599_v2, 1  ;;  %v2095_v30 = vadd.f32 %v2094_v4, %v7456_v34  ;;  %v2547_v21 = vsel %vm650_vm5, %v2544_v36, %v2546_v49  ;;  %v7622_v20 = vpack.c.bf16 %v7596_v1, %v2256_v48  ;;  %5633 = vmatpush3.bf16.msra.mxu0 %v6054_v14 }
 0x276   : > { %v2435_v45 = vsel %vm521_vm1, %v2433_v58, %v2434_v51  ;;  %v2196_v44 = vmax.f32 %v2100_v40, 0.0  ;;  %v2194_v59 = vmax.f32 %v2092_v26, 0.0  ;;  %v2197_v22 = vmax.f32 %v2103_v27, 0.0  ;;  %5634 = vmatprep.subr.bf16.mxu0 %v6057_v33  ;;  %v6061_v27 = vld [vmem:[#allocation7 + $0x1d8] sm:$0xff]  }
 0x277   : > { %8945 = vst [vmem:[#allocation15_spill] sm:$0xff] %v7622_v20  ;;  %v7626_v10 = vpack.c.bf16 %v2547_v21, %v2545_v62  ;;  %v2195_v55 = vmax.f32 %v2095_v30, 0.0  ;;  %v2437_v48 = vsel %vm521_vm1, %v2434_v51, %v2436_v57  ;;  %v8946_v50 = vrot.slane %v7535_v5, 2 }
 0x278   : > { %v8947_v49 = vrot.slane %v7529_v7, 2  ;;  %v7635_v3 = vrot.slane %v2196_v44, 7  ;;  %v7637_v62 = vrot.slane %v2194_v59, 7  ;;  %v2266_v4 = vrot.slane %v2197_v22, 7  ;;  %v6068_v59 = vld [vmem:[#allocation7 + $0x1a8] sm:$0xff]  }
 0x279   : > { %v5796_v12 = vpop.f32.mrb[140].mxu0  ;;  %3467 = vmatmul.mubr.bf16.gmra.mrb[164].mxu0 %v7626_v10  ;;  %v2263_v14 = vrot.slane %v2195_v55, 7  ;;  %v7648_v40 = vpack.c.bf16 %v2437_v48, %v2435_v45  ;;  %v8949_v55 = vrot.slane %v7538_v11, 2  ;;  %v6069_v11 = vld [vmem:[#allocation7 + $0x1f0] sm:$0xff]  }
 0x27a   : > { %v2116_v34 = vadd.f32 %v5796_v12, %v7472_v9  ;;  %v2107_v36 = vpop.f32.mrb[141].mxu0  ;;  %v2550_v58 = vsel %vm650_vm5, %v8947_v49, %v8946_v50  ;;  %4698 = vmatprep.mubr.msk.bf16.mxu0 %vm6526_vm4, %v7622_v20  ;;  %v7652_v21 = vsel %vm338_vm0, 0.0, %v7635_v3  ;;  %v7660_v57 = vsel %vm338_vm0, %v7635_v3, %v2266_v4  ;;  %5635 = vmatpush3.bf16.msra.mxu0 %v6058_v38  ;;  %v6065_v12 = vld [vmem:[#allocation7 + $0x1e0] sm:$0xff]  }
 0x27b   : > { %v2108_v33 = vadd.f32 %v2107_v36, %v7466_v19  ;;  %v5797_v9 = vpop.f32.mrb[142].mxu0  ;;  %4634 = vmatmul.mubr.msk.bf16.gmra.mrb[136].mxu1 %vm6526_vm4, %v7559_v29  ;;  %8948 = vst [vmem:[#allocation17_spill] sm:$0xff] %v7648_v40  ;;  %v7656_v19 = vsel %vm338_vm0, 0.0, %v7637_v62  ;;  %v7663_v44 = vsel %vm338_vm0, %v2266_v4, 0.0  ;;  %5636 = vmatprep.subr.bf16.mxu0 %v6061_v27  ;;  %v7676_v48 = vsel %vm338_vm0, %v7637_v62, %v2263_v14  ;;  %v6066_v38 = vld [vmem:[#allocation7 + $0x1a0] sm:$0xff]   ;;  %v6067_v27 = vld [vmem:[#allocation7 + $0x1e8] sm:$0xff]  }
 0x27c   : > { %v2200_v51 = vmax.f32 %v2116_v34, 0.0  ;;  %v2119_v7 = vadd.f32 %v5797_v9, %v7474_v61  ;;  %v2110_v26 = vpop.f32.mrb[143].mxu0  ;;  %v6062_v61 = vld [vmem:[#allocation7 + $0x198] sm:$0xff]   ;;  %3321 = vmatprep.mubr.bf16.mxu1 %v7648_v40  ;;  %v7679_v50 = vsel %vm338_vm0, %v2263_v14, 0.0 }
 0x27d   : > { %v2198_v4 = vmax.f32 %v2108_v33, 0.0  ;;  %v2111_v33 = vadd.f32 %v2110_v26, %v7468_v24 }
 0x27e   : > { %v7681_v49 = vrot.slane %v2200_v51, 7  ;;  %5637 = vmatpush3.bf16.msra.mxu0 %v6062_v61  ;;  %v2201_v51 = vmax.f32 %v2119_v7, 0.0  ;;  %v8950_v61 = vrot.slane %v7535_v5, 2 }
 0x27f   : > { %v7691_v14 = vrot.slane %v2198_v4, 7  ;;  %5638 = vmatprep.subr.bf16.mxu0 %v6065_v12  ;;  %v7703_v4 = vpack.c.bf16 %v7590_v0, %v7563_v13  ;;  %v2199_v12 = vmax.f32 %v2111_v33, 0.0 }
 0x280   : > { %v7689_v30 = vsel %vm338_vm0, 0.0, %v7681_v49  ;;  %v2552_v9 = vsel %vm650_vm5, %v8950_v61, %v8949_v55  ;;  %v2272_v26 = vrot.slane %v2201_v51, 7 }
 0x281   : > { %v5800_v36 = vpop.f32.mrb[144].mxu0  ;;  %8951 = vst [vmem:[#allocation16_spill] sm:$0xff] %v7703_v4  ;;  %v7707_v24 = vsel %vm338_vm0, 0.0, %v7691_v14  ;;  %v7709_v22 = vpack.c.bf16 %v2552_v9, %v2550_v58  ;;  %v2269_v9 = vrot.slane %v2199_v12, 7  ;;  %v6072_v12 = vld [vmem:[#allocation7 + $0x1f8] sm:$0xff]  }
 0x282   : > { %v2123_v34 = vpop.f32.mrb[145].mxu0  ;;  %v2132_v13 = vadd.f32 %v5800_v36, %v7484_v52  ;;  %5639 = vmatpush3.bf16.msra.mxu0 %v6066_v38  ;;  %v7720_v51 = vsel %vm338_vm0, %v7681_v49, %v2272_v26  ;;  %v7723_v58 = vsel %vm338_vm0, %v2272_v26, 0.0  ;;  %v8954_v52 = vrot.slane %v7593_v17, 1 }
 0x283   : > { %v5801_v7 = vpop.f32.mrb[146].mxu0  ;;  %4638 = vmatmul.mubr.msk.bf16.gmra.mrb[140].mxu1 %vm6526_vm4, %v7622_v20  ;;  %v2124_v61 = vadd.f32 %v2123_v34, %v7478_v63  ;;  %3475 = vmatmul.mubr.bf16.gmra.mrb[168].mxu0 %v7709_v22  ;;  %v7736_v38 = vsel %vm338_vm0, %v7691_v14, %v2269_v9  ;;  %v6070_v63 = vld [vmem:[#allocation7 + $0x1b0] sm:$0xff]   ;;  %v8958_v20 = vrot.slane %v7599_v2, 2  ;;  %v8964_v2 = vrot.slane %v7656_v19, 1 }
 0x284   : > { %v2126_v5 = vpop.f32.mrb[147].mxu0  ;;  %v2135_v33 = vadd.f32 %v5801_v7, %v7486_v56  ;;  %5640 = vmatprep.subr.bf16.mxu0 %v6067_v27  ;;  %4702 = vmatprep.mubr.msk.bf16.mxu0 %vm6526_vm4, %v7703_v4  ;;  %v7739_v56 = vsel %vm338_vm0, %v2269_v9, 0.0  ;;  %v2204_v27 = vmax.f32 %v2132_v13, 0.0  ;;  %v8952_v9 = vrot.slane %v7590_v0, 1 }
 0x285   : > { %v2202_v7 = vmax.f32 %v2124_v61, 0.0  ;;  %v8953_v13 = vrot.slane %v7574_v8, 1 }
 0x286   : > { %5641 = vmatpush3.bf16.msra.mxu0 %v6068_v59  ;;  %v7745_v55 = vrot.slane %v2204_v27, 7  ;;  %v2205_v32 = vmax.f32 %v2135_v33, 0.0  ;;  %v8955_v36 = vmov %v8952_v9  ;;  %v2127_v27 = vadd.f32 %v2126_v5, %v7480_v53 }
 0x287   : > { %v7747_v45 = vrot.slane %v2202_v7, 7  ;;  %v2440_v61 = vsel %vm521_vm1, %v8953_v13, %v8952_v9  ;;  %5642 = vmatprep.subr.bf16.mxu0 %v6069_v11  ;;  %v2442_v59 = vsel %vm521_vm1, %v8955_v36, %v8954_v52  ;;  %v8956_v7 = vrot.slane %v7596_v1, 2 }
 0x288   : > { %v8957_v33 = vrot.slane %v7577_v31, 2  ;;  %v7772_v40 = vsel %vm338_vm0, 0.0, %v7745_v55  ;;  %v2278_v5 = vrot.slane %v2205_v32, 7  ;;  %v7778_v52 = vpack.c.bf16 %v2442_v59, %v2440_v61 }
 0x289   : > { %v5804_v34 = vpop.f32.mrb[148].mxu0  ;;  %v8959_v9 = vmov %v8956_v7  ;;  %v7776_v53 = vsel %vm338_vm0, 0.0, %v7747_v45  ;;  %v2203_v32 = vmax.f32 %v2127_v27, 0.0  ;;  %v8963_v59 = vrot.slane %v7676_v48, 1 }
 0x28a   : > { %v2139_v26 = vpop.f32.mrb[149].mxu0  ;;  %v2555_v6 = vsel %vm650_vm5, %v8957_v33, %v8956_v7  ;;  %v2557_v11 = vsel %vm650_vm5, %v8959_v9, %v8958_v20  ;;  %8960 = vst [vmem:[#allocation18_spill] sm:$0xff] %v7778_v52  ;;  %5643 = vmatpush3.bf16.msra.mxu0 %v6070_v63  ;;  %v6073_v7 = vld [vmem:[#allocation7 + $0x1b8] sm:$0xff]   ;;  %v7786_v33 = vsel %vm338_vm0, %v7745_v55, %v2278_v5  ;;  %v7789_v9 = vsel %vm338_vm0, %v2278_v5, 0.0 }
 0x28b   : > { %v5805_v13 = vpop.f32.mrb[150].mxu0  ;;  %3329 = vmatprep.mubr.bf16.mxu1 %v7778_v52  ;;  %v7792_v61 = vpack.c.bf16 %v2557_v11, %v2555_v6  ;;  %5644 = vmatprep.subr.bf16.mxu0 %v6072_v12  ;;  %v2275_v5 = vrot.slane %v2203_v32, 7  ;;  %v7804_v6 = vpack.c.bf16 %v7676_v48, %v7637_v62  ;;  %v2148_v12 = vadd.f32 %v5804_v34, %v7496_v15 }
 0x28c   : > { %v2142_v31 = vpop.f32.mrb[151].mxu0  ;;  %4642 = vmatmul.mubr.msk.bf16.gmra.mrb[144].mxu1 %vm6526_vm4, %v7703_v4  ;;  %v2140_v27 = vadd.f32 %v2139_v26, %v7490_v54  ;;  %v2151_v11 = vadd.f32 %v5805_v13, %v7498_v43  ;;  %v2445_v63 = vsel %vm521_vm1, %v8964_v2, %v8963_v59  ;;  %v8965_v32 = vrot.slane %v7679_v50, 1 }
 0x28d   : > { %8961 = vst [vmem:[#allocation19_spill] sm:$0xff] %v7792_v61  ;;  %3483 = vmatmul.mubr.bf16.gmra.mrb[172].mxu0 %v7792_v61  ;;  %8962 = vst [vmem:[#allocation20_spill] sm:$0xff] %v7804_v6  ;;  %v8966_v1 = vmov %v8963_v59  ;;  %v2143_v62 = vadd.f32 %v2142_v31, %v7492_v18  ;;  %v7822_v54 = vsel %vm338_vm0, %v7747_v45, %v2275_v5  ;;  %v7825_v15 = vsel %vm338_vm0, %v2275_v5, 0.0 }
 0x28e   : > { %v2447_v20 = vsel %vm521_vm1, %v8966_v1, %v8965_v32  ;;  %5645 = vmatpush3.bf16.msra.mxu0 %v6073_v7  ;;  %4706 = vmatprep.mubr.msk.bf16.mxu0 %vm6526_vm4, %v7804_v6  ;;  %v2208_v43 = vmax.f32 %v2148_v12, 0.0  ;;  %v2206_v34 = vmax.f32 %v2140_v27, 0.0  ;;  %v2209_v5 = vmax.f32 %v2151_v11, 0.0 }
 0x28f   : > { %v7838_v32 = vpack.c.bf16 %v2447_v20, %v2445_v63  ;;  %v2207_v12 = vmax.f32 %v2143_v62, 0.0  ;;  %v8968_v27 = vrot.slane %v7590_v0, 2  ;;  %v8969_v13 = vrot.slane %v7574_v8, 2 }
 0x290   : > { %v7834_v7 = vrot.slane %v2208_v43, 7  ;;  %v7836_v59 = vrot.slane %v2206_v34, 7  ;;  %v8970_v31 = vrot.slane %v7593_v17, 2  ;;  %v7852_v34 = vpack.c.bf16 %v7660_v57, %v7635_v3 }
 0x291   : > { %v5808_v36 = vpop.f32.mrb[152].mxu0  ;;  %8967 = vst [vmem:[#allocation21_spill] sm:$0xff] %v7838_v32  ;;  %v2560_v18 = vsel %vm650_vm5, %v8969_v13, %v8968_v27  ;;  %v8971_v2 = vmov %v8968_v27  ;;  %v2284_v8 = vrot.slane %v2209_v5, 7  ;;  %3337 = vmatprep.mubr.bf16.mxu1 %v7838_v32 }
 0x292   : > { %v2155_v26 = vpop.f32.mrb[153].mxu0  ;;  %v2562_v43 = vsel %vm650_vm5, %v8971_v2, %v8970_v31  ;;  %v7856_v20 = vsel %vm338_vm0, 0.0, %v7834_v7  ;;  %v7860_v63 = vsel %vm338_vm0, 0.0, %v7836_v59  ;;  %v2164_v2 = vadd.f32 %v5808_v36, %v7508_v28 }
 0x293   : > { %v5809_v1 = vpop.f32.mrb[154].mxu0  ;;  %v7863_v17 = vpack.c.bf16 %v2562_v43, %v2560_v18  ;;  %v7874_v13 = vsel %vm338_vm0, %v7834_v7, %v2284_v8  ;;  %v7877_v31 = vsel %vm338_vm0, %v2284_v8, 0.0  ;;  %v2281_v18 = vrot.slane %v2207_v12, 7 }
 0x294   : > { %v2158_v4 = vpop.f32.mrb[155].mxu0  ;;  %4646 = vmatmul.mubr.msk.bf16.gmra.mrb[148].mxu1 %vm6526_vm4, %v7804_v6  ;;  %v2212_v28 = vmax.f32 %v2164_v2, 0.0  ;;  %v2156_v36 = vadd.f32 %v2155_v26, %v7502_v23  ;;  %v2167_v52 = vadd.f32 %v5809_v1, %v7510_v25  ;;  %v8974_v2 = vrot.slane %v7652_v21, 1 }
 0x295   : > { %8972 = vst [vmem:[#allocation22_spill] sm:$0xff] %v7863_v17  ;;  %3491 = vmatmul.mubr.bf16.gmra.mrb[176].mxu0 %v7863_v17  ;;  %v7890_v12 = vsel %vm338_vm0, %v7836_v59, %v2281_v18  ;;  %v7893_v8 = vsel %vm338_vm0, %v2281_v18, 0.0  ;;  %v8973_v18 = vrot.slane %v7660_v57, 1  ;;  %v8975_v43 = vrot.slane %v7663_v44, 1 }
 0x296   : > { %4710 = vmatprep.mubr.msk.bf16.mxu0 %vm6526_vm4, %v7852_v34  ;;  %v7900_v6 = vrot.slane %v2212_v28, 7  ;;  %v2210_v32 = vmax.f32 %v2156_v36, 0.0  ;;  %v2159_v62 = vadd.f32 %v2158_v4, %v7504_v37  ;;  %v8977_v28 = vrot.slane %v7676_v48, 2 }
 0x297   : > { %v2450_v23 = vsel %vm521_vm1, %v8974_v2, %v8973_v18  ;;  %v8976_v3 = vmov %v8973_v18  ;;  %v8978_v36 = vrot.slane %v7656_v19, 2  ;;  %v8979_v1 = vrot.slane %v7679_v50, 2 }
 0x298   : > { %v2452_v27 = vsel %vm521_vm1, %v8976_v3, %v8975_v43  ;;  %v8980_v17 = vmov %v8977_v28  ;;  %v7926_v2 = vsel %vm338_vm0, 0.0, %v7900_v6  ;;  %v7928_v61 = vrot.slane %v2210_v32, 7 }
 0x299   : > { %v5812_v11 = vpop.f32.mrb[156].mxu0  ;;  %v2565_v25 = vsel %vm650_vm5, %v8978_v36, %v8977_v28  ;;  %v2567_v18 = vsel %vm650_vm5, %v8980_v17, %v8979_v1  ;;  %v2213_v3 = vmax.f32 %v2167_v52, 0.0  ;;  %v7930_v37 = vpack.c.bf16 %v2452_v27, %v2450_v23 }
 0x29a   : > { %v2171_v5 = vpop.f32.mrb[157].mxu0  ;;  %v2211_v43 = vmax.f32 %v2159_v62, 0.0  ;;  %v7934_v28 = vpack.c.bf16 %v2567_v18, %v2565_v25  ;;  %v7938_v48 = vsel %vm338_vm0, 0.0, %v7928_v61  ;;  %v7943_v32 = vpack.c.bf16 %v7736_v38, %v7691_v14 }
 0x29b   : > { %v5813_v0 = vpop.f32.mrb[158].mxu0  ;;  %v2290_v50 = vrot.slane %v2213_v3, 7  ;;  %3345 = vmatprep.mubr.bf16.mxu1 %v7930_v37  ;;  %v2180_v52 = vadd.f32 %v5812_v11, %v7520_v60  ;;  %v2172_v23 = vadd.f32 %v2171_v5, %v7514_v42  ;;  %v8984_v5 = vrot.slane %v7739_v56, 1 }
 0x29c   : > { %v2174_v26 = vpop.f32.mrb[159].mxu0  ;;  %8981 = vst [vmem:[#allocation23_spill] sm:$0xff] %v7943_v32  ;;  %v2287_v62 = vrot.slane %v2211_v43, 7  ;;  %4650 = vmatmul.mubr.msk.bf16.gmra.mrb[152].mxu1 %vm6526_vm4, %v7852_v34  ;;  %v2183_v11 = vadd.f32 %v5813_v0, %v7524_v47  ;;  %v8994_v47 = vrot.slane %v7736_v38, 2  ;;  %v8107_v4 = vpack.c.bf16 %v7786_v33, %v7745_v55 }
 0x29d   : > { %3499 = vmatmul.mubr.bf16.gmra.mrb[180].mxu0 %v7934_v28  ;;  %v7955_v36 = vsel %vm338_vm0, %v7900_v6, %v2290_v50  ;;  %v7958_v14 = vsel %vm338_vm0, %v2290_v50, 0.0  ;;  %v2216_v60 = vmax.f32 %v2180_v52, 0.0  ;;  %v2214_v50 = vmax.f32 %v2172_v23, 0.0 }
 0x29e   : > { %4714 = vmatprep.mubr.msk.bf16.mxu0 %vm6526_vm4, %v7943_v32  ;;  %v7970_v18 = vsel %vm338_vm0, %v7928_v61, %v2287_v62  ;;  %v7973_v3 = vsel %vm338_vm0, %v2287_v62, 0.0  ;;  %v2217_v25 = vmax.f32 %v2183_v11, 0.0  ;;  %v8982_v62 = vrot.slane %v7736_v38, 1 }
 0x29f   : > { %v7975_v43 = vrot.slane %v2216_v60, 7  ;;  %v7985_v42 = vrot.slane %v2214_v50, 7  ;;  %v8983_v60 = vrot.slane %v7707_v24, 1  ;;  %v2175_v50 = vadd.f32 %v2174_v26, %v7516_v46 }
 0x2a0   : > { %v8985_v17 = vmov %v8982_v62  ;;  %v2296_v27 = vrot.slane %v2217_v25, 7  ;;  %v8988_v46 = vrot.slane %v7663_v44, 2 }
 0x2a1   : > { %v7983_v1 = vsel %vm338_vm0, 0.0, %v7975_v43  ;;  %v2455_v23 = vsel %vm521_vm1, %v8983_v60, %v8982_v62  ;;  %v2457_v52 = vsel %vm521_vm1, %v8985_v17, %v8984_v5  ;;  %v8002_v11 = vsel %vm338_vm0, 0.0, %v7985_v42 }
 0x2a2   : > { %v8004_v0 = vpack.c.bf16 %v2457_v52, %v2455_v23  ;;  %v8986_v62 = vrot.slane %v7660_v57, 2  ;;  %v8987_v60 = vrot.slane %v7652_v21, 2  ;;  %v2215_v17 = vmax.f32 %v2175_v50, 0.0 }
 0x2a3   : > { %v8020_v25 = vsel %vm338_vm0, %v7975_v43, %v2296_v27  ;;  %v8023_v52 = vsel %vm338_vm0, %v2296_v27, 0.0  ;;  %v8030_v23 = vpack.c.bf16 %v7720_v51, %v7681_v49  ;;  %v8991_v49 = vrot.slane %v7689_v30, 1 }
 0x2a4   : > { %v2570_v19 = vsel %vm650_vm5, %v8987_v60, %v8986_v62  ;;  %v8989_v26 = vmov %v8986_v62  ;;  %3353 = vmatprep.mubr.bf16.mxu1 %v8004_v0  ;;  %v2293_v27 = vrot.slane %v2215_v17, 7  ;;  %v8995_v62 = vrot.slane %v7707_v24, 2 }
 0x2a5   : > { %v2572_v5 = vsel %vm650_vm5, %v8989_v26, %v8988_v46  ;;  %4654 = vmatmul.mubr.msk.bf16.gmra.mrb[156].mxu1 %vm6526_vm4, %v7943_v32  ;;  %v8992_v46 = vrot.slane %v7723_v58, 1  ;;  %v8998_v24 = vrot.slane %v7822_v54, 1 }
 0x2a6   : > { %v8026_v21 = vpack.c.bf16 %v2572_v5, %v2570_v19  ;;  %v8990_v19 = vrot.slane %v7720_v51, 1  ;;  %v2575_v17 = vsel %vm650_vm5, %v8995_v62, %v8994_v47 }
 0x2a8   : > { %3507 = vmatmul.mubr.bf16.gmra.mrb[184].mxu0 %v8026_v21  ;;  %v2460_v60 = vsel %vm521_vm1, %v8991_v49, %v8990_v19  ;;  %v8993_v26 = vmov %v8990_v19  ;;  %v8996_v19 = vrot.slane %v7739_v56, 2  ;;  %v8997_v49 = vmov %v8994_v47 }
 0x2a9   : > { %v2462_v5 = vsel %vm521_vm1, %v8993_v26, %v8992_v46  ;;  %4718 = vmatprep.mubr.msk.bf16.mxu0 %vm6526_vm4, %v8030_v23  ;;  %v8067_v46 = vpack.c.bf16 %v7822_v54, %v7747_v45  ;;  %v8999_v47 = vrot.slane %v7776_v53, 1  ;;  %v8079_v56 = vsel %vm338_vm0, %v2293_v27, 0.0 }
 0x2aa   : > { %v8058_v50 = vpack.c.bf16 %v2462_v5, %v2460_v60  ;;  %v2577_v57 = vsel %vm650_vm5, %v8997_v49, %v8996_v19  ;;  %v8076_v60 = vsel %vm338_vm0, %v7985_v42, %v2293_v27  ;;  %v9000_v26 = vrot.slane %v7825_v15, 1 }
 0x2ab   : > { %v2465_v62 = vsel %vm521_vm1, %v8999_v47, %v8998_v24  ;;  %v8081_v38 = vpack.c.bf16 %v2577_v57, %v2575_v17  ;;  %v9001_v45 = vmov %v8998_v24  ;;  %v2494_v49 = vrot.slane %v8076_v60, 1 }
 0x2ac   : > { %v2467_v5 = vsel %vm521_vm1, %v9001_v45, %v9000_v26  ;;  %v2496_v24 = vrot.slane %v8079_v56, 1  ;;  %v2614_v47 = vrot.slane %v8076_v60, 2  ;;  %3361 = vmatprep.mubr.bf16.mxu1 %v8058_v50  ;;  %v9002_v57 = vrot.slane %v7720_v51, 2 }
 0x2ad   : > { %v8093_v27 = vpack.c.bf16 %v2467_v5, %v2465_v62  ;;  %v9003_v17 = vrot.slane %v7689_v30, 2  ;;  %v9004_v26 = vrot.slane %v7723_v58, 2  ;;  %v9006_v62 = vrot.slane %v7786_v33, 1  ;;  %4658 = vmatmul.mubr.msk.bf16.gmra.mrb[160].mxu1 %vm6526_vm4, %v8030_v23 }
 0x2ae   : > { %v9005_v45 = vmov %v9002_v57  ;;  %v9007_v5 = vrot.slane %v7772_v40, 1 }
 0x2af   : > { %v2580_v44 = vsel %vm650_vm5, %v9003_v17, %v9002_v57  ;;  %v2582_v19 = vsel %vm650_vm5, %v9005_v45, %v9004_v26  ;;  %v9008_v57 = vrot.slane %v7789_v9, 1  ;;  %v9009_v58 = vmov %v9006_v62  ;;  %3369 = vmatprep.mubr.bf16.mxu1 %v8093_v27 }
 0x2b0   : > { %v8109_v32 = vpack.c.bf16 %v2582_v19, %v2580_v44  ;;  %v2470_v30 = vsel %vm521_vm1, %v9007_v5, %v9006_v62  ;;  %v9010_v17 = vrot.slane %v7822_v54, 2  ;;  %v9011_v26 = vrot.slane %v7776_v53, 2  ;;  %3515 = vmatmul.mubr.bf16.gmra.mrb[188].mxu0 %v8081_v38 }
 0x2b1   : > { %v2472_v51 = vsel %vm521_vm1, %v9009_v58, %v9008_v57  ;;  %v9012_v19 = vrot.slane %v7825_v15, 2  ;;  %v8135_v5 = vpack.c.bf16 %v7890_v12, %v7836_v59  ;;  %v9014_v57 = vrot.slane %v7890_v12, 1  ;;  %4722 = vmatprep.mubr.msk.bf16.mxu0 %vm6526_vm4, %v8067_v46 }
 0x2b2   : > { %v2585_v55 = vsel %vm650_vm5, %v9011_v26, %v9010_v17  ;;  %v8126_v44 = vpack.c.bf16 %v2472_v51, %v2470_v30  ;;  %v9013_v45 = vmov %v9010_v17  ;;  %v9015_v58 = vrot.slane %v7860_v63, 1 }
 0x2b3   : > { %v2587_v62 = vsel %vm650_vm5, %v9013_v45, %v9012_v19  ;;  %v9016_v54 = vrot.slane %v7893_v8, 1  ;;  %v9017_v15 = vmov %v9014_v57  ;;  %v9018_v59 = vrot.slane %v7786_v33, 2 }
 0x2b4   : > { %v2475_v53 = vsel %vm521_vm1, %v9015_v58, %v9014_v57  ;;  %v8145_v30 = vpack.c.bf16 %v2587_v62, %v2585_v55  ;;  %v9019_v17 = vrot.slane %v7772_v40, 2  ;;  %v9020_v19 = vrot.slane %v7789_v9, 2 }
 0x2b5   : > { %v2477_v51 = vsel %vm521_vm1, %v9017_v15, %v9016_v54  ;;  %v9021_v45 = vmov %v9018_v59  ;;  %v2616_v55 = vrot.slane %v8079_v56, 2  ;;  %v8171_v40 = vpack.c.bf16 %v7874_v13, %v7834_v7  ;;  %4662 = vmatmul.mubr.msk.bf16.gmra.mrb[164].mxu1 %vm6526_vm4, %v8067_v46 }
 0x2b6   : > { %v2590_v26 = vsel %vm650_vm5, %v9019_v17, %v9018_v59  ;;  %v2592_v57 = vsel %vm650_vm5, %v9021_v45, %v9020_v19  ;;  %v8165_v62 = vpack.c.bf16 %v2477_v51, %v2475_v53  ;;  %v9022_v33 = vrot.slane %v7874_v13, 1  ;;  %3377 = vmatprep.mubr.bf16.mxu1 %v8126_v44 }
 0x2b7   : > { %v8167_v58 = vpack.c.bf16 %v2592_v57, %v2590_v26  ;;  %v9023_v9 = vrot.slane %v7856_v20, 1  ;;  %v9024_v54 = vrot.slane %v7877_v31, 1  ;;  %v9026_v51 = vrot.slane %v7890_v12, 2 }
 0x2b8   : > { %v9025_v53 = vmov %v9022_v33  ;;  %v9027_v7 = vrot.slane %v7860_v63, 2  ;;  %v9028_v17 = vrot.slane %v7893_v8, 2  ;;  %v9031_v63 = vrot.slane %v7938_v48, 1  ;;  %3523 = vmatmul.mubr.bf16.gmra.mrb[192].mxu0 %v8109_v32 }
 0x2b9   : > { %v2480_v56 = vsel %vm521_vm1, %v9023_v9, %v9022_v33  ;;  %v2482_v15 = vsel %vm521_vm1, %v9025_v53, %v9024_v54  ;;  %v9029_v26 = vmov %v9026_v51  ;;  %v8202_v33 = vpack.c.bf16 %v7970_v18, %v7928_v61  ;;  %4726 = vmatprep.mubr.msk.bf16.mxu0 %vm6526_vm4, %v8107_v4 }
 0x2ba   : > { %v2595_v59 = vsel %vm650_vm5, %v9027_v7, %v9026_v51  ;;  %v2597_v19 = vsel %vm650_vm5, %v9029_v26, %v9028_v17  ;;  %v8196_v45 = vpack.c.bf16 %v2482_v15, %v2480_v56  ;;  %v9030_v9 = vrot.slane %v7970_v18, 1 }
 0x2bb   : > { %v8198_v57 = vpack.c.bf16 %v2597_v19, %v2595_v59  ;;  %v9032_v8 = vrot.slane %v7973_v3, 1  ;;  %v9034_v56 = vrot.slane %v7874_v13, 2  ;;  %v9035_v15 = vrot.slane %v7856_v20, 2 }
 0x2bc   : > { %v2485_v54 = vsel %vm521_vm1, %v9031_v63, %v9030_v9  ;;  %v9033_v12 = vmov %v9030_v9  ;;  %v9036_v61 = vrot.slane %v7877_v31, 2  ;;  %v8226_v17 = vpack.c.bf16 %v7955_v36, %v7900_v6 }
 0x2bd   : > { %v2487_v53 = vsel %vm521_vm1, %v9033_v12, %v9032_v8  ;;  %v2600_v51 = vsel %vm650_vm5, %v9035_v15, %v9034_v56  ;;  %v9037_v7 = vmov %v9034_v56  ;;  %v9038_v9 = vrot.slane %v7955_v36, 1  ;;  %4666 = vmatmul.mubr.msk.bf16.gmra.mrb[168].mxu1 %vm6526_vm4, %v8107_v4 }
 0x2be   : > { %v2602_v59 = vsel %vm650_vm5, %v9037_v7, %v9036_v61  ;;  %v8228_v26 = vpack.c.bf16 %v2487_v53, %v2485_v54  ;;  %v9039_v20 = vrot.slane %v7926_v2, 1  ;;  %v9040_v31 = vrot.slane %v7958_v14, 1  ;;  %3385 = vmatprep.mubr.bf16.mxu1 %v8165_v62 }
 0x2bf   : > { %v8230_v19 = vpack.c.bf16 %v2602_v59, %v2600_v51  ;;  %v9041_v13 = vmov %v9038_v9  ;;  %v9042_v6 = vrot.slane %v7970_v18, 2  ;;  %v9043_v54 = vrot.slane %v7938_v48, 2 }
 0x2c0   : > { %v2490_v63 = vsel %vm521_vm1, %v9039_v20, %v9038_v9  ;;  %v2492_v8 = vsel %vm521_vm1, %v9041_v13, %v9040_v31  ;;  %v9044_v56 = vrot.slane %v7973_v3, 2  ;;  %v8256_v61 = vpack.c.bf16 %v8076_v60, %v7985_v42  ;;  %3531 = vmatmul.mubr.bf16.gmra.mrb[196].mxu0 %v8145_v30 }
 0x2c1   : > { %v8242_v12 = vpack.c.bf16 %v2492_v8, %v2490_v63  ;;  %v2605_v53 = vsel %vm650_vm5, %v9043_v54, %v9042_v6  ;;  %v9045_v15 = vmov %v9042_v6  ;;  %v9046_v59 = vrot.slane %v8002_v11, 1  ;;  %4730 = vmatprep.mubr.msk.bf16.mxu0 %vm6526_vm4, %v8135_v5 }
 0x2c2   : > { %v2607_v51 = vsel %vm650_vm5, %v9045_v15, %v9044_v56  ;;  %v2497_v48 = vsel %vm521_vm1, %v2494_v49, %v2496_v24  ;;  %v9047_v20 = vrot.slane %v7955_v36, 2  ;;  %v9048_v3 = vrot.slane %v7926_v2, 2 }
 0x2c3   : > { %v8258_v7 = vpack.c.bf16 %v2607_v51, %v2605_v53  ;;  %v2495_v9 = vsel %vm521_vm1, %v9046_v59, %v2494_v49  ;;  %v9049_v60 = vrot.slane %v7958_v14, 2  ;;  %v8281_v49 = vpack.c.bf16 %v8020_v25, %v7975_v43 }
 0x2c4   : > { %v2610_v18 = vsel %vm650_vm5, %v9048_v3, %v9047_v20  ;;  %v8272_v42 = vpack.c.bf16 %v2497_v48, %v2495_v9  ;;  %v9050_v63 = vmov %v9047_v20  ;;  %v9051_v2 = vrot.slane %v8002_v11, 2 }
 0x2c5   : > { %v2612_v31 = vsel %vm650_vm5, %v9050_v63, %v9049_v60  ;;  %v2617_v14 = vsel %vm650_vm5, %v2614_v47, %v2616_v55  ;;  %v9052_v36 = vrot.slane %v8020_v25, 1  ;;  %v9053_v8 = vrot.slane %v7983_v1, 1  ;;  %4670 = vmatmul.mubr.msk.bf16.gmra.mrb[172].mxu1 %vm6526_vm4, %v8135_v5  ;;  %v6074_v60 = vld [vmem:[#allocation7 + $0x208] sm:$0xff]   ;;  %v6075_v63 = vld [vmem:[#allocation7 + $0x210] sm:$0xff]  }
 0x2c6   : > { %v2615_v24 = vsel %vm650_vm5, %v9051_v2, %v2614_v47  ;;  %v8288_v13 = vpack.c.bf16 %v2612_v31, %v2610_v18  ;;  %v9054_v11 = vrot.slane %v8023_v52, 1  ;;  %v9056_v47 = vrot.slane %v8020_v25, 2  ;;  %3393 = vmatprep.mubr.bf16.mxu1 %v8196_v45  ;;  %v9061_v31 = vld [vmem:[#allocation17_spill] sm:$0xff]  ;;  %v6077_v2 = vld [vmem:[#allocation7 + $0x220] sm:$0xff]  }
 0x2c7   : > { %v2668_v6 = vsel %vm521_vm1, %v9053_v8, %v9052_v36  ;;  %v8299_v43 = vpack.c.bf16 %v2617_v14, %v2615_v24  ;;  %v9055_v54 = vmov %v9052_v36  ;;  %v9057_v55 = vrot.slane %v7983_v1, 2  ;;  %v5310_v1 = vpop.f32.mrb[128].mxu1  ;;  %v9062_v24 = vld [vmem:[#allocation15_spill] sm:$0xff]  ;;  %v9064_v14 = vld [vmem:[#allocation18_spill] sm:$0xff]  ;;  %v9065_v8 = vld [vmem:[#allocation16_spill] sm:$0xff] }
 0x2c8   : > { %v2670_v53 = vsel %vm521_vm1, %v9055_v54, %v9054_v11  ;;  %v9058_v15 = vrot.slane %v8023_v52, 2  ;;  %v9059_v51 = vmov %v9056_v47  ;;  %v5311_v25 = vpop.f32.mrb[129].mxu1  ;;  %3539 = vmatmul.mubr.bf16.gmra.mrb[200].mxu0 %v8167_v58  ;;  %v6080_v36 = vld [vmem:[#allocation7 + $0x238] sm:$0xff]   ;;  %v9067_v11 = vld [vmem:[#allocation20_spill] sm:$0xff] }
 0x2c9   : > { %v2676_v56 = vsel %vm650_vm5, %v9057_v55, %v9056_v47  ;;  %v8316_v9 = vpack.c.bf16 %v2670_v53, %v2668_v6  ;;  %v8328_v52 = vadd.f32 %v5311_v25, %v5310_v1  ;;  %v5313_v20 = vpop.f32.mrb[130].mxu1  ;;  %4734 = vmatprep.mubr.msk.bf16.mxu0 %vm6526_vm4, %v8171_v40  ;;  %v9066_v6 = vld [vmem:[#allocation21_spill] sm:$0xff]  ;;  %v9068_v54 = vld [vmem:[#allocation23_spill] sm:$0xff] }
 0x2ca   : > { %v2678_v59 = vsel %vm650_vm5, %v9059_v51, %v9058_v15  ;;  %v5314_v3 = vpop.f32.mrb[131].mxu1 }
 0x2cb   : > { %v8318_v48 = vpack.c.bf16 %v2678_v59, %v2676_v56  ;;  %v8330_v18 = vadd.f32 %v5314_v3, %v5313_v20 }
 0x2cd   : > { %4674 = vmatmul.mubr.msk.bf16.gmra.mrb[176].mxu1 %vm6526_vm4, %v8171_v40 }
 0x2ce   : > { %3401 = vmatprep.mubr.bf16.mxu1 %v8228_v26 }
 0x2d0   : > { %3547 = vmatmul.mubr.bf16.gmra.mrb[204].mxu0 %v8198_v57 }
 0x2d1   : > { %4738 = vmatprep.mubr.msk.bf16.mxu0 %vm6526_vm4, %v8202_v33 }
 0x2d5   : > { %4678 = vmatmul.mubr.msk.bf16.gmra.mrb[180].mxu1 %vm6526_vm4, %v8202_v33 }
 0x2d6   : > { %3409 = vmatprep.mubr.bf16.mxu1 %v8242_v12 }
 0x2d8   : > { %3555 = vmatmul.mubr.bf16.gmra.mrb[208].mxu0 %v8230_v19 }
 0x2d9   : > { %4742 = vmatprep.mubr.msk.bf16.mxu0 %vm6526_vm4, %v8226_v17 }
 0x2dd   : > { %4682 = vmatmul.mubr.msk.bf16.gmra.mrb[184].mxu1 %vm6526_vm4, %v8226_v17 }
 0x2de   : > { %3417 = vmatprep.mubr.bf16.mxu1 %v8272_v42 }
 0x2e0   : > { %3563 = vmatmul.mubr.bf16.gmra.mrb[212].mxu0 %v8258_v7 }
 0x2e1   : > { %4746 = vmatprep.mubr.msk.bf16.mxu0 %vm6526_vm4, %v8256_v61 }
 0x2e5   : > { %4686 = vmatmul.mubr.msk.bf16.gmra.mrb[188].mxu1 %vm6526_vm4, %v8256_v61 }
 0x2e6   : > { %3619 = vmatprep.mubr.bf16.mxu1 %v7626_v10  ;;  %v6076_v10 = vld [vmem:[#allocation7 + $0x218] sm:$0xff]  }
 0x2e8   : > { %3571 = vmatmul.mubr.bf16.gmra.mrb[216].mxu0 %v8288_v13 }
 0x2e9   : > { %4750 = vmatprep.mubr.msk.bf16.mxu0 %vm6526_vm4, %v8281_v49 }
 0x2ed   : > { %3620 = vmatmul.mubr.bf16.vlgmr.msra.gmra.mrb[192].mxu1 %v7567_v16  ;;  %v9060_v16 = vld [vmem:[#allocation19_spill] sm:$0xff] }
 0x2ee   : > { %3627 = vmatprep.mubr.bf16.mxu1 %v7709_v22  ;;  %5815 = vmatpush3.bf16.msra.mxu1 %v7607_v41  ;;  %v6078_v41 = vld [vmem:[#allocation7 + $0x228] sm:$0xff]  }
 0x2ef   : > { %5816 = vmatprep.subr.bf16.mxu1 %v6074_v60 }
 0x2f0   : > { %3579 = vmatmul.mubr.bf16.gmra.mrb[220].mxu0 %v8299_v43 }
 0x2f1   : > { %3780 = vmatprep.mubr.bf16.mxu0 %v7616_v39 }
 0x2f2   : > { %5817 = vmatpush3.bf16.msra.mxu1 %v6074_v60 }
 0x2f3   : > { %5818 = vmatprep.subr.bf16.mxu1 %v6075_v63 }
 0x2f5   : > { %3628 = vmatmul.mubr.bf16.gmra.mrb[196].mxu1 %v7616_v39  ;;  %v9063_v39 = vld [vmem:[#allocation22_spill] sm:$0xff] }
 0x2f6   : > { %3635 = vmatprep.mubr.bf16.mxu1 %v9060_v16  ;;  %5819 = vmatpush3.bf16.msra.mxu1 %v6075_v63 }
 0x2f7   : > { %5820 = vmatprep.subr.bf16.mxu1 %v6076_v10 }
 0x2f8   : > { %4754 = vmatmul.mubr.msk.bf16.vlgmr.msra.gmra.mrb[224].mxu0 %vm6526_vm4, %v7559_v29  ;;  %v6079_v29 = vld [vmem:[#allocation7 + $0x230] sm:$0xff]  }
 0x2f9   : > { %3788 = vmatprep.mubr.bf16.mxu0 %v9061_v31 }
 0x2fa   : > { %5821 = vmatpush3.bf16.msra.mxu1 %v6076_v10 }
 0x2fb   : > { %5822 = vmatprep.subr.bf16.mxu1 %v6077_v2 }
 0x2fd   : > { %3636 = vmatmul.mubr.bf16.gmra.mrb[200].mxu1 %v9061_v31 }
 0x2fe   : > { %3643 = vmatprep.mubr.bf16.mxu1 %v9063_v39  ;;  %5823 = vmatpush3.bf16.msra.mxu1 %v6077_v2 }
 0x2ff   : > { %5824 = vmatprep.subr.bf16.mxu1 %v6078_v41 }
 0x300   : > { %4758 = vmatmul.mubr.msk.bf16.gmra.mrb[228].mxu0 %vm6526_vm4, %v9062_v24 }
 0x301   : > { %3796 = vmatprep.mubr.bf16.mxu0 %v9064_v14 }
 0x302   : > { %5825 = vmatpush3.bf16.msra.mxu1 %v6078_v41 }
 0x303   : > { %5826 = vmatprep.subr.bf16.mxu1 %v6079_v29 }
 0x305   : > { %3644 = vmatmul.mubr.bf16.gmra.mrb[204].mxu1 %v9064_v14 }
 0x306   : > { %3651 = vmatprep.mubr.bf16.mxu1 %v7934_v28  ;;  %5827 = vmatpush3.bf16.msra.mxu1 %v6079_v29 }
 0x307   : > { %5828 = vmatprep.subr.bf16.mxu1 %v6080_v36 }
 0x308   : > { %4762 = vmatmul.mubr.msk.bf16.gmra.mrb[232].mxu0 %vm6526_vm4, %v9065_v8 }
 0x309   : > { %3804 = vmatprep.mubr.bf16.mxu0 %v9066_v6 }
 0x30a   : > { %5829 = vmatpush3.bf16.msra.mxu1 %v6080_v36 }
 0x30d   : > { %3652 = vmatmul.mubr.bf16.gmra.mrb[208].mxu1 %v9066_v6 }
 0x30e   : > { %3659 = vmatprep.mubr.bf16.mxu1 %v8026_v21 }
 0x310   : > { %4766 = vmatmul.mubr.msk.bf16.gmra.mrb[236].mxu0 %vm6526_vm4, %v9067_v11 }
 0x311   : > { %3812 = vmatprep.mubr.bf16.mxu0 %v7930_v37 }
 0x315   : > { %3660 = vmatmul.mubr.bf16.gmra.mrb[212].mxu1 %v7930_v37 }
 0x316   : > { %3667 = vmatprep.mubr.bf16.mxu1 %v8081_v38 }
 0x318   : > { %4770 = vmatmul.mubr.msk.bf16.gmra.mrb[240].mxu0 %vm6526_vm4, %v7852_v34  ;;  %v8439_v34 = vld [vmem:[%s8839_s4] ss:$0 sm:$0xff] }
 0x319   : > { %3820 = vmatprep.mubr.bf16.mxu0 %v8004_v0 }
 0x31d   : > { %3668 = vmatmul.mubr.bf16.gmra.mrb[216].mxu1 %v8004_v0  ;;  %v3300_v0 = vadd.f32 %v8328_v52, %v8439_v34 }
 0x31e   : > { %3675 = vmatprep.mubr.bf16.mxu1 %v8109_v32 }
 0x320   : > { %4774 = vmatmul.mubr.msk.bf16.gmra.mrb[244].mxu0 %vm6526_vm4, %v9068_v54 }
 0x321   : > { %3828 = vmatprep.mubr.bf16.mxu0 %v8058_v50 }
 0x325   : > { %3676 = vmatmul.mubr.bf16.gmra.mrb[220].mxu1 %v8058_v50 }
 0x326   : > { %3683 = vmatprep.mubr.bf16.mxu1 %v8145_v30 }
 0x328   : > { %4778 = vmatmul.mubr.msk.bf16.gmra.mrb[248].mxu0 %vm6526_vm4, %v8030_v23 }
 0x329   : > { %3836 = vmatprep.mubr.bf16.mxu0 %v8093_v27 }
 0x32d   : > { %3684 = vmatmul.mubr.bf16.gmra.mrb[224].mxu1 %v8093_v27 }
 0x32e   : > { %3691 = vmatprep.mubr.bf16.mxu1 %v8167_v58 }
 0x330   : > { %4782 = vmatmul.mubr.msk.bf16.gmra.mrb[252].mxu0 %vm6526_vm4, %v8067_v46 }
 0x331   : > { %3844 = vmatprep.mubr.bf16.mxu0 %v8126_v44 }
 0x335   : > { %3692 = vmatmul.mubr.bf16.gmra.mrb[228].mxu1 %v8126_v44 }
 0x336   : > { %3699 = vmatprep.mubr.bf16.mxu1 %v8198_v57 }
 0x338   : > { %4786 = vmatmul.mubr.msk.bf16.gmra.mrb[0].mxu0 %vm6526_vm4, %v8107_v4 }
 0x339   : > { %3852 = vmatprep.mubr.bf16.mxu0 %v8165_v62 }
 0x33d   : > { %3700 = vmatmul.mubr.bf16.gmra.mrb[232].mxu1 %v8165_v62 }
 0x33e   : > { %3707 = vmatprep.mubr.bf16.mxu1 %v8230_v19 }
 0x340   : > { %4790 = vmatmul.mubr.msk.bf16.gmra.mrb[4].mxu0 %vm6526_vm4, %v8135_v5  ;;  %v3303_v5 = vadd.f32 %v8330_v18, %v8439_v34 }
 0x341   : > { %3860 = vmatprep.mubr.bf16.mxu0 %v8196_v45 }
 0x343   : > { %v5422_v37 = vpop.f32.mrb[160].mxu0 }
 0x344   : > { %v5423_v4 = vpop.f32.mrb[161].mxu0 }
 0x345   : > { %v5424_v23 = vadd.f32 %v5423_v4, %v5422_v37  ;;  %v5425_v50 = vpop.f32.mrb[162].mxu0  ;;  %3708 = vmatmul.mubr.bf16.gmra.mrb[236].mxu1 %v8196_v45 }
 0x346   : > { %v5316_v46 = vpop.f32.mrb[132].mxu1  ;;  %v5426_v27 = vpop.f32.mrb[163].mxu0  ;;  %3715 = vmatprep.mubr.bf16.mxu1 %v8258_v7 }
 0x347   : > { %v5317_v44 = vpop.f32.mrb[133].mxu1  ;;  %v8446_v62 = vadd.f32 %v5424_v23, %v3300_v0  ;;  %v5427_v53 = vadd.f32 %v5426_v27, %v5425_v50 }
 0x348   : > { %v5318_v47 = vadd.f32 %v5317_v44, %v5316_v46  ;;  %v5319_v55 = vpop.f32.mrb[134].mxu1  ;;  %4794 = vmatmul.mubr.msk.bf16.gmra.mrb[8].mxu0 %vm6526_vm4, %v8171_v40 }
 0x349   : > { %v5320_v56 = vpop.f32.mrb[135].mxu1  ;;  %v8449_v15 = vadd.f32 %v5427_v53, %v3303_v5  ;;  %3868 = vmatprep.mubr.bf16.mxu0 %v8228_v26 }
 0x34a   : > { %v5321_v51 = vadd.f32 %v5320_v56, %v5319_v55  ;;  %v3308_v52 = vadd.f32 %v5318_v47, %v8439_v34 }
 0x34c   : > { %v5428_v59 = vpop.f32.mrb[164].mxu0  ;;  %v3311_v10 = vadd.f32 %v5321_v51, %v8439_v34 }
 0x34d   : > { %v5429_v1 = vpop.f32.mrb[165].mxu0  ;;  %3716 = vmatmul.mubr.bf16.gmra.mrb[240].mxu1 %v8228_v26 }
 0x34e   : > { %v5322_v25 = vpop.f32.mrb[136].mxu1  ;;  %v5430_v20 = vadd.f32 %v5429_v1, %v5428_v59  ;;  %v5431_v3 = vpop.f32.mrb[166].mxu0  ;;  %3723 = vmatprep.mubr.bf16.mxu1 %v8288_v13 }
 0x34f   : > { %v5323_v18 = vpop.f32.mrb[137].mxu1  ;;  %v5432_v45 = vpop.f32.mrb[167].mxu0 }
 0x350   : > { %v5324_v60 = vadd.f32 %v5323_v18, %v5322_v25  ;;  %v5325_v63 = vpop.f32.mrb[138].mxu1  ;;  %v8458_v31 = vadd.f32 %v5430_v20, %v3308_v52  ;;  %v5433_v40 = vadd.f32 %v5432_v45, %v5431_v3  ;;  %4798 = vmatmul.mubr.msk.bf16.gmra.mrb[12].mxu0 %vm6526_vm4, %v8202_v33 }
 0x351   : > { %v5326_v2 = vpop.f32.mrb[139].mxu1  ;;  %3876 = vmatprep.mubr.bf16.mxu0 %v8242_v12 }
 0x352   : > { %v5327_v41 = vadd.f32 %v5326_v2, %v5325_v63  ;;  %v8465_v24 = vadd.f32 %v5433_v40, %v3311_v10  ;;  %v3316_v26 = vadd.f32 %v5324_v60, %v8439_v34 }
 0x354   : > { %v3319_v23 = vadd.f32 %v5327_v41, %v8439_v34 }
 0x355   : > { %3724 = vmatmul.mubr.bf16.gmra.mrb[244].mxu1 %v8242_v12 }
 0x356   : > { %v5328_v14 = vpop.f32.mrb[140].mxu1  ;;  %v5434_v36 = vpop.f32.mrb[168].mxu0  ;;  %3731 = vmatprep.mubr.bf16.mxu1 %v8299_v43 }
 0x357   : > { %v5329_v29 = vpop.f32.mrb[141].mxu1  ;;  %v5435_v11 = vpop.f32.mrb[169].mxu0 }
 0x358   : > { %v5330_v8 = vadd.f32 %v5329_v29, %v5328_v14  ;;  %v5331_v6 = vpop.f32.mrb[142].mxu1  ;;  %v5436_v37 = vadd.f32 %v5435_v11, %v5434_v36  ;;  %v5437_v4 = vpop.f32.mrb[170].mxu0  ;;  %4802 = vmatmul.mubr.msk.bf16.gmra.mrb[16].mxu0 %vm6526_vm4, %v8226_v17  ;;  %v9069_v14 = vld [vmem:[#allocation12_spill] sm:$0xff] }
 0x359   : > { %v5332_v54 = vpop.f32.mrb[143].mxu1  ;;  %v5438_v0 = vpop.f32.mrb[171].mxu0  ;;  %3884 = vmatprep.mubr.bf16.mxu0 %v8272_v42 }
 0x35a   : > { %v5333_v33 = vadd.f32 %v5332_v54, %v5331_v6  ;;  %v8476_v50 = vadd.f32 %v5436_v37, %v3316_v26  ;;  %v5439_v46 = vadd.f32 %v5438_v0, %v5437_v4  ;;  %v3324_v55 = vadd.f32 %v5330_v8, %v8439_v34 }
 0x35c   : > { %v8478_v27 = vadd.f32 %v5439_v46, %v3319_v23 }
 0x35d   : > { %3732 = vmatmul.mubr.bf16.gmra.mrb[248].mxu1 %v8272_v42  ;;  %v3327_v42 = vadd.f32 %v5333_v33, %v8439_v34 }
 0x35e   : > { %3739 = vmatprep.mubr.bf16.mxu1 %v8318_v48 }
 0x35f   : > { %v5334_v12 = vpop.f32.mrb[144].mxu1 }
 0x360   : > { %v5440_v44 = vpop.f32.mrb[172].mxu0  ;;  %v5335_v5 = vpop.f32.mrb[145].mxu1  ;;  %4806 = vmatmul.mubr.msk.bf16.gmra.mrb[20].mxu0 %vm6526_vm4, %v8256_v61 }
 0x361   : > { %v5441_v17 = vpop.f32.mrb[173].mxu0  ;;  %v5336_v53 = vadd.f32 %v5335_v5, %v5334_v12  ;;  %v5337_v47 = vpop.f32.mrb[146].mxu1  ;;  %3892 = vmatprep.mubr.bf16.mxu0 %v8316_v9 }
 0x362   : > { %v5442_v56 = vadd.f32 %v5441_v17, %v5440_v44  ;;  %v5443_v51 = vpop.f32.mrb[174].mxu0  ;;  %v5338_v59 = vpop.f32.mrb[147].mxu1 }
 0x363   : > { %v5444_v1 = vpop.f32.mrb[175].mxu0  ;;  %v5339_v25 = vadd.f32 %v5338_v59, %v5337_v47  ;;  %v3332_v40 = vadd.f32 %v5336_v53, %v8439_v34 }
 0x364   : > { %v8488_v52 = vadd.f32 %v5442_v56, %v3324_v55  ;;  %v5445_v20 = vadd.f32 %v5444_v1, %v5443_v51 }
 0x365   : > { %3740 = vmatmul.mubr.bf16.gmra.mrb[252].mxu1 %v8316_v9  ;;  %v3335_v9 = vadd.f32 %v5339_v25, %v8439_v34 }
 0x366   : > { %v8490_v61 = vadd.f32 %v5445_v20, %v3327_v42  ;;  %5830 = vmatprep.mubr.bf16.mxu1 %v7709_v22  ;;  %v9070_v22 = vld [vmem:[#allocation13_spill] sm:$0xff] }
 0x367   : > { %v5340_v3 = vpop.f32.mrb[148].mxu1 }
 0x368   : > { %v5446_v18 = vpop.f32.mrb[176].mxu0  ;;  %v5341_v45 = vpop.f32.mrb[149].mxu1  ;;  %4810 = vmatmul.mubr.msk.bf16.gmra.mrb[24].mxu0 %vm6526_vm4, %v8281_v49 }
 0x369   : > { %v5447_v60 = vpop.f32.mrb[177].mxu0  ;;  %v5342_v63 = vadd.f32 %v5341_v45, %v5340_v3  ;;  %v5343_v10 = vpop.f32.mrb[150].mxu1  ;;  %3900 = vmatprep.mubr.bf16.mxu0 %v9069_v14 }
 0x36a   : > { %v5448_v2 = vadd.f32 %v5447_v60, %v5446_v18  ;;  %v5449_v41 = vpop.f32.mrb[178].mxu0  ;;  %v5344_v29 = vpop.f32.mrb[151].mxu1 }
 0x36b   : > { %v5450_v36 = vpop.f32.mrb[179].mxu0  ;;  %v5345_v8 = vadd.f32 %v5344_v29, %v5343_v10  ;;  %v3340_v33 = vadd.f32 %v5342_v63, %v8439_v34 }
 0x36c   : > { %v8500_v6 = vadd.f32 %v5448_v2, %v3332_v40  ;;  %v5451_v11 = vadd.f32 %v5450_v36, %v5449_v41 }
 0x36d   : > { %5831 = vmatmul.mubr.bf16.vlgmr.msra.gmra.mrb[0].mxu1 %v9060_v16  ;;  %v3343_v16 = vadd.f32 %v5345_v8, %v8439_v34 }
 0x36e   : > { %v8502_v49 = vadd.f32 %v5451_v11, %v3335_v9  ;;  %5834 = vmatprep.mubr.bf16.mxu1 %v9063_v39 }
 0x36f   : > { %v5346_v26 = vpop.f32.mrb[152].mxu1 }
 0x370   : > { %4814 = vmatmul.mubr.msk.bf16.gmra.mrb[28].mxu0 %vm6526_vm4, %v9070_v22  ;;  %v5452_v54 = vpop.f32.mrb[180].mxu0  ;;  %v5347_v4 = vpop.f32.mrb[153].mxu1 }
 0x371   : > { %v5453_v37 = vpop.f32.mrb[181].mxu0  ;;  %v5348_v46 = vadd.f32 %v5347_v4, %v5346_v26  ;;  %v5349_v12 = vpop.f32.mrb[154].mxu1 }
 0x372   : > { %v5454_v0 = vadd.f32 %v5453_v37, %v5452_v54  ;;  %v5455_v23 = vpop.f32.mrb[182].mxu0  ;;  %v5350_v5 = vpop.f32.mrb[155].mxu1 }
 0x373   : > { %v5456_v44 = vpop.f32.mrb[183].mxu0  ;;  %v5351_v53 = vadd.f32 %v5350_v5, %v5349_v12  ;;  %v3348_v25 = vadd.f32 %v5348_v46, %v8439_v34 }
 0x374   : > { %v8511_v17 = vadd.f32 %v5454_v0, %v3340_v33  ;;  %v5457_v35 = vadd.f32 %v5456_v44, %v5455_v23 }
 0x375   : > { %5835 = vmatmul.mubr.bf16.gmra.mrb[4].mxu1 %v7934_v28  ;;  %v3351_v60 = vadd.f32 %v5351_v53, %v8439_v34 }
 0x376   : > { %v8513_v47 = vadd.f32 %v5457_v35, %v3343_v16  ;;  %5838 = vmatprep.mubr.bf16.mxu1 %v8026_v21 }
 0x378   : > { %v5352_v39 = vpop.f32.mrb[156].mxu1 }
 0x379   : > { %v5353_v56 = vpop.f32.mrb[157].mxu1 }
 0x37a   : > { %v5354_v59 = vadd.f32 %v5353_v56, %v5352_v39  ;;  %v5355_v1 = vpop.f32.mrb[158].mxu1 }
 0x37b   : > { %v5458_v55 = vpop.f32.mrb[184].mxu0  ;;  %v5356_v3 = vpop.f32.mrb[159].mxu1 }
 0x37c   : > { %v5459_v51 = vpop.f32.mrb[185].mxu0  ;;  %v5357_v45 = vadd.f32 %v5356_v3, %v5355_v1  ;;  %v3356_v36 = vadd.f32 %v5354_v59, %v8439_v34 }
 0x37d   : > { %v5460_v42 = vadd.f32 %v5459_v51, %v5458_v55  ;;  %v5461_v20 = vpop.f32.mrb[186].mxu0  ;;  %5839 = vmatmul.mubr.bf16.gmra.mrb[8].mxu1 %v8081_v38 }
 0x37e   : > { %v5462_v18 = vpop.f32.mrb[187].mxu0  ;;  %5842 = vmatprep.mubr.bf16.mxu1 %v8109_v32  ;;  %v3359_v26 = vadd.f32 %v5357_v45, %v8439_v34 }
 0x37f   : > { %v8519_v63 = vadd.f32 %v5460_v42, %v3348_v25  ;;  %v5463_v28 = vadd.f32 %v5462_v18, %v5461_v20 }
 0x380   : > { %v5358_v10 = vpop.f32.mrb[160].mxu1 }
 0x381   : > { %v8523_v21 = vadd.f32 %v5463_v28, %v3351_v60  ;;  %v5359_v2 = vpop.f32.mrb[161].mxu1 }
 0x382   : > { %v5360_v14 = vadd.f32 %v5359_v2, %v5358_v10  ;;  %v5361_v29 = vpop.f32.mrb[162].mxu1 }
 0x383   : > { %v5464_v40 = vpop.f32.mrb[188].mxu0  ;;  %v5362_v11 = vpop.f32.mrb[163].mxu1 }
 0x384   : > { %v5465_v41 = vpop.f32.mrb[189].mxu0  ;;  %v5363_v54 = vadd.f32 %v5362_v11, %v5361_v29  ;;  %v3364_v44 = vadd.f32 %v5360_v14, %v8439_v34 }
 0x385   : > { %v5466_v8 = vadd.f32 %v5465_v41, %v5464_v40  ;;  %v5467_v9 = vpop.f32.mrb[190].mxu0  ;;  %5843 = vmatmul.mubr.bf16.gmra.mrb[12].mxu1 %v8145_v30 }
 0x386   : > { %v5468_v22 = vpop.f32.mrb[191].mxu0  ;;  %5846 = vmatprep.mubr.bf16.mxu1 %v8167_v58  ;;  %v3367_v55 = vadd.f32 %v5363_v54, %v8439_v34 }
 0x387   : > { %v8527_v38 = vadd.f32 %v5466_v8, %v3356_v36  ;;  %v5469_v32 = vadd.f32 %v5468_v22, %v5467_v9 }
 0x388   : > { %v5364_v4 = vpop.f32.mrb[164].mxu1 }
 0x389   : > { %v8531_v37 = vadd.f32 %v5469_v32, %v3359_v26  ;;  %v5365_v0 = vpop.f32.mrb[165].mxu1 }
 0x38a   : > { %v5366_v46 = vadd.f32 %v5365_v0, %v5364_v4  ;;  %v5367_v12 = vpop.f32.mrb[166].mxu1 }
 0x38b   : > { %v5470_v33 = vpop.f32.mrb[192].mxu0  ;;  %v5368_v35 = vpop.f32.mrb[167].mxu1 }
 0x38c   : > { %v5471_v23 = vpop.f32.mrb[193].mxu0  ;;  %v5369_v39 = vadd.f32 %v5368_v35, %v5367_v12  ;;  %v3372_v3 = vadd.f32 %v5366_v46, %v8439_v34 }
 0x38d   : > { %v5472_v5 = vadd.f32 %v5471_v23, %v5470_v33  ;;  %v5473_v16 = vpop.f32.mrb[194].mxu0  ;;  %5847 = vmatmul.mubr.bf16.gmra.mrb[16].mxu1 %v8198_v57 }
 0x38e   : > { %v5474_v53 = vpop.f32.mrb[195].mxu0  ;;  %5850 = vmatprep.mubr.bf16.mxu1 %v8230_v19  ;;  %v3375_v40 = vadd.f32 %v5369_v39, %v8439_v34 }
 0x38f   : > { %v8535_v30 = vadd.f32 %v5472_v5, %v3364_v44  ;;  %v5475_v58 = vadd.f32 %v5474_v53, %v5473_v16 }
 0x390   : > { %v5370_v51 = vpop.f32.mrb[168].mxu1 }
 0x391   : > { %v8539_v56 = vadd.f32 %v5475_v58, %v3367_v55  ;;  %v5371_v1 = vpop.f32.mrb[169].mxu1 }
 0x392   : > { %v5372_v42 = vadd.f32 %v5371_v1, %v5370_v51  ;;  %v5373_v20 = vpop.f32.mrb[170].mxu1  ;;  %v9071_v1 = vld [vmem:[#allocation14_spill] sm:$0xff] }
 0x393   : > { %v5476_v59 = vpop.f32.mrb[196].mxu0  ;;  %v5374_v60 = vpop.f32.mrb[171].mxu1 }
 0x394   : > { %v5477_v25 = vpop.f32.mrb[197].mxu0  ;;  %v5375_v10 = vadd.f32 %v5374_v60, %v5373_v20  ;;  %v3380_v11 = vadd.f32 %v5372_v42, %v8439_v34 }
 0x395   : > { %v5478_v18 = vadd.f32 %v5477_v25, %v5476_v59  ;;  %v5479_v45 = vpop.f32.mrb[198].mxu0  ;;  %5851 = vmatmul.mubr.bf16.gmra.mrb[20].mxu1 %v8258_v7 }
 0x396   : > { %v5480_v28 = vpop.f32.mrb[199].mxu0  ;;  %5854 = vmatprep.mubr.bf16.mxu1 %v8288_v13  ;;  %v3383_v33 = vadd.f32 %v5375_v10, %v8439_v34 }
 0x397   : > { %v8543_v57 = vadd.f32 %v5478_v18, %v3372_v3  ;;  %v5481_v19 = vadd.f32 %v5480_v28, %v5479_v45 }
 0x398   : > { %v5376_v41 = vpop.f32.mrb[172].mxu1 }
 0x399   : > { %v8547_v2 = vadd.f32 %v5481_v19, %v3375_v40  ;;  %v5377_v29 = vpop.f32.mrb[173].mxu1 }
 0x39a   : > { %v5378_v8 = vadd.f32 %v5377_v29, %v5376_v41  ;;  %v5379_v9 = vpop.f32.mrb[174].mxu1 }
 0x39b   : > { %v5482_v14 = vpop.f32.mrb[200].mxu0  ;;  %v5380_v26 = vpop.f32.mrb[175].mxu1 }
 0x39c   : > { %v5483_v36 = vpop.f32.mrb[201].mxu0  ;;  %v5381_v4 = vadd.f32 %v5380_v26, %v5379_v9  ;;  %v3388_v35 = vadd.f32 %v5378_v8, %v8439_v34 }
 0x39d   : > { %v5484_v22 = vadd.f32 %v5483_v36, %v5482_v14  ;;  %v5485_v54 = vpop.f32.mrb[202].mxu0  ;;  %5855 = vmatmul.mubr.bf16.gmra.mrb[24].mxu1 %v8299_v43 }
 0x39e   : > { %v5486_v32 = vpop.f32.mrb[203].mxu0  ;;  %5858 = vmatprep.mubr.bf16.mxu1 %v8318_v48  ;;  %v3391_v59 = vadd.f32 %v5381_v4, %v8439_v34 }
 0x39f   : > { %v8551_v7 = vadd.f32 %v5484_v22, %v3380_v11  ;;  %v5487_v13 = vadd.f32 %v5486_v32, %v5485_v54 }
 0x3a0   : > { %v5382_v23 = vpop.f32.mrb[176].mxu1 }
 0x3a1   : > { %v8555_v0 = vadd.f32 %v5487_v13, %v3383_v33  ;;  %v5383_v12 = vpop.f32.mrb[177].mxu1 }
 0x3a2   : > { %v5384_v5 = vadd.f32 %v5383_v12, %v5382_v23  ;;  %v5385_v16 = vpop.f32.mrb[178].mxu1 }
 0x3a3   : > { %v5488_v46 = vpop.f32.mrb[204].mxu0  ;;  %v5386_v55 = vpop.f32.mrb[179].mxu1 }
 0x3a4   : > { %v5489_v44 = vpop.f32.mrb[205].mxu0  ;;  %v5387_v51 = vadd.f32 %v5386_v55, %v5385_v16  ;;  %v3396_v28 = vadd.f32 %v5384_v5, %v8439_v34 }
 0x3a5   : > { %v5490_v53 = vadd.f32 %v5489_v44, %v5488_v46  ;;  %v5491_v39 = vpop.f32.mrb[206].mxu0  ;;  %5859 = vmatmul.mubr.bf16.gmra.mrb[28].mxu1 %v9071_v1 }
 0x3a6   : > { %v5492_v58 = vpop.f32.mrb[207].mxu0  ;;  %v3399_v29 = vadd.f32 %v5387_v51, %v8439_v34 }
 0x3a7   : > { %v8559_v43 = vadd.f32 %v5490_v53, %v3388_v35  ;;  %v5493_v48 = vadd.f32 %v5492_v58, %v5491_v39 }
 0x3a8   : > { %v5388_v42 = vpop.f32.mrb[180].mxu1 }
 0x3a9   : > { %v8562_v25 = vadd.f32 %v5493_v48, %v3391_v59  ;;  %v5389_v3 = vpop.f32.mrb[181].mxu1 }
 0x3aa   : > { %v5390_v45 = vadd.f32 %v5389_v3, %v5388_v42  ;;  %v5391_v60 = vpop.f32.mrb[182].mxu1 }
 0x3ab   : > { %v5494_v20 = vpop.f32.mrb[208].mxu0  ;;  %v5392_v19 = vpop.f32.mrb[183].mxu1 }
 0x3ac   : > { %v5495_v18 = vpop.f32.mrb[209].mxu0  ;;  %v5393_v14 = vadd.f32 %v5392_v19, %v5391_v60  ;;  %v3404_v33 = vadd.f32 %v5390_v45, %v8439_v34 }
 0x3ad   : > { %v5496_v10 = vadd.f32 %v5495_v18, %v5494_v20  ;;  %v5497_v40 = vpop.f32.mrb[210].mxu0 }
 0x3ae   : > { %v5498_v41 = vpop.f32.mrb[211].mxu0  ;;  %v3407_v5 = vadd.f32 %v5393_v14, %v8439_v34 }
 0x3af   : > { %v8566_v36 = vadd.f32 %v5496_v10, %v3396_v28  ;;  %v5499_v8 = vadd.f32 %v5498_v41, %v5497_v40 }
 0x3b0   : > { %v5394_v11 = vpop.f32.mrb[184].mxu1 }
 0x3b1   : > { %v8568_v9 = vadd.f32 %v5499_v8, %v3399_v29  ;;  %v5395_v54 = vpop.f32.mrb[185].mxu1 }
 0x3b2   : > { %v5396_v32 = vadd.f32 %v5395_v54, %v5394_v11  ;;  %v5397_v4 = vpop.f32.mrb[186].mxu1 }
 0x3b3   : > { %v5500_v22 = vpop.f32.mrb[212].mxu0  ;;  %v5398_v46 = vpop.f32.mrb[187].mxu1 }
 0x3b4   : > { %v5501_v26 = vpop.f32.mrb[213].mxu0  ;;  %v5399_v44 = vadd.f32 %v5398_v46, %v5397_v4  ;;  %v3412_v1 = vadd.f32 %v5396_v32, %v8439_v34 }
 0x3b5   : > { %v5502_v13 = vadd.f32 %v5501_v26, %v5500_v22  ;;  %v5503_v23 = vpop.f32.mrb[214].mxu0 }
 0x3b6   : > { %v5504_v12 = vpop.f32.mrb[215].mxu0  ;;  %v3415_v60 = vadd.f32 %v5399_v44, %v8439_v34 }
 0x3b7   : > { %v8572_v16 = vadd.f32 %v5502_v13, %v3404_v33  ;;  %v5505_v35 = vadd.f32 %v5504_v12, %v5503_v23 }
 0x3b8   : > { %v5400_v39 = vpop.f32.mrb[188].mxu1 }
 0x3b9   : > { %v8574_v53 = vadd.f32 %v5505_v35, %v3407_v5  ;;  %v5401_v58 = vpop.f32.mrb[189].mxu1 }
 0x3ba   : > { %v5402_v59 = vadd.f32 %v5401_v58, %v5400_v39  ;;  %v5403_v48 = vpop.f32.mrb[190].mxu1 }
 0x3bb   : > { %v5506_v55 = vpop.f32.mrb[216].mxu0  ;;  %v5404_v3 = vpop.f32.mrb[191].mxu1 }
 0x3bc   : > { %v5507_v51 = vpop.f32.mrb[217].mxu0  ;;  %v5405_v45 = vadd.f32 %v5404_v3, %v5403_v48  ;;  %v3420_v22 = vadd.f32 %v5402_v59, %v8439_v34 }
 0x3bd   : > { %v5508_v42 = vadd.f32 %v5507_v51, %v5506_v55  ;;  %v5509_v20 = vpop.f32.mrb[218].mxu0 }
 0x3be   : > { %v5510_v18 = vpop.f32.mrb[219].mxu0  ;;  %v3423_v23 = vadd.f32 %v5405_v45, %v8439_v34 }
 0x3bf   : > { %v8578_v28 = vadd.f32 %v5508_v42, %v3412_v1  ;;  %v5511_v10 = vadd.f32 %v5510_v18, %v5509_v20 }
 0x3c0   : > { %v5534_v19 = vpop.f32.mrb[192].mxu1 }
 0x3c1   : > { %v8580_v40 = vadd.f32 %v5511_v10, %v3415_v60  ;;  %v5535_v14 = vpop.f32.mrb[193].mxu1 }
 0x3c2   : > { %v5536_v8 = vadd.f32 %v5535_v14, %v5534_v19  ;;  %v5537_v11 = vpop.f32.mrb[194].mxu1 }
 0x3c3   : > { %v5512_v41 = vpop.f32.mrb[220].mxu0  ;;  %v5538_v32 = vpop.f32.mrb[195].mxu1 }
 0x3c4   : > { %v5513_v29 = vpop.f32.mrb[221].mxu0  ;;  %v3622_v33 = vadd.f32 %v5536_v8, %v8446_v62  ;;  %v5539_v13 = vadd.f32 %v5538_v32, %v5537_v11 }
 0x3c5   : > { %v5514_v54 = vadd.f32 %v5513_v29, %v5512_v41  ;;  %v5515_v26 = vpop.f32.mrb[222].mxu0 }
 0x3c6   : > { %v5516_v4 = vpop.f32.mrb[223].mxu0  ;;  %v3625_v44 = vadd.f32 %v5539_v13, %v8449_v15 }
 0x3c7   : > { %v8585_v46 = vadd.f32 %v5514_v54, %v3420_v22  ;;  %v5517_v12 = vadd.f32 %v5516_v4, %v5515_v26 }
 0x3c8   : > { %v5540_v35 = vpop.f32.mrb[196].mxu1 }
 0x3c9   : > { %v8588_v5 = vadd.f32 %v5517_v12, %v3423_v23  ;;  %v5541_v55 = vpop.f32.mrb[197].mxu1 }
 0x3ca   : > { %v5542_v51 = vadd.f32 %v5541_v55, %v5540_v35  ;;  %v5543_v59 = vpop.f32.mrb[198].mxu1 }
 0x3cb   : > { %v5646_v39 = vpop.f32.mrb[224].mxu0  ;;  %v5544_v42 = vpop.f32.mrb[199].mxu1 }
 0x3cc   : > { %v5647_v58 = vpop.f32.mrb[225].mxu0  ;;  %v3630_v20 = vadd.f32 %v5542_v51, %v8458_v31  ;;  %v5545_v34 = vadd.f32 %v5544_v42, %v5543_v59 }
 0x3cd   : > { %v5648_v48 = vadd.f32 %v5647_v58, %v5646_v39  ;;  %v5649_v1 = vpop.f32.mrb[226].mxu0 }
 0x3ce   : > { %v5650_v62 = vpop.f32.mrb[227].mxu0  ;;  %v3633_v15 = vadd.f32 %v5545_v34, %v8465_v24 }
 0x3cf   : > { %v5651_v3 = vadd.f32 %v5650_v62, %v5649_v1  ;;  %v8591_v18 = vadd.f32 %v5648_v48, %v3622_v33 }
 0x3d0   : > { %v5546_v60 = vpop.f32.mrb[200].mxu1 }
 0x3d1   : > { %v8594_v45 = vadd.f32 %v5651_v3, %v3625_v44  ;;  %v5547_v19 = vpop.f32.mrb[201].mxu1 }
 0x3d2   : > { %v5548_v14 = vadd.f32 %v5547_v19, %v5546_v60  ;;  %v5549_v29 = vpop.f32.mrb[202].mxu1 }
 0x3d3   : > { %v5652_v10 = vpop.f32.mrb[228].mxu0  ;;  %v5550_v22 = vpop.f32.mrb[203].mxu1 }
 0x3d4   : > { %v5653_v41 = vpop.f32.mrb[229].mxu0  ;;  %v3638_v31 = vadd.f32 %v5548_v14, %v8476_v50  ;;  %v5551_v26 = vadd.f32 %v5550_v22, %v5549_v29 }
 0x3d5   : > { %v5654_v8 = vadd.f32 %v5653_v41, %v5652_v10  ;;  %v5655_v11 = vpop.f32.mrb[230].mxu0 }
 0x3d6   : > { %v5656_v54 = vpop.f32.mrb[231].mxu0  ;;  %v3641_v24 = vadd.f32 %v5551_v26, %v8478_v27 }
 0x3d7   : > { %v5657_v32 = vadd.f32 %v5656_v54, %v5655_v11  ;;  %v8597_v4 = vadd.f32 %v5654_v8, %v3630_v20 }
 0x3d8   : > { %v5552_v13 = vpop.f32.mrb[204].mxu1 }
 0x3d9   : > { %v8600_v33 = vadd.f32 %v5657_v32, %v3633_v15  ;;  %v5553_v12 = vpop.f32.mrb[205].mxu1 }
 0x3da   : > { %v5554_v35 = vadd.f32 %v5553_v12, %v5552_v13  ;;  %v5555_v39 = vpop.f32.mrb[206].mxu1 }
 0x3db   : > { %v5658_v23 = vpop.f32.mrb[232].mxu0  ;;  %v5556_v51 = vpop.f32.mrb[207].mxu1 }
 0x3dc   : > { %v5659_v44 = vpop.f32.mrb[233].mxu0  ;;  %v3646_v50 = vadd.f32 %v5554_v35, %v8488_v52  ;;  %v5557_v48 = vadd.f32 %v5556_v51, %v5555_v39 }
 0x3dd   : > { %v5660_v55 = vadd.f32 %v5659_v44, %v5658_v23  ;;  %v5661_v58 = vpop.f32.mrb[234].mxu0 }
 0x3de   : > { %v5662_v59 = vpop.f32.mrb[235].mxu0  ;;  %v3649_v27 = vadd.f32 %v5557_v48, %v8490_v61 }
 0x3df   : > { %v5663_v1 = vadd.f32 %v5662_v59, %v5661_v58  ;;  %v8603_v42 = vadd.f32 %v5660_v55, %v3638_v31 }
 0x3e0   : > { %v5558_v20 = vpop.f32.mrb[208].mxu1 }
 0x3e1   : > { %v8606_v62 = vadd.f32 %v5663_v1, %v3641_v24  ;;  %v5559_v3 = vpop.f32.mrb[209].mxu1 }
 0x3e2   : > { %v5560_v60 = vadd.f32 %v5559_v3, %v5558_v20  ;;  %v5561_v10 = vpop.f32.mrb[210].mxu1 }
 0x3e3   : > { %v5664_v34 = vpop.f32.mrb[236].mxu0  ;;  %v5562_v14 = vpop.f32.mrb[211].mxu1 }
 0x3e4   : > { %v5665_v15 = vpop.f32.mrb[237].mxu0  ;;  %v3654_v52 = vadd.f32 %v5560_v60, %v8500_v6  ;;  %v5563_v8 = vadd.f32 %v5562_v14, %v5561_v10 }
 0x3e5   : > { %v5666_v19 = vadd.f32 %v5665_v15, %v5664_v34  ;;  %v5667_v41 = vpop.f32.mrb[238].mxu0 }
 0x3e6   : > { %v5668_v29 = vpop.f32.mrb[239].mxu0  ;;  %v3657_v61 = vadd.f32 %v5563_v8, %v8502_v49 }
 0x3e7   : > { %v5669_v11 = vadd.f32 %v5668_v29, %v5667_v41  ;;  %v8609_v22 = vadd.f32 %v5666_v19, %v3646_v50 }
 0x3e8   : > { %v5564_v31 = vpop.f32.mrb[212].mxu1 }
 0x3e9   : > { %v8612_v54 = vadd.f32 %v5669_v11, %v3649_v27  ;;  %v5565_v32 = vpop.f32.mrb[213].mxu1 }
 0x3ea   : > { %v5566_v13 = vadd.f32 %v5565_v32, %v5564_v31  ;;  %v5567_v23 = vpop.f32.mrb[214].mxu1 }
 0x3eb   : > { %v5670_v26 = vpop.f32.mrb[240].mxu0  ;;  %v5568_v35 = vpop.f32.mrb[215].mxu1 }
 0x3ec   : > { %v5671_v24 = vpop.f32.mrb[241].mxu0  ;;  %v3662_v6 = vadd.f32 %v5566_v13, %v8511_v17  ;;  %v5569_v55 = vadd.f32 %v5568_v35, %v5567_v23 }
 0x3ed   : > { %v5672_v12 = vadd.f32 %v5671_v24, %v5670_v26  ;;  %v5673_v44 = vpop.f32.mrb[242].mxu0 }
 0x3ee   : > { %v5674_v39 = vpop.f32.mrb[243].mxu0  ;;  %v3665_v49 = vadd.f32 %v5569_v55, %v8513_v47 }
 0x3ef   : > { %v5675_v58 = vadd.f32 %v5674_v39, %v5673_v44  ;;  %v8615_v51 = vadd.f32 %v5672_v12, %v3654_v52 }
 0x3f0   : > { %v5570_v50 = vpop.f32.mrb[216].mxu1 }
 0x3f1   : > { %v8618_v59 = vadd.f32 %v5675_v58, %v3657_v61  ;;  %v5571_v1 = vpop.f32.mrb[217].mxu1 }
 0x3f2   : > { %v5572_v20 = vadd.f32 %v5571_v1, %v5570_v50  ;;  %v5573_v34 = vpop.f32.mrb[218].mxu1 }
 0x3f3   : > { %v5676_v48 = vpop.f32.mrb[244].mxu0  ;;  %v5574_v60 = vpop.f32.mrb[219].mxu1 }
 0x3f4   : > { %v5677_v27 = vpop.f32.mrb[245].mxu0  ;;  %v3670_v17 = vadd.f32 %v5572_v20, %v8519_v63  ;;  %v5575_v19 = vadd.f32 %v5574_v60, %v5573_v34 }
 0x3f5   : > { %v5678_v3 = vadd.f32 %v5677_v27, %v5676_v48  ;;  %v5679_v15 = vpop.f32.mrb[246].mxu0 }
 0x3f6   : > { %v5680_v10 = vpop.f32.mrb[247].mxu0  ;;  %v3673_v47 = vadd.f32 %v5575_v19, %v8523_v21 }
 0x3f7   : > { %v5681_v41 = vadd.f32 %v5680_v10, %v5679_v15  ;;  %v8621_v14 = vadd.f32 %v5678_v3, %v3662_v6 }
 0x3f8   : > { %v5576_v52 = vpop.f32.mrb[220].mxu1 }
 0x3f9   : > { %v8624_v29 = vadd.f32 %v5681_v41, %v3665_v49  ;;  %v5577_v11 = vpop.f32.mrb[221].mxu1 }
 0x3fa   : > { %v5578_v31 = vadd.f32 %v5577_v11, %v5576_v52  ;;  %v5579_v26 = vpop.f32.mrb[222].mxu1 }
 0x3fb   : > { %v5682_v8 = vpop.f32.mrb[248].mxu0  ;;  %v5580_v13 = vpop.f32.mrb[223].mxu1 }
 0x3fc   : > { %v5683_v61 = vpop.f32.mrb[249].mxu0  ;;  %v3678_v63 = vadd.f32 %v5578_v31, %v8527_v38  ;;  %v5581_v12 = vadd.f32 %v5580_v13, %v5579_v26 }
 0x3fd   : > { %v5684_v32 = vadd.f32 %v5683_v61, %v5682_v8  ;;  %v5685_v24 = vpop.f32.mrb[250].mxu0 }
 0x3fe   : > { %v5686_v23 = vpop.f32.mrb[251].mxu0  ;;  %v3681_v21 = vadd.f32 %v5581_v12, %v8531_v37 }
 0x3ff   : > { %v5687_v44 = vadd.f32 %v5686_v23, %v5685_v24  ;;  %v8627_v35 = vadd.f32 %v5684_v32, %v3670_v17 }
 0x400   : > { %v5582_v6 = vpop.f32.mrb[224].mxu1 }
 0x401   : > { %v8630_v39 = vadd.f32 %v5687_v44, %v3673_v47  ;;  %v5583_v58 = vpop.f32.mrb[225].mxu1 }
 0x402   : > { %v5584_v50 = vadd.f32 %v5583_v58, %v5582_v6  ;;  %v5585_v48 = vpop.f32.mrb[226].mxu1 }
 0x403   : > { %v5688_v55 = vpop.f32.mrb[252].mxu0  ;;  %v5586_v20 = vpop.f32.mrb[227].mxu1 }
 0x404   : > { %v5689_v49 = vpop.f32.mrb[253].mxu0  ;;  %v3686_v38 = vadd.f32 %v5584_v50, %v8535_v30  ;;  %v5587_v3 = vadd.f32 %v5586_v20, %v5585_v48 }
 0x405   : > { %v5690_v1 = vadd.f32 %v5689_v49, %v5688_v55  ;;  %v5691_v27 = vpop.f32.mrb[254].mxu0 }
 0x406   : > { %v5692_v34 = vpop.f32.mrb[255].mxu0  ;;  %v3689_v37 = vadd.f32 %v5587_v3, %v8539_v56 }
 0x407   : > { %v5693_v15 = vadd.f32 %v5692_v34, %v5691_v27  ;;  %v8633_v60 = vadd.f32 %v5690_v1, %v3678_v63 }
 0x408   : > { %v5588_v17 = vpop.f32.mrb[228].mxu1 }
 0x409   : > { %v8636_v10 = vadd.f32 %v5693_v15, %v3681_v21  ;;  %v5589_v41 = vpop.f32.mrb[229].mxu1 }
 0x40a   : > { %v5590_v52 = vadd.f32 %v5589_v41, %v5588_v17  ;;  %v5591_v8 = vpop.f32.mrb[230].mxu1 }
 0x40b   : > { %v5694_v19 = vpop.f32.mrb[0].mxu0  ;;  %v5592_v31 = vpop.f32.mrb[231].mxu1 }
 0x40c   : > { %v5695_v47 = vpop.f32.mrb[1].mxu0  ;;  %v3694_v30 = vadd.f32 %v5590_v52, %v8543_v57  ;;  %v5593_v32 = vadd.f32 %v5592_v31, %v5591_v8 }
 0x40d   : > { %v5696_v11 = vadd.f32 %v5695_v47, %v5694_v19  ;;  %v5697_v61 = vpop.f32.mrb[2].mxu0 }
 0x40e   : > { %v5698_v26 = vpop.f32.mrb[3].mxu0  ;;  %v3697_v56 = vadd.f32 %v5593_v32, %v8547_v2 }
 0x40f   : > { %v5699_v24 = vadd.f32 %v5698_v26, %v5697_v61  ;;  %v8639_v13 = vadd.f32 %v5696_v11, %v3686_v38 }
 0x410   : > { %v5594_v63 = vpop.f32.mrb[232].mxu1 }
 0x411   : > { %v8642_v23 = vadd.f32 %v5699_v24, %v3689_v37  ;;  %v5595_v44 = vpop.f32.mrb[233].mxu1 }
 0x412   : > { %v5596_v6 = vadd.f32 %v5595_v44, %v5594_v63  ;;  %v5597_v55 = vpop.f32.mrb[234].mxu1 }
 0x413   : > { %v5700_v12 = vpop.f32.mrb[4].mxu0  ;;  %v5598_v50 = vpop.f32.mrb[235].mxu1 }
 0x414   : > { %v5701_v21 = vpop.f32.mrb[5].mxu0  ;;  %v3702_v57 = vadd.f32 %v5596_v6, %v8551_v7  ;;  %v5599_v1 = vadd.f32 %v5598_v50, %v5597_v55 }
 0x415   : > { %v5702_v58 = vadd.f32 %v5701_v21, %v5700_v12  ;;  %v5703_v49 = vpop.f32.mrb[6].mxu0 }
 0x416   : > { %v5704_v48 = vpop.f32.mrb[7].mxu0  ;;  %v3705_v2 = vadd.f32 %v5599_v1, %v8555_v0 }
 0x417   : > { %v5705_v27 = vadd.f32 %v5704_v48, %v5703_v49  ;;  %v8645_v20 = vadd.f32 %v5702_v58, %v3694_v30 }
 0x418   : > { %v5600_v38 = vpop.f32.mrb[236].mxu1 }
 0x419   : > { %v8648_v34 = vadd.f32 %v5705_v27, %v3697_v56  ;;  %v5601_v15 = vpop.f32.mrb[237].mxu1 }
 0x41a   : > { %v5602_v17 = vadd.f32 %v5601_v15, %v5600_v38  ;;  %v5603_v19 = vpop.f32.mrb[238].mxu1 }
 0x41b   : > { %v5706_v3 = vpop.f32.mrb[8].mxu0  ;;  %v5604_v52 = vpop.f32.mrb[239].mxu1 }
 0x41c   : > { %v5707_v37 = vpop.f32.mrb[9].mxu0  ;;  %v3710_v7 = vadd.f32 %v5602_v17, %v8559_v43  ;;  %v5605_v11 = vadd.f32 %v5604_v52, %v5603_v19 }
 0x41d   : > { %v5708_v41 = vadd.f32 %v5707_v37, %v5706_v3  ;;  %v5709_v47 = vpop.f32.mrb[10].mxu0 }
 0x41e   : > { %v5710_v8 = vpop.f32.mrb[11].mxu0  ;;  %v3713_v0 = vadd.f32 %v5605_v11, %v8562_v25 }
 0x41f   : > { %v5711_v61 = vadd.f32 %v5710_v8, %v5709_v47  ;;  %v8651_v31 = vadd.f32 %v5708_v41, %v3702_v57 }
 0x420   : > { %v5606_v30 = vpop.f32.mrb[240].mxu1 }
 0x421   : > { %v8654_v26 = vadd.f32 %v5711_v61, %v3705_v2  ;;  %v5607_v24 = vpop.f32.mrb[241].mxu1 }
 0x422   : > { %v5608_v63 = vadd.f32 %v5607_v24, %v5606_v30  ;;  %v5609_v12 = vpop.f32.mrb[242].mxu1 }
 0x423   : > { %v5712_v32 = vpop.f32.mrb[12].mxu0  ;;  %v5610_v6 = vpop.f32.mrb[243].mxu1 }
 0x424   : > { %v5713_v56 = vpop.f32.mrb[13].mxu0  ;;  %v3718_v43 = vadd.f32 %v5608_v63, %v8566_v36  ;;  %v5611_v58 = vadd.f32 %v5610_v6, %v5609_v12 }
 0x425   : > { %v5714_v44 = vadd.f32 %v5713_v56, %v5712_v32  ;;  %v5715_v21 = vpop.f32.mrb[14].mxu0 }
 0x426   : > { %v5716_v55 = vpop.f32.mrb[15].mxu0  ;;  %v3721_v25 = vadd.f32 %v5611_v58, %v8568_v9 }
 0x427   : > { %v5717_v49 = vadd.f32 %v5716_v55, %v5715_v21  ;;  %v8657_v50 = vadd.f32 %v5714_v44, %v3710_v7 }
 0x428   : > { %v5612_v57 = vpop.f32.mrb[244].mxu1 }
 0x429   : > { %v8660_v48 = vadd.f32 %v5717_v49, %v3713_v0  ;;  %v5613_v27 = vpop.f32.mrb[245].mxu1 }
 0x42a   : > { %v5614_v38 = vadd.f32 %v5613_v27, %v5612_v57  ;;  %v5615_v3 = vpop.f32.mrb[246].mxu1 }
 0x42b   : > { %v5718_v1 = vpop.f32.mrb[16].mxu0  ;;  %v5616_v17 = vpop.f32.mrb[247].mxu1 }
 0x42c   : > { %v5719_v2 = vpop.f32.mrb[17].mxu0  ;;  %v3726_v36 = vadd.f32 %v5614_v38, %v8572_v16  ;;  %v5617_v41 = vadd.f32 %v5616_v17, %v5615_v3 }
 0x42d   : > { %v5720_v15 = vadd.f32 %v5719_v2, %v5718_v1  ;;  %v5721_v37 = vpop.f32.mrb[18].mxu0 }
 0x42e   : > { %v5722_v19 = vpop.f32.mrb[19].mxu0  ;;  %v3729_v9 = vadd.f32 %v5617_v41, %v8574_v53 }
 0x42f   : > { %v5723_v47 = vadd.f32 %v5722_v19, %v5721_v37  ;;  %v8663_v52 = vadd.f32 %v5720_v15, %v3718_v43 }
 0x430   : > { %v5618_v7 = vpop.f32.mrb[248].mxu1 }
 0x431   : > { %v8666_v8 = vadd.f32 %v5723_v47, %v3721_v25  ;;  %v5619_v61 = vpop.f32.mrb[249].mxu1 }
 0x432   : > { %v5620_v30 = vadd.f32 %v5619_v61, %v5618_v7  ;;  %v5621_v32 = vpop.f32.mrb[250].mxu1 }
 0x433   : > { %v5724_v11 = vpop.f32.mrb[20].mxu0  ;;  %v5622_v63 = vpop.f32.mrb[251].mxu1 }
 0x434   : > { %v5725_v0 = vpop.f32.mrb[21].mxu0  ;;  %v3734_v16 = vadd.f32 %v5620_v30, %v8578_v28  ;;  %v5623_v44 = vadd.f32 %v5622_v63, %v5621_v32  ;;  %v6081_v30 = vld [vmem:[%s6491_s6 + $0x10] sm:$0xff]  ;;  %v6082_v63 = vld [vmem:[%s6491_s6] sm:$0xff] }
 0x435   : > { %v5726_v24 = vadd.f32 %v5725_v0, %v5724_v11  ;;  %v5727_v56 = vpop.f32.mrb[22].mxu0 }
 0x436   : > { %v5728_v12 = vpop.f32.mrb[23].mxu0  ;;  %v3737_v53 = vadd.f32 %v5623_v44, %v8580_v40 }
 0x437   : > { %v5729_v21 = vadd.f32 %v5728_v12, %v5727_v56  ;;  %v8669_v6 = vadd.f32 %v5726_v24, %v3726_v36 }
 0x438   : > { %v5624_v43 = vpop.f32.mrb[252].mxu1 }
 0x439   : > { %v8672_v55 = vadd.f32 %v5729_v21, %v3729_v9  ;;  %v5625_v49 = vpop.f32.mrb[253].mxu1  ;;  %v6083_v21 = vld [vmem:[%s6491_s6 + $0x18] sm:$0xff] }
 0x43a   : > { %v5626_v57 = vadd.f32 %v5625_v49, %v5624_v43  ;;  %v5627_v1 = vpop.f32.mrb[254].mxu1 }
 0x43b   : > { %v5730_v58 = vpop.f32.mrb[24].mxu0  ;;  %v5628_v38 = vpop.f32.mrb[255].mxu1 }
 0x43c   : > { %v5731_v25 = vpop.f32.mrb[25].mxu0  ;;  %v3742_v28 = vadd.f32 %v5626_v57, %v8585_v46  ;;  %v5629_v15 = vadd.f32 %v5628_v38, %v5627_v1 }
 0x43d   : > { %v5732_v27 = vadd.f32 %v5731_v25, %v5730_v58  ;;  %v5733_v2 = vpop.f32.mrb[26].mxu0  ;;  %v6084_v58 = vld [vmem:[%s6491_s6 + $0x8] sm:$0xff] }
 0x43e   : > { %v5734_v3 = vpop.f32.mrb[27].mxu0  ;;  %v3745_v40 = vadd.f32 %v5629_v15, %v8588_v5 }
 0x43f   : > { %v5735_v37 = vadd.f32 %v5734_v3, %v5733_v2  ;;  %v8675_v17 = vadd.f32 %v5732_v27, %v3734_v16  ;;  %v6085_v3 = vld [vmem:[%s6491_s6 + $0x30] sm:$0xff] }
 0x440   : > { %v5832_v36 = vpop.f32.mrb[0].mxu1 }
 0x441   : > { %v8678_v19 = vadd.f32 %v5735_v37, %v3737_v53  ;;  %v3952_v47 = vadd.f32 %v5832_v36, %v8597_v4  ;;  %v3943_v9 = vpop.f32.mrb[1].mxu1 }
 0x442   : > { %v3944_v11 = vadd.f32 %v3943_v9, %v8591_v18  ;;  %v5833_v61 = vpop.f32.mrb[2].mxu1 }
 0x443   : > { %v5736_v41 = vpop.f32.mrb[28].mxu0  ;;  %v4072_v32 = vadd.f32 %v6081_v30, %v3952_v47  ;;  %v3955_v5 = vadd.f32 %v5833_v61, %v8600_v33  ;;  %v3946_v24 = vpop.f32.mrb[3].mxu1  ;;  %v6087_v47 = vld [vmem:[%s6491_s6 + $0x38] sm:$0xff] }
 0x444   : > { %v5737_v7 = vpop.f32.mrb[29].mxu0  ;;  %v4070_v12 = vadd.f32 %v6082_v63, %v3944_v11  ;;  %v3947_v4 = vadd.f32 %v3946_v24, %v8594_v45  ;;  %v6088_v11 = vld [vmem:[%s6491_s6 + $0x28] sm:$0xff] }
 0x445   : > { %v5738_v46 = vadd.f32 %v5737_v7, %v5736_v41  ;;  %v5739_v0 = vpop.f32.mrb[30].mxu0  ;;  %v4104_v44 = vmax.f32 %v4072_v32, 0.0  ;;  %v4073_v53 = vadd.f32 %v6083_v21, %v3955_v5  ;;  %v6089_v5 = vld [vmem:[%s6491_s6 + $0x50] sm:$0xff] }
 0x446   : > { %v5740_v56 = vpop.f32.mrb[31].mxu0  ;;  %v4102_v43 = vmax.f32 %v4070_v12, 0.0  ;;  %v4071_v49 = vadd.f32 %v6084_v58, %v3947_v4  ;;  %v6090_v12 = vld [vmem:[%s6491_s6 + $0x40] sm:$0xff] }
 0x447   : > { %v5741_v16 = vadd.f32 %v5740_v56, %v5739_v0  ;;  %v8687_v18 = vadd.f32 %v5738_v46, %v3742_v28  ;;  %4136 = vst [vmem:[%s8692_s11 + $0x10] sm:$0xff] %v4104_v44  ;;  %v4105_v45 = vmax.f32 %v4073_v53, 0.0  ;;  %v6091_v44 = vld [vmem:[%s6491_s6 + $0x58] sm:$0xff] }
 0x448   : > { %4134 = vst [vmem:[%s8692_s11] sm:$0xff] %v4102_v43  ;;  %v4103_v25 = vmax.f32 %v4071_v49, 0.0  ;;  %v5836_v57 = vpop.f32.mrb[4].mxu1  ;;  %v6092_v43 = vld [vmem:[%s6491_s6 + $0x48] sm:$0xff] }
 0x449   : > { %v8695_v33 = vadd.f32 %v5741_v16, %v3745_v40  ;;  %4137 = vst [vmem:[%s8692_s11 + $0x18] sm:$0xff] %v4105_v45  ;;  %v3968_v1 = vadd.f32 %v5836_v57, %v8609_v22  ;;  %v3959_v27 = vpop.f32.mrb[5].mxu1  ;;  %v6086_v40 = vld [vmem:[%s6491_s6 + $0x20] sm:$0xff] }
 0x44a   : > { %4135 = vst [vmem:[%s8692_s11 + $0x8] sm:$0xff] %v4103_v25  ;;  %v3960_v2 = vadd.f32 %v3959_v27, %v8603_v42  ;;  %v5837_v38 = vpop.f32.mrb[6].mxu1 }
 0x44b   : > { %v4076_v28 = vadd.f32 %v6085_v3, %v3968_v1  ;;  %v3971_v15 = vadd.f32 %v5837_v38, %v8612_v54  ;;  %v3962_v37 = vpop.f32.mrb[7].mxu1  ;;  %v6093_v1 = vld [vmem:[%s6491_s6 + $0x70] sm:$0xff]  ;;  %v6094_v3 = vld [vmem:[%s6491_s6 + $0x60] sm:$0xff] }
 0x44c   : > { %v4074_v36 = vadd.f32 %v6086_v40, %v3960_v2  ;;  %v3963_v41 = vadd.f32 %v3962_v37, %v8606_v62  ;;  %v6095_v37 = vld [vmem:[%s6491_s6 + $0x78] sm:$0xff] }
 0x44d   : > { %v4108_v22 = vmax.f32 %v4076_v28, 0.0  ;;  %v4077_v9 = vadd.f32 %v6087_v47, %v3971_v15 }
 0x44e   : > { %v4106_v7 = vmax.f32 %v4074_v36, 0.0  ;;  %v4075_v42 = vadd.f32 %v6088_v11, %v3963_v41  ;;  %v6096_v41 = vld [vmem:[%s6491_s6 + $0x68] sm:$0xff] }
 0x44f   : > { %4140 = vst [vmem:[%s8692_s11 + $0x30] sm:$0xff] %v4108_v22  ;;  %v4109_v61 = vmax.f32 %v4077_v9, 0.0 }
 0x450   : > { %4138 = vst [vmem:[%s8692_s11 + $0x20] sm:$0xff] %v4106_v7  ;;  %v4107_v46 = vmax.f32 %v4075_v42, 0.0  ;;  %v5840_v54 = vpop.f32.mrb[8].mxu1  ;;  %v6097_v42 = vld [vmem:[%s6491_s6 + $0x90] sm:$0xff] }
 0x451   : > { %4141 = vst [vmem:[%s8692_s11 + $0x38] sm:$0xff] %v4109_v61  ;;  %v3984_v0 = vadd.f32 %v5840_v54, %v8621_v14  ;;  %v3975_v30 = vpop.f32.mrb[9].mxu1 }
 0x452   : > { %4139 = vst [vmem:[%s8692_s11 + $0x28] sm:$0xff] %v4107_v46  ;;  %v3976_v62 = vadd.f32 %v3975_v30, %v8615_v51  ;;  %v5841_v32 = vpop.f32.mrb[10].mxu1 }
 0x453   : > { %v4080_v24 = vadd.f32 %v6089_v5, %v3984_v0  ;;  %v3987_v56 = vadd.f32 %v5841_v32, %v8624_v29  ;;  %v3978_v63 = vpop.f32.mrb[11].mxu1  ;;  %v6098_v0 = vld [vmem:[%s6491_s6 + $0x80] sm:$0xff]  ;;  %v6099_v32 = vld [vmem:[%s6491_s6 + $0x98] sm:$0xff] }
 0x454   : > { %v4078_v4 = vadd.f32 %v6090_v12, %v3976_v62  ;;  %v3979_v16 = vadd.f32 %v3978_v63, %v8618_v59 }
 0x455   : > { %v4112_v14 = vmax.f32 %v4080_v24, 0.0  ;;  %v4081_v21 = vadd.f32 %v6091_v44, %v3987_v56  ;;  %v6100_v56 = vld [vmem:[%s6491_s6 + $0x88] sm:$0xff]  ;;  %v6101_v44 = vld [vmem:[%s6491_s6 + $0xb0] sm:$0xff] }
 0x456   : > { %v4110_v53 = vmax.f32 %v4078_v4, 0.0  ;;  %v4079_v51 = vadd.f32 %v6092_v43, %v3979_v16 }
 0x457   : > { %4144 = vst [vmem:[%s8692_s11 + $0x50] sm:$0xff] %v4112_v14  ;;  %v4113_v58 = vmax.f32 %v4081_v21, 0.0 }
 0x458   : > { %4142 = vst [vmem:[%s8692_s11 + $0x40] sm:$0xff] %v4110_v53  ;;  %v4111_v49 = vmax.f32 %v4079_v51, 0.0  ;;  %v5844_v29 = vpop.f32.mrb[12].mxu1  ;;  %v6102_v51 = vld [vmem:[%s6491_s6 + $0xa0] sm:$0xff] }
 0x459   : > { %4145 = vst [vmem:[%s8692_s11 + $0x58] sm:$0xff] %v4113_v58  ;;  %v4000_v45 = vadd.f32 %v5844_v29, %v8633_v60  ;;  %v3991_v25 = vpop.f32.mrb[13].mxu1  ;;  %v6103_v29 = vld [vmem:[%s6491_s6 + $0xb8] sm:$0xff] }
 0x45a   : > { %4143 = vst [vmem:[%s8692_s11 + $0x48] sm:$0xff] %v4111_v49  ;;  %v3992_v59 = vadd.f32 %v3991_v25, %v8627_v35  ;;  %v5845_v57 = vpop.f32.mrb[14].mxu1 }
 0x45b   : > { %v4084_v27 = vadd.f32 %v6093_v1, %v4000_v45  ;;  %v4003_v2 = vadd.f32 %v5845_v57, %v8636_v10  ;;  %v3994_v38 = vpop.f32.mrb[15].mxu1 }
 0x45c   : > { %v4082_v28 = vadd.f32 %v6094_v3, %v3992_v59  ;;  %v3995_v15 = vadd.f32 %v3994_v38, %v8630_v39  ;;  %v6104_v59 = vld [vmem:[%s6491_s6 + $0xa8] sm:$0xff]  ;;  %v6105_v3 = vld [vmem:[%s6491_s6 + $0xd0] sm:$0xff] }
 0x45d   : > { %v4116_v60 = vmax.f32 %v4084_v27, 0.0  ;;  %v4085_v40 = vadd.f32 %v6095_v37, %v4003_v2  ;;  %v6106_v37 = vld [vmem:[%s6491_s6 + $0xc0] sm:$0xff] }
 0x45e   : > { %v4114_v36 = vmax.f32 %v4082_v28, 0.0  ;;  %v4083_v35 = vadd.f32 %v6096_v41, %v3995_v15  ;;  %v6107_v41 = vld [vmem:[%s6491_s6 + $0xd8] sm:$0xff] }
 0x45f   : > { %4148 = vst [vmem:[%s8692_s11 + $0x70] sm:$0xff] %v4116_v60  ;;  %v4117_v22 = vmax.f32 %v4085_v40, 0.0 }
 0x460   : > { %4146 = vst [vmem:[%s8692_s11 + $0x60] sm:$0xff] %v4114_v36  ;;  %v4115_v47 = vmax.f32 %v4083_v35, 0.0  ;;  %v5848_v10 = vpop.f32.mrb[16].mxu1 }
 0x461   : > { %4149 = vst [vmem:[%s8692_s11 + $0x78] sm:$0xff] %v4117_v22  ;;  %v4016_v9 = vadd.f32 %v5848_v10, %v8645_v20  ;;  %v4007_v7 = vpop.f32.mrb[17].mxu1 }
 0x462   : > { %4147 = vst [vmem:[%s8692_s11 + $0x68] sm:$0xff] %v4115_v47  ;;  %v4008_v39 = vadd.f32 %v4007_v7, %v8639_v13  ;;  %v5849_v11 = vpop.f32.mrb[18].mxu1  ;;  %v6108_v47 = vld [vmem:[%s6491_s6 + $0xc8] sm:$0xff] }
 0x463   : > { %v4088_v61 = vadd.f32 %v6097_v42, %v4016_v9  ;;  %v4019_v46 = vadd.f32 %v5849_v11, %v8648_v34  ;;  %v4010_v54 = vpop.f32.mrb[19].mxu1  ;;  %v6109_v42 = vld [vmem:[%s6491_s6 + $0xf0] sm:$0xff] }
 0x464   : > { %v4086_v30 = vadd.f32 %v6098_v0, %v4008_v39  ;;  %v4011_v62 = vadd.f32 %v4010_v54, %v8642_v23  ;;  %v6110_v0 = vld [vmem:[%s6491_s6 + $0xe0] sm:$0xff] }
 0x465   : > { %v4120_v20 = vmax.f32 %v4088_v61, 0.0  ;;  %v4089_v5 = vadd.f32 %v6099_v32, %v4019_v46 }
 0x466   : > { %v4118_v24 = vmax.f32 %v4086_v30, 0.0  ;;  %v4087_v13 = vadd.f32 %v6100_v56, %v4011_v62 }
 0x467   : > { %4152 = vst [vmem:[%s8692_s11 + $0x90] sm:$0xff] %v4120_v20  ;;  %v4121_v63 = vmax.f32 %v4089_v5, 0.0  ;;  %v6111_v20 = vld [vmem:[%s6491_s6 + $0xf8] sm:$0xff]  ;;  %v6112_v5 = vld [vmem:[%s6491_s6 + $0xe8] sm:$0xff] }
 0x468   : > { %4150 = vst [vmem:[%s8692_s11 + $0x80] sm:$0xff] %v4118_v24  ;;  %v4119_v12 = vmax.f32 %v4087_v13, 0.0  ;;  %v5852_v34 = vpop.f32.mrb[20].mxu1 }
 0x469   : > { %4153 = vst [vmem:[%s8692_s11 + $0x98] sm:$0xff] %v4121_v63  ;;  %v4032_v4 = vadd.f32 %v5852_v34, %v8657_v50  ;;  %v4023_v16 = vpop.f32.mrb[21].mxu1 }
 0x46a   : > { %4151 = vst [vmem:[%s8692_s11 + $0x88] sm:$0xff] %v4119_v12  ;;  %v4024_v23 = vadd.f32 %v4023_v16, %v8651_v31  ;;  %v5853_v14 = vpop.f32.mrb[22].mxu1 }
 0x46b   : > { %v4092_v21 = vadd.f32 %v6101_v44, %v4032_v4  ;;  %v4035_v53 = vadd.f32 %v5853_v14, %v8660_v48  ;;  %v4026_v43 = vpop.f32.mrb[23].mxu1 }
 0x46c   : > { %v4090_v58 = vadd.f32 %v6102_v51, %v4024_v23  ;;  %v4027_v49 = vadd.f32 %v4026_v43, %v8654_v26 }
 0x46d   : > { %v4124_v50 = vmax.f32 %v4092_v21, 0.0  ;;  %v4093_v45 = vadd.f32 %v6103_v29, %v4035_v53 }
 0x46e   : > { %v4122_v25 = vmax.f32 %v4090_v58, 0.0  ;;  %v4091_v31 = vadd.f32 %v6104_v59, %v4027_v49 }
 0x46f   : > { %4156 = vst [vmem:[%s8692_s11 + $0xb0] sm:$0xff] %v4124_v50  ;;  %v4125_v57 = vmax.f32 %v4093_v45, 0.0 }
 0x470   : > { %4154 = vst [vmem:[%s8692_s11 + $0xa0] sm:$0xff] %v4122_v25  ;;  %v4123_v1 = vmax.f32 %v4091_v31, 0.0  ;;  %v5856_v48 = vpop.f32.mrb[24].mxu1 }
 0x471   : > { %4157 = vst [vmem:[%s8692_s11 + $0xb8] sm:$0xff] %v4125_v57  ;;  %v4048_v27 = vadd.f32 %v5856_v48, %v8669_v6  ;;  %v4039_v2 = vpop.f32.mrb[25].mxu1 }
 0x472   : > { %4155 = vst [vmem:[%s8692_s11 + $0xa8] sm:$0xff] %v4123_v1  ;;  %v4040_v26 = vadd.f32 %v4039_v2, %v8663_v52  ;;  %v5857_v38 = vpop.f32.mrb[26].mxu1 }
 0x473   : > { %v4096_v28 = vadd.f32 %v6105_v3, %v4048_v27  ;;  %v4051_v15 = vadd.f32 %v5857_v38, %v8672_v55  ;;  %v4042_v60 = vpop.f32.mrb[27].mxu1 }
 0x474   : > { %v4094_v40 = vadd.f32 %v6106_v37, %v4040_v26  ;;  %v4043_v36 = vadd.f32 %v4042_v60, %v8666_v8 }
 0x475   : > { %v4128_v6 = vmax.f32 %v4096_v28, 0.0  ;;  %v4097_v35 = vadd.f32 %v6107_v41, %v4051_v15 }
 0x476   : > { %v4126_v22 = vmax.f32 %v4094_v40, 0.0  ;;  %v4095_v52 = vadd.f32 %v6108_v47, %v4043_v36 }
 0x477   : > { %4160 = vst [vmem:[%s8692_s11 + $0xd0] sm:$0xff] %v4128_v6  ;;  %v4129_v10 = vmax.f32 %v4097_v35, 0.0 }
 0x478   : > { %4158 = vst [vmem:[%s8692_s11 + $0xc0] sm:$0xff] %v4126_v22  ;;  %v4127_v55 = vmax.f32 %v4095_v52, 0.0  ;;  %v5860_v9 = vpop.f32.mrb[28].mxu1 }
 0x479   : > { %4161 = vst [vmem:[%s8692_s11 + $0xd8] sm:$0xff] %v4129_v10  ;;  %v4064_v7 = vadd.f32 %v5860_v9, %v8687_v18  ;;  %v4055_v8 = vpop.f32.mrb[29].mxu1 }
 0x47a   : > { %4159 = vst [vmem:[%s8692_s11 + $0xc8] sm:$0xff] %v4127_v55  ;;  %v4056_v39 = vadd.f32 %v4055_v8, %v8675_v17  ;;  %v5861_v11 = vpop.f32.mrb[30].mxu1 }
 0x47b   : > { %v4100_v61 = vadd.f32 %v6109_v42, %v4064_v7  ;;  %v4067_v46 = vadd.f32 %v5861_v11, %v8695_v33  ;;  %v4058_v54 = vpop.f32.mrb[31].mxu1 }
 0x47c   : > { %v4098_v30 = vadd.f32 %v6110_v0, %v4056_v39  ;;  %v4059_v62 = vadd.f32 %v4058_v54, %v8678_v19 }
 0x47d   : > { %v4132_v18 = vmax.f32 %v4100_v61, 0.0  ;;  %v4101_v17 = vadd.f32 %v6111_v20, %v4067_v46 }
 0x47e   : > { %v4130_v32 = vmax.f32 %v4098_v30, 0.0  ;;  %v4099_v24 = vadd.f32 %v6112_v5, %v4059_v62 }
 0x47f   : > { %4164 = vst [vmem:[%s8692_s11 + $0xf0] sm:$0xff] %v4132_v18  ;;  %v4133_v33 = vmax.f32 %v4101_v17, 0.0 }
 0x480   : > { %4162 = vst [vmem:[%s8692_s11 + $0xe0] sm:$0xff] %v4130_v32  ;;  %v4131_v19 = vmax.f32 %v4099_v24, 0.0 }
 0x481   : > { %4165 = vst [vmem:[%s8692_s11 + $0xf8] sm:$0xff] %v4133_v33 }
 0x482   : > { %4163 = vst [vmem:[%s8692_s11 + $0xe8] sm:$0xff] %v4131_v19 }
 0x483   : > { %6212 = shalt.err (!%p6209_p2)
}
 0x484   : > { %s6213_s6 = scalar_lea.hbm %s8786_s9, 4096  ;;  %s6217_s8 = scalar_lea.hbm %s8840_s5, 8192 }
 0x485   : > { %p6214_p13 = scmp.ne.s32.totalorder %s8786_s9, %s6213_s6  ;;  %p6218_p4 = scmp.lt.u32.totalorder %s8786_s9, %s8840_s5 }
 0x486   : > { %p6219_p5 = scmp.lt.u32.totalorder %s6217_s8, %s6213_s6  ;;  %p6221_p11 = scmp.lt.u32.totalorder %s6213_s6, %s8786_s9 }
 0x487   : > { %p6215_p6 = pnand %p6214_p13, %p9072_p0 }
 0x488   : > { %p6220_p8 = por %p6219_p5, %p6218_p4 }
 0x489   : > { %p6216_p10 = pneg %p6215_p6 }
 0x48a   : > { %p6222_p1 = por %p6221_p11, %p6220_p8 }
 0x48c   : > { %p6223_p3 = pnand %p6222_p1, %p6216_p10 }
 0x48e   : > { %6226 = shalt.err (!%p6223_p3)
}
 0x48f   : > { %s6281_s28 = smov 128   ;;  %s6282_s15 = smov 8  }
 0x490   : > { %5872 = dma.vmem_to_hbm [thread:$0]  (%p9072_p0), %s8788_s30, 4096, %s8786_s9, %s4167_s22, %s6281_s28, %s6281_s28, %s6282_s15  }
 0x491 PF: > { %s4195_s16 = sand.u32 1, %s6257_s18   ;;  %p9073_p7 = scmp.ne.s32.totalorder %s8876_s25, 0 }
 0x492   : > { %p9074_p9 = scmp.ge.s32.totalorder %s6269_s21, 2  ;;  %s4196_s12 = scalar_lea.sflag [#allocation4], %s4195_s16 }
 0x494   : > { %p5886_p12 = pnand %p9074_p9, %p9073_p7 }
 0x496   : > { %6252 = dma.done.wait (!%p5886_p12), %s4196_s12, 4096  }
 0x497   : > { %6254 = vsyncadd (!%p5886_p12), %s4196_s12, 4294963200  ;;  %p19_p2 = scmp.ge.s32.totalorder %s6423_s14, 4   ;;  %s9075_s18 = smov %s6261_s19 }
 0x498   : > { %s9076_s19 = smov %s6265_s20  ;;  %s9077_s20 = smov %s6439_s27 }
 0x499   : > { %s9078_s21 = smov %s6423_s14  ;;  %21 = sbr.rel (!%p19_p2) target bundleno = 6 (0x6), region = 93 }
 0x4a0   :  { %4201 = vsyncpa [#allocation3], 1 }
 0x4a1   :  { %4203 = vsyncpa [#allocation3 + $0x1], 1 }
 0x4a2   :  { %4204 = vsyncpa [#allocation6], 1 }
 0x4a3   :  { %4205 = vsyncpa [#allocation4], 1 }
 0x4a4   :  { %4207 = vsyncpa [#allocation4 + $0x1], 1 }

</bundles_post_ra>
